<compile_context>
chip_gen: v5e
topology: v5e:2x2
jax: 0.10.0
libtpu: 0.0.40
codegen_flags: <defaults>
</compile_context>

<pallas_src>
import functools

import jax
import jax.numpy as jnp
from jax.experimental import pallas as pl
from jax.experimental.pallas import tpu as pltpu


def _round_up(x, m):
    return ((x + m - 1) // m) * m


# ---------------------------------------------------------------------------
# Shared epilogue: layer-0 bias/ReLU + fused layers 1..L (registers/VMEM only).
# ---------------------------------------------------------------------------
def _tail_layers(y0, wb, o_ref, n_layers):
    if n_layers == 0:
        o_ref[...] = y0.astype(o_ref.dtype)
        return
    x = jnp.maximum(y0, 0.0).astype(jnp.bfloat16)  # single bf16 downcast / layer
    for l in range(1, n_layers + 1):
        w = wb[2 * l][...]
        b = wb[2 * l + 1][...]
        y = jnp.dot(x, w, preferred_element_type=jnp.float32) + b
        if l < n_layers:
            x = jnp.maximum(y, 0.0).astype(jnp.bfloat16)
        else:
            o_ref[...] = y.astype(o_ref.dtype)


# ---------------------------------------------------------------------------
# Fully fused kernel (layer-0 weight entirely VMEM-resident), grid = (m,).
# refs = (w0, b0, w1, b1, ..., wL, bL, out_ref). x_ref is bf16.
# ---------------------------------------------------------------------------
def _fused_mlp_kernel(x_ref, *refs, n_layers):
    o_ref = refs[-1]
    wb = refs[:-1]
    y0 = jnp.dot(x_ref[...], wb[0][...],
                 preferred_element_type=jnp.float32) + wb[1][...]
    _tail_layers(y0, wb, o_ref, n_layers)


# ---------------------------------------------------------------------------
# K-tiled kernel (layer-0 weight streamed over a trailing grid axis),
# grid = (m, k). refs = (w0, b0, ..., wL, bL, out_ref, acc_ref).
# ---------------------------------------------------------------------------
def _ktiled_mlp_kernel(x_ref, *refs, n_layers):
    o_ref, acc_ref = refs[-2], refs[-1]
    wb = refs[:-2]
    k = pl.program_id(1)

    @pl.when(k == 0)
    def _():
        acc_ref[...] = jnp.zeros_like(acc_ref)

    acc_ref[...] += jnp.dot(x_ref[...], wb[0][...],
                            preferred_element_type=jnp.float32)

    @pl.when(k == pl.num_programs(1) - 1)
    def _():
        _tail_layers(acc_ref[...] + wb[1][...], wb, o_ref, n_layers)


# ---------------------------------------------------------------------------
# Parameter init (deterministic, nn.Linear default scale). Every dim is
# zero-padded to a multiple of 128; weights stored bf16, biases f32 (1, N).
# Padded rows/cols are zero, so padded lanes stay exactly 0 through bias+ReLU.
# ---------------------------------------------------------------------------
def init_imlp_params(key, img_size, n_classes, n_layers):
    in_dim = img_size * img_size * 3
    dims = [in_dim // (2 ** l) for l in range(n_layers + 1)] + [n_classes]
    pad_dims = [_round_up(d, 128) for d in dims]

    params = []
    for l in range(n_layers + 1):
        k_in, k_out = dims[l], dims[l + 1]
        kp_in, kp_out = pad_dims[l], pad_dims[l + 1]
        key, kw, kb = jax.random.split(key, 3)
        bound = 1.0 / (float(k_in) ** 0.5)  # U(-1/sqrt(fan_in), 1/sqrt(fan_in))
        w = jax.random.uniform(kw, (k_in, k_out), jnp.float32, -bound, bound)
        b = jax.random.uniform(kb, (k_out,), jnp.float32, -bound, bound)
        w_pad = jnp.zeros((kp_in, kp_out), jnp.float32).at[:k_in, :k_out].set(w)
        b_pad = jnp.zeros((1, kp_out), jnp.float32).at[0, :k_out].set(b)
        params.append((w_pad.astype(jnp.bfloat16), b_pad))

    meta = dict(dims=dims, pad_dims=pad_dims, n_layers=n_layers,
                n_classes=n_classes, in_dim=in_dim)
    return params, meta


# ---------------------------------------------------------------------------
# Pick the layer-0 K tile so all resident buffers fit a conservative VMEM
# budget (safe on v7x's 64 MiB physical) and derive an explicit vmem limit.
# ---------------------------------------------------------------------------
def _select_k_tile(pad_dims, tm, n_layers):
    k0, n1, n_out = pad_dims[0], pad_dims[1], pad_dims[-1]
    rest_w = sum(pad_dims[l] * pad_dims[l + 1] * 2 for l in range(1, n_layers + 1))
    biases = sum(pad_dims[l + 1] * 4 for l in range(n_layers + 1))
    # out tile double-buffered (f32) + f32 accumulator scratch
    fixed = rest_w + biases + tm * n_out * 4 * 2 + tm * n1 * 4

    def footprint(tk, nk):
        w0_bufs = 1 if nk == 1 else 2          # constant block -> single buffer
        return fixed + tm * tk * 2 * 2 + tk * n1 * 2 * w0_bufs

    budget = 46 << 20                          # fits every chip incl. v7x (64 MiB)
    nblk = k0 // 128
    tk = 128
    for nk in range(1, nblk + 1):
        if nblk % nk:
            continue
        t = k0 // nk
        if footprint(t, nk) <= budget:
            tk = t
            break
    nk = k0 // tk
    # TODO(synk): if `fixed` alone exceeds the budget (very deep/wide readouts)
    # layers >= 1 would need streaming too; not reachable for iMLP-sized nets.
    vmem_limit = max(32 << 20, footprint(tk, nk) + (4 << 20))
    return tk, vmem_limit


# ---------------------------------------------------------------------------
# Forward pass: one fused pallas_call over a batch-tiled (optionally K-tiled)
# grid. Returns (logits, None) like the PyTorch module.
# ---------------------------------------------------------------------------
def imlp_forward(params, meta, img):
    num_imgs = img.shape[0]
    in_dim = meta["in_dim"]
    pad_dims = meta["pad_dims"]
    n_layers = meta["n_layers"]
    n_classes = meta["n_classes"]

    K0, N1, n_out_pad = pad_dims[0], pad_dims[1], pad_dims[-1]

    # torch-style .view(num_imgs, -1) flatten; stream to the kernel as bf16.
    x = img.reshape(num_imgs, -1).astype(jnp.bfloat16)

    # --- batch tiling: aim for >= 2 tiles so both v7x TensorCores get work ---
    M = num_imgs
    TM_CAP = 512
    m_aligned = _round_up(max(M, 1), 8)
    if m_aligned <= 16:
        TM = m_aligned
    elif m_aligned <= 2 * TM_CAP:
        TM = _round_up((m_aligned + 1) // 2, 8)
    else:
        TM = TM_CAP
    M_pad = _round_up(M, TM)
    grid_m = M_pad // TM

    # --- layer-0 K tiling + explicit VMEM limit from actual footprint --------
    TK, vmem_limit = _select_k_tile(pad_dims, TM, n_layers)
    grid_k = K0 // TK

    # Single fused bf16 pad; skipped entirely when shapes already line up.
    if M_pad == M and K0 == in_dim:
        x_pad = x
    else:
        x_pad = jnp.pad(x, ((0, M_pad - M), (0, K0 - in_dim)))

    flat_wb = []
    for w, b in params:
        flat_wb.extend([w, b])

    # Advisory cost estimate for the XLA scheduler.
    flops = 2 * M_pad * sum(pad_dims[l] * pad_dims[l + 1]
                            for l in range(n_layers + 1))
    w_bytes = sum(w.size * 2 for w, _ in params)
    b_bytes = sum(b.size * 4 for _, b in params)
    w0_refetch = (grid_m - 1) * params[0][0].size * 2 if grid_k > 1 else 0
    bytes_accessed = (x_pad.size * 2 + w_bytes + b_bytes + w0_refetch
                      + M_pad * n_out_pad * 4)

    def _run(single_buffer_consts):
        const_mode = {}
        if single_buffer_consts and hasattr(pl, "Buffered"):
            # Constant index_map -> double-buffering buys nothing; halve VMEM.
            const_mode = dict(pipeline_mode=pl.Buffered(1))

        if grid_k == 1:
            grid = (grid_m,)
            x_spec = pl.BlockSpec((TM, K0), lambda i: (i, 0))
            w0_spec = pl.BlockSpec((K0, N1), lambda i: (0, 0), **const_mode)
            const_map = lambda i: (0, 0)
            out_spec = pl.BlockSpec((TM, n_out_pad), lambda i: (i, 0))
            kernel = functools.partial(_fused_mlp_kernel, n_layers=n_layers)
            scratch = []
            dim_sem = ("parallel",)
        else:
            grid = (grid_m, grid_k)
            x_spec = pl.BlockSpec((TM, TK), lambda i, k: (i, k))
            w0_spec = pl.BlockSpec((TK, N1), lambda i, k: (k, 0))
            const_map = lambda i, k: (0, 0)
            out_spec = pl.BlockSpec((TM, n_out_pad), lambda i, k: (i, 0))
            kernel = functools.partial(_ktiled_mlp_kernel, n_layers=n_layers)
            scratch = [pltpu.VMEM((TM, N1), jnp.float32)]
            dim_sem = ("parallel", "arbitrary")

        in_specs = [x_spec, w0_spec,
                    pl.BlockSpec(params[0][1].shape, const_map, **const_mode)]
        for w, b in params[1:]:
            in_specs.append(pl.BlockSpec(w.shape, const_map, **const_mode))
            in_specs.append(pl.BlockSpec(b.shape, const_map, **const_mode))

        return pl.pallas_call(
            kernel,
            out_shape=jax.ShapeDtypeStruct((M_pad, n_out_pad), jnp.float32),
            grid=grid,
            in_specs=in_specs,
            out_specs=out_spec,
            scratch_shapes=scratch,
            compiler_params=pltpu.CompilerParams(
                dimension_semantics=dim_sem,
                vmem_limit_bytes=int(vmem_limit)),
            cost_estimate=pl.CostEstimate(
                flops=int(flops), transcendentals=0,
                bytes_accessed=int(bytes_accessed)),
        )(x_pad, *flat_wb)

    try:
        logits_pad = _run(True)
    except Exception:
        # Fallback for jax versions without BlockSpec pipeline_mode support.
        logits_pad = _run(False)

    logits = logits_pad[:M, :n_classes]
    return logits, None


# ---------------------------------------------------------------------------
# Pure-JAX reference (same bf16 weights / bf16 intermediate activations as the
# kernel, f32 accumulation) for a structural correctness check.
# ---------------------------------------------------------------------------
def _ref_forward(params, meta, img):
    m = img.shape[0]
    x = jnp.zeros((m, meta["pad_dims"][0]), jnp.float32)
    x = x.at[:, :meta["in_dim"]].set(
        img.reshape(m, -1).astype(jnp.bfloat16).astype(jnp.float32))
    y = None
    for l, (w, b) in enumerate(params):
        y = x @ w.astype(jnp.float32) + b
        if l < meta["n_layers"]:
            x = jnp.maximum(y, 0.0).astype(jnp.bfloat16).astype(jnp.float32)
    return y[:, :meta["n_classes"]]


# ---------------------------------------------------------------------------
if __name__ == "__main__":
    # Small config consistent with the module: img_size=16 -> in_dim = 768
    batch = 2
    img_size = 16
    n_classes = 10
    n_layers = 2  # 768 -> 384 -> 192 -> 10  (padded: 768 -> 384 -> 256 -> 128)

    key = jax.random.PRNGKey(0)
    key, k_img = jax.random.split(key)
    img = jax.random.normal(k_img, (batch, 3, img_size, img_size), jnp.float32)

    params, meta = init_imlp_params(key, img_size, n_classes, n_layers)

    logits, adj = imlp_forward(params, meta, img)
    logits = jax.block_until_ready(logits)

    assert logits.shape == (batch, n_classes)
    assert bool(jnp.all(jnp.isfinite(logits)))
    assert adj is None

    ref = _ref_forward(params, meta, img)
    assert bool(jnp.allclose(logits, ref, atol=2e-2, rtol=2e-2))

    print("KERNEL_OK")
</pallas_src>

<mosaic_0001>
module attributes {stable_mosaic.version = 11 : i64} {
  func.func @_fused_mlp_kernel(%arg0: i32, %arg1: memref<8x768xbf16, #tpu.memory_space<vmem>>, %arg2: memref<768x384xbf16, #tpu.memory_space<vmem>>, %arg3: memref<1x384xf32, #tpu.memory_space<vmem>>, %arg4: memref<384x256xbf16, #tpu.memory_space<vmem>>, %arg5: memref<1x256xf32, #tpu.memory_space<vmem>>, %arg6: memref<256x128xbf16, #tpu.memory_space<vmem>>, %arg7: memref<1x128xf32, #tpu.memory_space<vmem>>, %arg8: memref<8x128xf32, #tpu.memory_space<vmem>>) attributes {dimension_semantics = [#tpu.dimension_semantics<parallel>], iteration_bounds = array<i64: 1>, scalar_prefetch = 0 : i64, scratch_operands = 0 : i64, tpu.core_type = #tpu.core_type<tc>, window_params = [{transform_indices = @transform_0, window_bounds = array<i64: 8, 768>}, {pipeline_mode = #tpu.pipeline_mode<synchronous>, transform_indices = @transform_1, window_bounds = array<i64: 768, 384>}, {pipeline_mode = #tpu.pipeline_mode<synchronous>, transform_indices = @transform_2, window_bounds = array<i64: 1, 384>}, {pipeline_mode = #tpu.pipeline_mode<synchronous>, transform_indices = @transform_3, window_bounds = array<i64: 384, 256>}, {pipeline_mode = #tpu.pipeline_mode<synchronous>, transform_indices = @transform_4, window_bounds = array<i64: 1, 256>}, {pipeline_mode = #tpu.pipeline_mode<synchronous>, transform_indices = @transform_5, window_bounds = array<i64: 256, 128>}, {pipeline_mode = #tpu.pipeline_mode<synchronous>, transform_indices = @transform_6, window_bounds = array<i64: 1, 128>}, {transform_indices = @transform_7, window_bounds = array<i64: 8, 128>}]} {
    %c0 = arith.constant 0 : index
    %c0_0 = arith.constant 0 : index
    %0 = vector.load %arg1[%c0, %c0_0] : memref<8x768xbf16, #tpu.memory_space<vmem>>, vector<8x768xbf16>
    %c0_1 = arith.constant 0 : index
    %c0_2 = arith.constant 0 : index
    %1 = vector.load %arg2[%c0_1, %c0_2] : memref<768x384xbf16, #tpu.memory_space<vmem>>, vector<768x384xbf16>
    %cst = arith.constant dense<0.000000e+00> : vector<8x384xf32>
    %2 = tpu.matmul %0, %1, %cst {dimension_numbers = #tpu.dot_dimension_numbers<[1], [0], [0], [1], [0, 0, 1, 1], [], []>} : vector<8x768xbf16>, vector<768x384xbf16>, vector<8x384xf32> -> vector<8x384xf32>
    %c0_3 = arith.constant 0 : index
    %c0_4 = arith.constant 0 : index
    %3 = vector.load %arg3[%c0_3, %c0_4] : memref<1x384xf32, #tpu.memory_space<vmem>>, vector<1x384xf32>
    %4 = vector.broadcast %3 : vector<1x384xf32> to vector<8x384xf32>
    %5 = arith.addf %2, %4 : vector<8x384xf32>
    %cst_5 = arith.constant 0.000000e+00 : f32
    %6 = vector.broadcast %cst_5 : f32 to vector<8x384xf32>
    %7 = arith.maximumf %5, %6 : vector<8x384xf32>
    %8 = arith.truncf %7 : vector<8x384xf32> to vector<8x384xbf16>
    %c0_6 = arith.constant 0 : index
    %c0_7 = arith.constant 0 : index
    %9 = vector.load %arg4[%c0_6, %c0_7] : memref<384x256xbf16, #tpu.memory_space<vmem>>, vector<384x256xbf16>
    %c0_8 = arith.constant 0 : index
    %c0_9 = arith.constant 0 : index
    %10 = vector.load %arg5[%c0_8, %c0_9] : memref<1x256xf32, #tpu.memory_space<vmem>>, vector<1x256xf32>
    %cst_10 = arith.constant dense<0.000000e+00> : vector<8x256xf32>
    %11 = tpu.matmul %8, %9, %cst_10 {dimension_numbers = #tpu.dot_dimension_numbers<[1], [0], [0], [1], [0, 0, 1, 1], [], []>} : vector<8x384xbf16>, vector<384x256xbf16>, vector<8x256xf32> -> vector<8x256xf32>
    %12 = vector.broadcast %10 : vector<1x256xf32> to vector<8x256xf32>
    %13 = arith.addf %11, %12 : vector<8x256xf32>
    %cst_11 = arith.constant 0.000000e+00 : f32
    %14 = vector.broadcast %cst_11 : f32 to vector<8x256xf32>
    %15 = arith.maximumf %13, %14 : vector<8x256xf32>
    %16 = arith.truncf %15 : vector<8x256xf32> to vector<8x256xbf16>
    %c0_12 = arith.constant 0 : index
    %c0_13 = arith.constant 0 : index
    %17 = vector.load %arg6[%c0_12, %c0_13] : memref<256x128xbf16, #tpu.memory_space<vmem>>, vector<256x128xbf16>
    %c0_14 = arith.constant 0 : index
    %c0_15 = arith.constant 0 : index
    %18 = vector.load %arg7[%c0_14, %c0_15] : memref<1x128xf32, #tpu.memory_space<vmem>>, vector<1x128xf32>
    %cst_16 = arith.constant dense<0.000000e+00> : vector<8x128xf32>
    %19 = tpu.matmul %16, %17, %cst_16 {dimension_numbers = #tpu.dot_dimension_numbers<[1], [0], [0], [1], [0, 0, 1, 1], [], []>} : vector<8x256xbf16>, vector<256x128xbf16>, vector<8x128xf32> -> vector<8x128xf32>
    %20 = vector.broadcast %18 : vector<1x128xf32> to vector<8x128xf32>
    %21 = arith.addf %19, %20 : vector<8x128xf32>
    %c0_17 = arith.constant 0 : index
    %c0_18 = arith.constant 0 : index
    %22 = vector.load %arg8[%c0_17, %c0_18] : memref<8x128xf32, #tpu.memory_space<vmem>>, vector<8x128xf32>
    tpu.vector_store %arg8[%c0_17, %c0_18], %21 {strides = array<i32>} : memref<8x128xf32, #tpu.memory_space<vmem>>, vector<8x128xf32>,
    return
  }
  func.func @transform_0(%arg0: i32) -> (i32, i32) {
    %c0_i32 = arith.constant 0 : i32
    %c0_i32_0 = arith.constant 0 : i32
    return %arg0, %c0_i32 : i32, i32
  }
  func.func @transform_1(%arg0: i32) -> (i32, i32) {
    %c0_i32 = arith.constant 0 : i32
    %c0_i32_0 = arith.constant 0 : i32
    %c0_i32_1 = arith.constant 0 : i32
    return %c0_i32, %c0_i32_0 : i32, i32
  }
  func.func @transform_2(%arg0: i32) -> (i32, i32) {
    %c0_i32 = arith.constant 0 : i32
    %c0_i32_0 = arith.constant 0 : i32
    %c0_i32_1 = arith.constant 0 : i32
    return %c0_i32, %c0_i32_0 : i32, i32
  }
  func.func @transform_3(%arg0: i32) -> (i32, i32) {
    %c0_i32 = arith.constant 0 : i32
    %c0_i32_0 = arith.constant 0 : i32
    %c0_i32_1 = arith.constant 0 : i32
    return %c0_i32, %c0_i32_0 : i32, i32
  }
  func.func @transform_4(%arg0: i32) -> (i32, i32) {
    %c0_i32 = arith.constant 0 : i32
    %c0_i32_0 = arith.constant 0 : i32
    %c0_i32_1 = arith.constant 0 : i32
    return %c0_i32, %c0_i32_0 : i32, i32
  }
  func.func @transform_5(%arg0: i32) -> (i32, i32) {
    %c0_i32 = arith.constant 0 : i32
    %c0_i32_0 = arith.constant 0 : i32
    %c0_i32_1 = arith.constant 0 : i32
    return %c0_i32, %c0_i32_0 : i32, i32
  }
  func.func @transform_6(%arg0: i32) -> (i32, i32) {
    %c0_i32 = arith.constant 0 : i32
    %c0_i32_0 = arith.constant 0 : i32
    %c0_i32_1 = arith.constant 0 : i32
    return %c0_i32, %c0_i32_0 : i32, i32
  }
  func.func @transform_7(%arg0: i32) -> (i32, i32) {
    %c0_i32 = arith.constant 0 : i32
    %c0_i32_0 = arith.constant 0 : i32
    return %arg0, %c0_i32 : i32, i32
  }
}

module attributes {stable_mosaic.version = 11 : i64} {
  func.func @_fused_mlp_kernel(%arg0: i32, %arg1: memref<8x768xbf16, #tpu.memory_space<vmem>>, %arg2: memref<768x384xbf16, #tpu.memory_space<vmem>>, %arg3: memref<1x384xf32, #tpu.memory_space<vmem>>, %arg4: memref<384x256xbf16, #tpu.memory_space<vmem>>, %arg5: memref<1x256xf32, #tpu.memory_space<vmem>>, %arg6: memref<256x128xbf16, #tpu.memory_space<vmem>>, %arg7: memref<1x128xf32, #tpu.memory_space<vmem>>, %arg8: memref<8x128xf32, #tpu.memory_space<vmem>>) attributes {dimension_semantics = [#tpu.dimension_semantics<parallel>], iteration_bounds = array<i64: 1>, scalar_prefetch = 0 : i64, scratch_operands = 0 : i64, tpu.core_type = #tpu.core_type<tc>, window_params = [{transform_indices = @transform_0, window_bounds = array<i64: 8, 768>}, {pipeline_mode = #tpu.pipeline_mode<synchronous>, transform_indices = @transform_1, window_bounds = array<i64: 768, 384>}, {pipeline_mode = #tpu.pipeline_mode<synchronous>, transform_indices = @transform_2, window_bounds = array<i64: 1, 384>}, {pipeline_mode = #tpu.pipeline_mode<synchronous>, transform_indices = @transform_3, window_bounds = array<i64: 384, 256>}, {pipeline_mode = #tpu.pipeline_mode<synchronous>, transform_indices = @transform_4, window_bounds = array<i64: 1, 256>}, {pipeline_mode = #tpu.pipeline_mode<synchronous>, transform_indices = @transform_5, window_bounds = array<i64: 256, 128>}, {pipeline_mode = #tpu.pipeline_mode<synchronous>, transform_indices = @transform_6, window_bounds = array<i64: 1, 128>}, {transform_indices = @transform_7, window_bounds = array<i64: 8, 128>}]} {
    %c0 = arith.constant 0 : index
    %c0_0 = arith.constant 0 : index
    %0 = vector.load %arg1[%c0, %c0_0] : memref<8x768xbf16, #tpu.memory_space<vmem>>, vector<8x768xbf16>
    %c0_1 = arith.constant 0 : index
    %c0_2 = arith.constant 0 : index
    %1 = vector.load %arg2[%c0_1, %c0_2] : memref<768x384xbf16, #tpu.memory_space<vmem>>, vector<768x384xbf16>
    %cst = arith.constant dense<0.000000e+00> : vector<8x384xf32>
    %2 = tpu.matmul %0, %1, %cst {dimension_numbers = #tpu.dot_dimension_numbers<[1], [0], [0], [1], [0, 0, 1, 1], [], []>} : vector<8x768xbf16>, vector<768x384xbf16>, vector<8x384xf32> -> vector<8x384xf32>
    %c0_3 = arith.constant 0 : index
    %c0_4 = arith.constant 0 : index
    %3 = vector.load %arg3[%c0_3, %c0_4] : memref<1x384xf32, #tpu.memory_space<vmem>>, vector<1x384xf32>
    %4 = vector.broadcast %3 : vector<1x384xf32> to vector<8x384xf32>
    %5 = arith.addf %2, %4 : vector<8x384xf32>
    %cst_5 = arith.constant 0.000000e+00 : f32
    %6 = vector.broadcast %cst_5 : f32 to vector<8x384xf32>
    %7 = arith.maximumf %5, %6 : vector<8x384xf32>
    %8 = arith.truncf %7 : vector<8x384xf32> to vector<8x384xbf16>
    %c0_6 = arith.constant 0 : index
    %c0_7 = arith.constant 0 : index
    %9 = vector.load %arg4[%c0_6, %c0_7] : memref<384x256xbf16, #tpu.memory_space<vmem>>, vector<384x256xbf16>
    %c0_8 = arith.constant 0 : index
    %c0_9 = arith.constant 0 : index
    %10 = vector.load %arg5[%c0_8, %c0_9] : memref<1x256xf32, #tpu.memory_space<vmem>>, vector<1x256xf32>
    %cst_10 = arith.constant dense<0.000000e+00> : vector<8x256xf32>
    %11 = tpu.matmul %8, %9, %cst_10 {dimension_numbers = #tpu.dot_dimension_numbers<[1], [0], [0], [1], [0, 0, 1, 1], [], []>} : vector<8x384xbf16>, vector<384x256xbf16>, vector<8x256xf32> -> vector<8x256xf32>
    %12 = vector.broadcast %10 : vector<1x256xf32> to vector<8x256xf32>
    %13 = arith.addf %11, %12 : vector<8x256xf32>
    %cst_11 = arith.constant 0.000000e+00 : f32
    %14 = vector.broadcast %cst_11 : f32 to vector<8x256xf32>
    %15 = arith.maximumf %13, %14 : vector<8x256xf32>
    %16 = arith.truncf %15 : vector<8x256xf32> to vector<8x256xbf16>
    %c0_12 = arith.constant 0 : index
    %c0_13 = arith.constant 0 : index
    %17 = vector.load %arg6[%c0_12, %c0_13] : memref<256x128xbf16, #tpu.memory_space<vmem>>, vector<256x128xbf16>
    %c0_14 = arith.constant 0 : index
    %c0_15 = arith.constant 0 : index
    %18 = vector.load %arg7[%c0_14, %c0_15] : memref<1x128xf32, #tpu.memory_space<vmem>>, vector<1x128xf32>
    %cst_16 = arith.constant dense<0.000000e+00> : vector<8x128xf32>
    %19 = tpu.matmul %16, %17, %cst_16 {dimension_numbers = #tpu.dot_dimension_numbers<[1], [0], [0], [1], [0, 0, 1, 1], [], []>} : vector<8x256xbf16>, vector<256x128xbf16>, vector<8x128xf32> -> vector<8x128xf32>
    %20 = vector.broadcast %18 : vector<1x128xf32> to vector<8x128xf32>
    %21 = arith.addf %19, %20 : vector<8x128xf32>
    %c0_17 = arith.constant 0 : index
    %c0_18 = arith.constant 0 : index
    %22 = vector.load %arg8[%c0_17, %c0_18] : memref<8x128xf32, #tpu.memory_space<vmem>>, vector<8x128xf32>
    tpu.vector_store %arg8[%c0_17, %c0_18], %21 {strides = array<i32>} : memref<8x128xf32, #tpu.memory_space<vmem>>, vector<8x128xf32>,
    return
  }
  func.func @transform_0(%arg0: i32) -> (i32, i32) {
    %c0_i32 = arith.constant 0 : i32
    %c0_i32_0 = arith.constant 0 : i32
    return %arg0, %c0_i32 : i32, i32
  }
  func.func @transform_1(%arg0: i32) -> (i32, i32) {
    %c0_i32 = arith.constant 0 : i32
    %c0_i32_0 = arith.constant 0 : i32
    %c0_i32_1 = arith.constant 0 : i32
    return %c0_i32, %c0_i32_0 : i32, i32
  }
  func.func @transform_2(%arg0: i32) -> (i32, i32) {
    %c0_i32 = arith.constant 0 : i32
    %c0_i32_0 = arith.constant 0 : i32
    %c0_i32_1 = arith.constant 0 : i32
    return %c0_i32, %c0_i32_0 : i32, i32
  }
  func.func @transform_3(%arg0: i32) -> (i32, i32) {
    %c0_i32 = arith.constant 0 : i32
    %c0_i32_0 = arith.constant 0 : i32
    %c0_i32_1 = arith.constant 0 : i32
    return %c0_i32, %c0_i32_0 : i32, i32
  }
  func.func @transform_4(%arg0: i32) -> (i32, i32) {
    %c0_i32 = arith.constant 0 : i32
    %c0_i32_0 = arith.constant 0 : i32
    %c0_i32_1 = arith.constant 0 : i32
    return %c0_i32, %c0_i32_0 : i32, i32
  }
  func.func @transform_5(%arg0: i32) -> (i32, i32) {
    %c0_i32 = arith.constant 0 : i32
    %c0_i32_0 = arith.constant 0 : i32
    %c0_i32_1 = arith.constant 0 : i32
    return %c0_i32, %c0_i32_0 : i32, i32
  }
  func.func @transform_6(%arg0: i32) -> (i32, i32) {
    %c0_i32 = arith.constant 0 : i32
    %c0_i32_0 = arith.constant 0 : i32
    %c0_i32_1 = arith.constant 0 : i32
    return %c0_i32, %c0_i32_0 : i32, i32
  }
  func.func @transform_7(%arg0: i32) -> (i32, i32) {
    %c0_i32 = arith.constant 0 : i32
    %c0_i32_0 = arith.constant 0 : i32
    return %arg0, %c0_i32 : i32, i32
  }
}

</mosaic_0001>

<bundles_post_ra>
// kernel: tpu_custom_call.1
= control target key start
LH: loop header
LB: loop body
LE: loop exit
PB: predicated region body
PF: predicated region fallthrough
CT: control target
= control target key end

     0   :  { %12 = vsyncpa [#allocation3], 0  ;;  %s3203_s0 = inlined_call_operand.hbm [shape: bf16[8,768], index: 0, kind: input, shape index: {}]   ;;  %s3204_s1 = inlined_call_operand.hbm [shape: bf16[768,384], index: 1, kind: input, shape index: {}]   ;;  %s3205_s2 = inlined_call_operand.hbm [shape: f32[1,384], index: 2, kind: input, shape index: {}]   ;;  %s3206_s3 = inlined_call_operand.hbm [shape: bf16[384,256], index: 3, kind: input, shape index: {}]   ;;  %s3207_s4 = inlined_call_operand.vmem [shape: f32[1,256], index: 4, kind: input, shape index: {}]   ;;  %s3208_s5 = inlined_call_operand.hbm [shape: bf16[256,128], index: 5, kind: input, shape index: {}]   ;;  %s3209_s6 = inlined_call_operand.vmem [shape: f32[1,128], index: 6, kind: input, shape index: {}]   ;;  %s3210_s7 = inlined_call_operand.hbm [shape: f32[8,128], index: 7, kind: output, shape index: {}]  }
   0x1   :  { %13 = vsyncpa [#allocation6], 0 }
   0x2   :  { %14 = vsyncpa [#allocation9], 0  ;;  %s31_s26 = sshll.u32 %s3204_s1, 4  ;;  %s32_s26 = int_to_ptr.hbm [resolvable:$true] %s31_s26 }
   0x3   :  { %15 = vsyncpa [#allocation4], 0  ;;  %s3092_s27 = smov [#allocation5]   ;;  %s55_s8 = sshll.u32 %s3206_s3, 4  ;;  %s56_s8 = int_to_ptr.hbm [resolvable:$true] %s55_s8 }
   0x4   :  { %s33_s28 = sshll.u32 %s3092_s27, 4  ;;  %s3093_s9 = smov 192   ;;  %s34_s28 = int_to_ptr.vmem [resolvable:$true] %s33_s28 }
   0x5   :  { %s3094_s10 = smov 12   ;;  %s3095_s11 = smov [#allocation8]  }
   0x6   :  { %39 = dma.hbm_to_vmem [thread:$0]  %s32_s26, 18432, %s34_s28, [#allocation6], %s3093_s9, %s3093_s9, %s3094_s10  }
   0x7   :  { %s57_s12 = sshll.u32 %s3095_s11, 4  ;;  %s3096_s13 = smov 128   ;;  %s58_s12 = int_to_ptr.vmem [resolvable:$true] %s57_s12 }
   0x8   :  { %s3097_s14 = smov 8   ;;  %s21_s16 = sshll.u32 %s3203_s0, 4  ;;  %s22_s16 = int_to_ptr.hbm [resolvable:$true] %s21_s16 }
   0x9   :  { %63 = dma.hbm_to_vmem [thread:$0]  %s56_s8, 6144, %s58_s12, [#allocation9], %s3096_s13, %s3096_s13, %s3097_s14  }
   0xa   :  { %s3098_s17 = smov [#allocation2]   ;;  %s45_s20 = sshll.u32 %s3205_s2, 4  ;;  %s46_s20 = int_to_ptr.hbm [resolvable:$true] %s45_s20 }
   0xb   :  { %s23_s18 = sshll.u32 %s3098_s17, 4  ;;  %s3099_s21 = smov [#allocation7]   ;;  %s24_s18 = int_to_ptr.vmem [resolvable:$true] %s23_s18 }
   0xc   :  { %26 = dma.hbm_to_vmem [thread:$0]  %s22_s16, 384, %s24_s18, [#allocation3]  }
   0xd   :  { %s47_s22 = sshll.u32 %s3099_s21, 4  ;;  %s70_s25 = sshll.u32 %s3208_s5, 4  ;;  %s48_s22 = int_to_ptr.vmem [resolvable:$true] %s47_s22  ;;  %s71_s25 = int_to_ptr.hbm [resolvable:$true] %s70_s25 }
   0xe   :  { %50 = dma.hbm_to_vmem [thread:$0]  %s46_s20, 48, %s48_s22, [#allocation6]  }
   0xf   :  { %s3100_s0 = smov [#allocation10]   ;;  %s3101_s27 = smov 64  }
  0x10   :  { %s72_s26 = sshll.u32 %s3100_s0, 4  ;;  %s3102_s28 = smov 4   ;;  %s73_s26 = int_to_ptr.vmem [resolvable:$true] %s72_s26 }
  0x11   :  { %78 = dma.hbm_to_vmem [thread:$0]  %s71_s25, 2048, %s73_s26, [#allocation9], %s3101_s27, %s3101_s27, %s3102_s28  }
  0x12   :  { %3084 = dma.done.wait [#allocation3], 384  }
  0x13   :  { %3085 = vsyncadd [#allocation3], 4294966912 }
  0x14   :  { %3086 = dma.done.wait [#allocation6], 18480  }
  0x15   :  { %3087 = vsyncadd [#allocation6], 4294948816 }
  0x16   :  { %3088 = dma.done.wait [#allocation9], 8192  }
  0x17   :  { %3089 = vsyncadd [#allocation9], 4294959104  ;;  %v1973_v0 = vld [vmem:[#allocation5 + $0xa8] sm:$0xf]  ;;  %v2741_v1 = vld [vmem:[#allocation5 + $0xb0] sm:$0xf0] }
  0x18   :  { %v2069_v2 = vld [vmem:[#allocation5 + $0x168] sm:$0xf]  ;;  %v1974_v3 = vor.u32 %v2741_v1, %v1973_v0  ;;  %v2765_v4 = vld [vmem:[#allocation5 + $0x170] sm:$0xf0]  ;;  %v1961_v11 = vld [vmem:[#allocation5 + $0x90] sm:$0xf] }
  0x19   :  { %v2165_v5 = vld [vmem:[#allocation5 + $0x228] sm:$0xf]  ;;  %v2789_v6 = vld [vmem:[#allocation5 + $0x230] sm:$0xf0]  ;;  %v2070_v7 = vor.u32 %v2765_v4, %v2069_v2  ;;  %v2738_v13 = vld [vmem:[#allocation5 + $0x98] sm:$0xf0] }
  0x1a   :  { %v2166_v8 = vor.u32 %v2789_v6, %v2165_v5  ;;  %v2261_v9 = vld [vmem:[#allocation5 + $0x2e8] sm:$0xf]  ;;  %v2813_v10 = vld [vmem:[#allocation5 + $0x2f0] sm:$0xf0]  ;;  %1093 = vmatpush.bf16.msra.mxu0 %v1974_v3  ;;  %v2057_v14 = vld [vmem:[#allocation5 + $0x150] sm:$0xf]  ;;  %v1962_v16 = vor.u32 %v2738_v13, %v1961_v11 }
  0x1b   :  { %v2262_v12 = vor.u32 %v2813_v10, %v2261_v9  ;;  %v2762_v15 = vld [vmem:[#allocation5 + $0x158] sm:$0xf0]  ;;  %1106 = vmatpush.bf16.msra.mxu1 %v2070_v7  ;;  %v2153_v18 = vld [vmem:[#allocation5 + $0x210] sm:$0xf]  ;;  %v1949_v23 = vld [vmem:[#allocation5 + $0x78] sm:$0xf] }
  0x1c   :  { %1119 = vmatpush.bf16.msra.mxu2 %v2166_v8  ;;  %v2058_v17 = vor.u32 %v2762_v15, %v2057_v14  ;;  %v2786_v19 = vld [vmem:[#allocation5 + $0x218] sm:$0xf0]  ;;  %v2249_v20 = vld [vmem:[#allocation5 + $0x2d0] sm:$0xf]  ;;  %v2735_v24 = vld [vmem:[#allocation5 + $0x80] sm:$0xf0] }
  0x1d   :  { %1132 = vmatpush.bf16.msra.mxu3 %v2262_v12  ;;  %v2154_v21 = vor.u32 %v2786_v19, %v2153_v18  ;;  %v2810_v22 = vld [vmem:[#allocation5 + $0x2d8] sm:$0xf0]  ;;  %v2045_v26 = vld [vmem:[#allocation5 + $0x138] sm:$0xf]  ;;  %v2759_v27 = vld [vmem:[#allocation5 + $0x140] sm:$0xf0]  ;;  %v1950_v29 = vor.u32 %v2735_v24, %v1949_v23 }
  0x1e   :  { %v2250_v25 = vor.u32 %v2810_v22, %v2249_v20  ;;  %v2141_v28 = vld [vmem:[#allocation5 + $0x1f8] sm:$0xf]  ;;  %1094 = vmatpush.bf16.msra.mxu0 %v1962_v16  ;;  %v2783_v30 = vld [vmem:[#allocation5 + $0x200] sm:$0xf0]  ;;  %v2046_v33 = vor.u32 %v2759_v27, %v2045_v26  ;;  %v1937_v35 = vld [vmem:[#allocation5 + $0x60] sm:$0xf] }
  0x1f   :  { %v2237_v31 = vld [vmem:[#allocation5 + $0x2b8] sm:$0xf]  ;;  %v2807_v32 = vld [vmem:[#allocation5 + $0x2c0] sm:$0xf0]  ;;  %1107 = vmatpush.bf16.msra.mxu1 %v2058_v17  ;;  %v2142_v34 = vor.u32 %v2783_v30, %v2141_v28  ;;  %v2732_v36 = vld [vmem:[#allocation5 + $0x68] sm:$0xf0] }
  0x20   :  { %1120 = vmatpush.bf16.msra.mxu2 %v2154_v21  ;;  %v2033_v37 = vld [vmem:[#allocation5 + $0x120] sm:$0xf]  ;;  %v2238_v38 = vor.u32 %v2807_v32, %v2237_v31  ;;  %v2756_v39 = vld [vmem:[#allocation5 + $0x128] sm:$0xf0]  ;;  %v1938_v44 = vor.u32 %v2732_v36, %v1937_v35  ;;  %v1925_v47 = vld [vmem:[#allocation5 + $0x48] sm:$0xf] }
  0x21   :  { %1133 = vmatpush.bf16.msra.mxu3 %v2250_v25  ;;  %v2129_v40 = vld [vmem:[#allocation5 + $0x1e0] sm:$0xf]  ;;  %v2780_v41 = vld [vmem:[#allocation5 + $0x1e8] sm:$0xf0]  ;;  %v2034_v45 = vor.u32 %v2756_v39, %v2033_v37  ;;  %v2729_v48 = vld [vmem:[#allocation5 + $0x50] sm:$0xf0] }
  0x22   :  { %v2225_v42 = vld [vmem:[#allocation5 + $0x2a0] sm:$0xf]  ;;  %v2804_v43 = vld [vmem:[#allocation5 + $0x2a8] sm:$0xf0]  ;;  %1095 = vmatpush.bf16.msra.mxu0 %v1950_v29  ;;  %v2130_v46 = vor.u32 %v2780_v41, %v2129_v40  ;;  %v2021_v49 = vld [vmem:[#allocation5 + $0x108] sm:$0xf]  ;;  %v1926_v56 = vor.u32 %v2729_v48, %v1925_v47 }
  0x23   :  { %1108 = vmatpush.bf16.msra.mxu1 %v2046_v33  ;;  %v2226_v50 = vor.u32 %v2804_v43, %v2225_v42  ;;  %v2753_v51 = vld [vmem:[#allocation5 + $0x110] sm:$0xf0]  ;;  %v2117_v52 = vld [vmem:[#allocation5 + $0x1c8] sm:$0xf]  ;;  %v1913_v59 = vld [vmem:[#allocation5 + $0x30] sm:$0xf] }
  0x24   :  { %1121 = vmatpush.bf16.msra.mxu2 %v2142_v34  ;;  %v2777_v53 = vld [vmem:[#allocation5 + $0x1d0] sm:$0xf0]  ;;  %v2213_v54 = vld [vmem:[#allocation5 + $0x288] sm:$0xf]  ;;  %v2022_v57 = vor.u32 %v2753_v51, %v2021_v49  ;;  %v2726_v60 = vld [vmem:[#allocation5 + $0x38] sm:$0xf0] }
  0x25   :  { %1134 = vmatpush.bf16.msra.mxu3 %v2238_v38  ;;  %v2801_v55 = vld [vmem:[#allocation5 + $0x290] sm:$0xf0]  ;;  %v2118_v58 = vor.u32 %v2777_v53, %v2117_v52  ;;  %v2009_v61 = vld [vmem:[#allocation5 + $0xf0] sm:$0xf]  ;;  %v2750_v63 = vld [vmem:[#allocation5 + $0xf8] sm:$0xf0]  ;;  %v1914_v4 = vor.u32 %v2726_v60, %v1913_v59 }
  0x26   :  { %1096 = vmatpush.bf16.msra.mxu0 %v1938_v44  ;;  %v2214_v62 = vor.u32 %v2801_v55, %v2213_v54  ;;  %v2105_v0 = vld [vmem:[#allocation5 + $0x1b0] sm:$0xf]  ;;  %v2774_v1 = vld [vmem:[#allocation5 + $0x1b8] sm:$0xf0]  ;;  %v2010_v5 = vor.u32 %v2750_v63, %v2009_v61  ;;  %v1901_v7 = vld [vmem:[#allocation5 + $0x18] sm:$0xf] }
  0x27   :  { %1109 = vmatpush.bf16.msra.mxu1 %v2034_v45  ;;  %v2201_v2 = vld [vmem:[#allocation5 + $0x270] sm:$0xf]  ;;  %v2798_v3 = vld [vmem:[#allocation5 + $0x278] sm:$0xf0]  ;;  %v2106_v6 = vor.u32 %v2774_v1, %v2105_v0  ;;  %v2723_v8 = vld [vmem:[#allocation5 + $0x20] sm:$0xf0] }
  0x28   :  { %1122 = vmatpush.bf16.msra.mxu2 %v2130_v46  ;;  %v1997_v9 = vld [vmem:[#allocation5 + $0xd8] sm:$0xf]  ;;  %v2202_v10 = vor.u32 %v2798_v3, %v2201_v2  ;;  %v2747_v11 = vld [vmem:[#allocation5 + $0xe0] sm:$0xf0]  ;;  %v1902_v16 = vor.u32 %v2723_v8, %v1901_v7  ;;  %v1889_v17 = vld [vmem:[#allocation5] sm:$0xf] }
  0x29   :  { %1135 = vmatpush.bf16.msra.mxu3 %v2226_v50  ;;  %v2093_v12 = vld [vmem:[#allocation5 + $0x198] sm:$0xf]  ;;  %v2771_v13 = vld [vmem:[#allocation5 + $0x1a0] sm:$0xf0]  ;;  %v2720_v18 = vld [vmem:[#allocation5 + $0x8] sm:$0xf0]  ;;  %v1998_v19 = vor.u32 %v2747_v11, %v1997_v9 }
  0x2a   :  { %1097 = vmatpush.bf16.msra.mxu0 %v1926_v56  ;;  %v2189_v14 = vld [vmem:[#allocation5 + $0x258] sm:$0xf]  ;;  %v2795_v15 = vld [vmem:[#allocation5 + $0x260] sm:$0xf0]  ;;  %v2094_v20 = vor.u32 %v2771_v13, %v2093_v12  ;;  %v1985_v21 = vld [vmem:[#allocation5 + $0xc0] sm:$0xf]  ;;  %v1890_v31 = vor.u32 %v2720_v18, %v1889_v17 }
  0x2b   :  { %1110 = vmatpush.bf16.msra.mxu1 %v2022_v57  ;;  %v2744_v22 = vld [vmem:[#allocation5 + $0xc8] sm:$0xf0]  ;;  %v2081_v23 = vld [vmem:[#allocation5 + $0x180] sm:$0xf]  ;;  %v2190_v24 = vor.u32 %v2795_v15, %v2189_v14  ;;  %v2357_v26 = vld [vmem:[#allocation5 + $0x3a8] sm:$0xf] }
  0x2c   :  { %1123 = vmatpush.bf16.msra.mxu2 %v2118_v58  ;;  %v2768_v25 = vld [vmem:[#allocation5 + $0x188] sm:$0xf0]  ;;  %v2837_v27 = vld [vmem:[#allocation5 + $0x3b0] sm:$0xf0]  ;;  %v2453_v28 = vld [vmem:[#allocation5 + $0x468] sm:$0xf]  ;;  %v1986_v35 = vor.u32 %v2744_v22, %v1985_v21 }
  0x2d   :  { %1136 = vmatpush.bf16.msra.mxu3 %v2214_v62  ;;  %v2861_v29 = vld [vmem:[#allocation5 + $0x470] sm:$0xf0]  ;;  %v2740_v30 = vld [vmem:[#allocation5 + $0xac] sm:$0xf]  ;;  %v1975_v32 = vld [vmem:[#allocation5 + $0xb4] sm:$0xf0]  ;;  %v2082_v36 = vor.u32 %v2768_v25, %v2081_v23  ;;  %v2358_v39 = vor.u32 %v2837_v27, %v2357_v26 }
  0x2e   :  { %1098 = vmatpush.bf16.msra.mxu0 %v1914_v4  ;;  %v2177_v33 = vld [vmem:[#allocation5 + $0x240] sm:$0xf]  ;;  %v2792_v34 = vld [vmem:[#allocation5 + $0x248] sm:$0xf0]  ;;  %v2071_v38 = vld [vmem:[#allocation5 + $0x174] sm:$0xf0]  ;;  %v2454_v40 = vor.u32 %v2861_v29, %v2453_v28  ;;  %v1978_v42 = vor.u32 %v2740_v30, %v1975_v32 }
  0x2f   :  { %1111 = vmatpush.bf16.msra.mxu1 %v2010_v5  ;;  %v2764_v37 = vld [vmem:[#allocation5 + $0x16c] sm:$0xf]  ;;  %v2345_v41 = vld [vmem:[#allocation5 + $0x390] sm:$0xf]  ;;  %v2178_v43 = vor.u32 %v2792_v34, %v2177_v33  ;;  %v2834_v44 = vld [vmem:[#allocation5 + $0x398] sm:$0xf0] }
  0x30   :  { %1124 = vmatpush.bf16.msra.mxu2 %v2106_v6  ;;  %v2441_v45 = vld [vmem:[#allocation5 + $0x450] sm:$0xf]  ;;  %v2858_v46 = vld [vmem:[#allocation5 + $0x458] sm:$0xf0]  ;;  %v2074_v47 = vor.u32 %v2764_v37, %v2071_v38  ;;  %v2737_v48 = vld [vmem:[#allocation5 + $0x94] sm:$0xf]  ;;  %v2346_v53 = vor.u32 %v2834_v44, %v2345_v41 }
  0x31   :  { %1137 = vmatpush.bf16.msra.mxu3 %v2202_v10  ;;  %v1963_v49 = vld [vmem:[#allocation5 + $0x9c] sm:$0xf0]  ;;  %v2761_v50 = vld [vmem:[#allocation5 + $0x154] sm:$0xf]  ;;  %v101_v52 = vld [vmem:[#allocation2] sm:$0xff]  ;;  %v2442_v54 = vor.u32 %v2858_v46, %v2441_v45  ;;  %s3103_s30 = smov [#allocation11]  }
  0x32   :  { %1099 = vmatpush.bf16.msra.mxu0 %v1902_v16  ;;  %v2059_v51 = vld [vmem:[#allocation5 + $0x15c] sm:$0xf0]  ;;  %v2333_v55 = vld [vmem:[#allocation5 + $0x378] sm:$0xf]  ;;  %v307_v56 = vunpack.c.l.b16 %v101_v52  ;;  %v308_v57 = vunpack.c.h.b16 %v101_v52  ;;  %v1966_v58 = vor.u32 %v2737_v48, %v1963_v49  ;;  %v2831_v59 = vld [vmem:[#allocation5 + $0x380] sm:$0xf0] }
  0x33   :  { %1112 = vmatpush.bf16.msra.mxu1 %v1998_v19  ;;  %v2429_v60 = vld [vmem:[#allocation5 + $0x438] sm:$0xf]  ;;  %v2855_v61 = vld [vmem:[#allocation5 + $0x440] sm:$0xf0]  ;;  %v2062_v62 = vor.u32 %v2761_v50, %v2059_v51  ;;  %v2734_v63 = vld [vmem:[#allocation5 + $0x7c] sm:$0xf]  ;;  %v2334_v5 = vor.u32 %v2831_v59, %v2333_v55 }
  0x34   :  { %1125 = vmatpush.bf16.msra.mxu2 %v2094_v20  ;;  %v1951_v0 = vld [vmem:[#allocation5 + $0x84] sm:$0xf0]  ;;  %v3159_v1 = vpack.c.b16 %v307_v56, %v307_v56  ;;  %v3161_v2 = vpack.c.b16 %v308_v57, %v308_v57  ;;  %v2758_v3 = vld [vmem:[#allocation5 + $0x13c] sm:$0xf]  ;;  %v2430_v6 = vor.u32 %v2855_v61, %v2429_v60  ;;  %v2321_v7 = vld [vmem:[#allocation5 + $0x360] sm:$0xf] }
  0x35   :  { %1138 = vmatpush.bf16.msra.mxu3 %v2190_v24  ;;  %v2047_v4 = vld [vmem:[#allocation5 + $0x144] sm:$0xf0]  ;;  %v102_v8 = vld [vmem:[#allocation2 + $0x8] sm:$0xff]  ;;  %v1954_v9 = vor.u32 %v2734_v63, %v1951_v0  ;;  %v2828_v10 = vld [vmem:[#allocation5 + $0x368] sm:$0xf0]  ;;  %s1873_s8 = sshll.u32 %s3103_s30, 4  ;;  %s1874_s8 = int_to_ptr.vmem [resolvable:$true] %s1873_s8 }
  0x36   :  { %1100 = vmatpush.bf16.msra.mxu0 %v1890_v31  ;;  %v2417_v11 = vld [vmem:[#allocation5 + $0x420] sm:$0xf]  ;;  %v2852_v12 = vld [vmem:[#allocation5 + $0x428] sm:$0xf0]  ;;  %v309_v13 = vunpack.c.l.b16 %v102_v8  ;;  %v310_v14 = vunpack.c.h.b16 %v102_v8  ;;  %v2050_v15 = vor.u32 %v2758_v3, %v2047_v4  ;;  %v2731_v16 = vld [vmem:[#allocation5 + $0x64] sm:$0xf]  ;;  %v2322_v22 = vor.u32 %v2828_v10, %v2321_v7 }
  0x37   :  { %1113 = vmatpush.bf16.msra.mxu1 %v1986_v35  ;;  %v1939_v17 = vld [vmem:[#allocation5 + $0x6c] sm:$0xf0]  ;;  %v2755_v18 = vld [vmem:[#allocation5 + $0x124] sm:$0xf]  ;;  %v2418_v23 = vor.u32 %v2852_v12, %v2417_v11  ;;  %v2309_v24 = vld [vmem:[#allocation5 + $0x348] sm:$0xf] }
  0x38   :  { %1126 = vmatpush.bf16.msra.mxu2 %v2082_v36  ;;  %v2035_v19 = vld [vmem:[#allocation5 + $0x12c] sm:$0xf0]  ;;  %v3165_v20 = vpack.c.b16 %v309_v13, %v309_v13  ;;  %v3167_v21 = vpack.c.b16 %v310_v14, %v310_v14  ;;  %v1942_v25 = vor.u32 %v2731_v16, %v1939_v17  ;;  %v2825_v26 = vld [vmem:[#allocation5 + $0x350] sm:$0xf0]  ;;  %v2405_v27 = vld [vmem:[#allocation5 + $0x408] sm:$0xf] }
  0x39   :  { %1139 = vmatpush.bf16.msra.mxu3 %v2178_v43  ;;  %1101 = vmatmul.bf16.vlgmr.msra.gmra.mxu0 %v3159_v1  ;;  %v2849_v28 = vld [vmem:[#allocation5 + $0x410] sm:$0xf0]  ;;  %v2038_v29 = vor.u32 %v2755_v18, %v2035_v19  ;;  %v2728_v30 = vld [vmem:[#allocation5 + $0x4c] sm:$0xf]  ;;  %v1927_v31 = vld [vmem:[#allocation5 + $0x54] sm:$0xf0]  ;;  %v2310_v34 = vor.u32 %v2825_v26, %v2309_v24 }
  0x3a   :  { %1145 = vmatpush.bf16.msrb.mxu0 %v2358_v39  ;;  %1114 = vmatmul.bf16.vlgmr.msra.gmra.mxu1 %v3161_v2  ;;  %v2752_v32 = vld [vmem:[#allocation5 + $0x10c] sm:$0xf]  ;;  %v2023_v33 = vld [vmem:[#allocation5 + $0x114] sm:$0xf0]  ;;  %v2406_v35 = vor.u32 %v2849_v28, %v2405_v27  ;;  %v2297_v36 = vld [vmem:[#allocation5 + $0x330] sm:$0xf]  ;;  %v1930_v37 = vor.u32 %v2728_v30, %v1927_v31 }
  0x3b   :  { %1158 = vmatpush.bf16.msrb.mxu1 %v2454_v40  ;;  %1127 = vmatmul.bf16.vlgmr.msra.gmra.mxu2 %v3165_v20  ;;  %v2822_v38 = vld [vmem:[#allocation5 + $0x338] sm:$0xf0]  ;;  %v2393_v39 = vld [vmem:[#allocation5 + $0x3f0] sm:$0xf]  ;;  %v2026_v41 = vor.u32 %v2752_v32, %v2023_v33  ;;  %v1915_v43 = vld [vmem:[#allocation5 + $0x3c] sm:$0xf0] }
  0x3c   :  { %1171 = vmatpush.bf16.msrb.mxu2 %v1978_v42  ;;  %1140 = vmatmul.bf16.vlgmr.msra.gmra.mxu3 %v3167_v21  ;;  %v2846_v40 = vld [vmem:[#allocation5 + $0x3f8] sm:$0xf0]  ;;  %v2725_v42 = vld [vmem:[#allocation5 + $0x34] sm:$0xf]  ;;  %v2011_v45 = vld [vmem:[#allocation5 + $0xfc] sm:$0xf0]  ;;  %v2298_v46 = vor.u32 %v2822_v38, %v2297_v36 }
  0x3d   :  { %1184 = vmatpush.bf16.msrb.mxu3 %v2074_v47  ;;  %v2749_v44 = vld [vmem:[#allocation5 + $0xf4] sm:$0xf]  ;;  %v2394_v47 = vor.u32 %v2846_v40, %v2393_v39  ;;  %v2285_v48 = vld [vmem:[#allocation5 + $0x318] sm:$0xf]  ;;  %v1918_v49 = vor.u32 %v2725_v42, %v1915_v43  ;;  %v2819_v50 = vld [vmem:[#allocation5 + $0x320] sm:$0xf0] }
  0x3e   :  { %1146 = vmatpush.bf16.msrb.mxu0 %v2346_v53  ;;  %v2381_v51 = vld [vmem:[#allocation5 + $0x3d8] sm:$0xf]  ;;  %v2843_v52 = vld [vmem:[#allocation5 + $0x3e0] sm:$0xf0]  ;;  %v2014_v53 = vor.u32 %v2749_v44, %v2011_v45  ;;  %v1903_v55 = vld [vmem:[#allocation5 + $0x24] sm:$0xf0]  ;;  %v2286_v59 = vor.u32 %v2819_v50, %v2285_v48 }
  0x3f   :  { %1159 = vmatpush.bf16.msrb.mxu1 %v2442_v54  ;;  %v2722_v54 = vld [vmem:[#allocation5 + $0x1c] sm:$0xf]  ;;  %v1999_v57 = vld [vmem:[#allocation5 + $0xe4] sm:$0xf0]  ;;  %v2382_v60 = vor.u32 %v2843_v52, %v2381_v51  ;;  %v2816_v61 = vld [vmem:[#allocation5 + $0x308] sm:$0xf0] }
  0x40   :  { %1172 = vmatpush.bf16.msrb.mxu2 %v1966_v58  ;;  %v2746_v56 = vld [vmem:[#allocation5 + $0xdc] sm:$0xf]  ;;  %v2273_v58 = vld [vmem:[#allocation5 + $0x300] sm:$0xf]  ;;  %v1906_v0 = vor.u32 %v2722_v54, %v1903_v55  ;;  %v2840_v3 = vld [vmem:[#allocation5 + $0x3c8] sm:$0xf0] }
  0x41   :  { %1185 = vmatpush.bf16.msrb.mxu3 %v2062_v62  ;;  %v2369_v62 = vld [vmem:[#allocation5 + $0x3c0] sm:$0xf]  ;;  %v103_v63 = vld [vmem:[#allocation2 + $0x10] sm:$0xff]  ;;  %v2719_v4 = vld [vmem:[#allocation5 + $0x4] sm:$0xf]  ;;  %v2274_v14 = vor.u32 %v2816_v61, %v2273_v58  ;;  %s1875_s11 = sshll.u32 %s3210_s7, 4  ;;  %s1876_s11 = int_to_ptr.hbm [resolvable:$true] %s1875_s11 }
  0x42   :  { %1147 = vmatpush.bf16.msrb.mxu0 %v2334_v5  ;;  %v1891_v5 = vld [vmem:[#allocation5 + $0xc] sm:$0xf0]  ;;  %v2788_v7 = vld [vmem:[#allocation5 + $0x22c] sm:$0xf]  ;;  %v2167_v8 = vld [vmem:[#allocation5 + $0x234] sm:$0xf0]  ;;  %v311_v13 = vunpack.c.l.b16 %v103_v63  ;;  %v312_v18 = vunpack.c.h.b16 %v103_v63 }
  0x43   :  { %1160 = vmatpush.bf16.msrb.mxu1 %v2430_v6  ;;  %v2002_v6 = vor.u32 %v2746_v56, %v1999_v57  ;;  %v2263_v10 = vld [vmem:[#allocation5 + $0x2f4] sm:$0xf0]  ;;  %v2836_v11 = vld [vmem:[#allocation5 + $0x3ac] sm:$0xf]  ;;  %v2743_v16 = vld [vmem:[#allocation5 + $0xc4] sm:$0xf]  ;;  %v1894_v19 = vor.u32 %v2719_v4, %v1891_v5 }
  0x44   :  { %1173 = vmatpush.bf16.msrb.mxu2 %v1954_v9  ;;  %v2812_v9 = vld [vmem:[#allocation5 + $0x2ec] sm:$0xf]  ;;  %v2359_v12 = vld [vmem:[#allocation5 + $0x3b4] sm:$0xf0]  ;;  %v1987_v17 = vld [vmem:[#allocation5 + $0xcc] sm:$0xf0]  ;;  %v3171_v31 = vpack.c.b16 %v311_v13, %v311_v13  ;;  %v3173_v36 = vpack.c.b16 %v312_v18, %v312_v18 }
  0x45   :  { %1186 = vmatpush.bf16.msrb.mxu3 %v2050_v15  ;;  %v2370_v15 = vor.u32 %v2840_v3, %v2369_v62  ;;  %v2455_v24 = vld [vmem:[#allocation5 + $0x474] sm:$0xf0]  ;;  %v2362_v26 = vor.u32 %v2836_v11, %v2359_v12  ;;  %v2785_v27 = vld [vmem:[#allocation5 + $0x214] sm:$0xf]  ;;  %v2155_v28 = vld [vmem:[#allocation5 + $0x21c] sm:$0xf0]  ;;  %v1990_v30 = vor.u32 %v2743_v16, %v1987_v17 }
  0x46   :  { %1148 = vmatpush.bf16.msrb.mxu0 %v2322_v22  ;;  %v2170_v22 = vor.u32 %v2788_v7, %v2167_v8  ;;  %v2251_v32 = vld [vmem:[#allocation5 + $0x2dc] sm:$0xf0]  ;;  %v2833_v33 = vld [vmem:[#allocation5 + $0x394] sm:$0xf]  ;;  %v2782_v42 = vld [vmem:[#allocation5 + $0x1fc] sm:$0xf] }
  0x47   :  { %1161 = vmatpush.bf16.msrb.mxu1 %v2418_v23  ;;  %v2860_v23 = vld [vmem:[#allocation5 + $0x46c] sm:$0xf]  ;;  %v2857_v38 = vld [vmem:[#allocation5 + $0x454] sm:$0xf]  ;;  %v2443_v39 = vld [vmem:[#allocation5 + $0x45c] sm:$0xf0] }
  0x48   :  { %1174 = vmatpush.bf16.msrb.mxu2 %v1942_v25  ;;  %v2266_v25 = vor.u32 %v2812_v9, %v2263_v10  ;;  %v2143_v43 = vld [vmem:[#allocation5 + $0x204] sm:$0xf0]  ;;  %v2806_v44 = vld [vmem:[#allocation5 + $0x2bc] sm:$0xf]  ;;  %v2446_v48 = vor.u32 %v2857_v38, %v2443_v39  ;;  %v2779_v54 = vld [vmem:[#allocation5 + $0x1e4] sm:$0xf] }
  0x49   :  { %1187 = vmatpush.bf16.msrb.mxu3 %v2038_v29  ;;  %v2809_v29 = vld [vmem:[#allocation5 + $0x2d4] sm:$0xf]  ;;  %v2239_v45 = vld [vmem:[#allocation5 + $0x2c4] sm:$0xf0]  ;;  %v2854_v50 = vld [vmem:[#allocation5 + $0x43c] sm:$0xf] }
  0x4a   :  { %1149 = vmatpush.bf16.msrb.mxu0 %v2310_v34  ;;  %v2347_v34 = vld [vmem:[#allocation5 + $0x39c] sm:$0xf0]  ;;  %v2254_v40 = vor.u32 %v2809_v29, %v2251_v32  ;;  %v2431_v51 = vld [vmem:[#allocation5 + $0x444] sm:$0xf0]  ;;  %v2242_v52 = vor.u32 %v2806_v44, %v2239_v45  ;;  %v2131_v55 = vld [vmem:[#allocation5 + $0x1ec] sm:$0xf0] }
  0x4b   :  { %1162 = vmatpush.bf16.msrb.mxu1 %v2406_v35  ;;  %v2458_v35 = vor.u32 %v2860_v23, %v2455_v24  ;;  %v2803_v56 = vld [vmem:[#allocation5 + $0x2a4] sm:$0xf]  ;;  %v2227_v57 = vld [vmem:[#allocation5 + $0x2ac] sm:$0xf0]  ;;  %v2134_v61 = vor.u32 %v2779_v54, %v2131_v55  ;;  %v2119_v5 = vld [vmem:[#allocation5 + $0x1d4] sm:$0xf0] }
  0x4c   :  { %1175 = vmatpush.bf16.msrb.mxu2 %v1930_v37  ;;  %v2158_v37 = vor.u32 %v2785_v27, %v2155_v28  ;;  %v2827_v58 = vld [vmem:[#allocation5 + $0x364] sm:$0xf]  ;;  %v2419_v63 = vld [vmem:[#allocation5 + $0x42c] sm:$0xf0]  ;;  %v2230_v3 = vor.u32 %v2803_v56, %v2227_v57  ;;  %v2215_v7 = vld [vmem:[#allocation5 + $0x294] sm:$0xf0] }
  0x4d   :  { %1188 = vmatpush.bf16.msrb.mxu3 %v2026_v41  ;;  %v2350_v41 = vor.u32 %v2833_v33, %v2347_v34  ;;  %v2851_v62 = vld [vmem:[#allocation5 + $0x424] sm:$0xf]  ;;  %v2824_v8 = vld [vmem:[#allocation5 + $0x34c] sm:$0xf]  ;;  %v2311_v9 = vld [vmem:[#allocation5 + $0x354] sm:$0xf0] }
  0x4e   :  { %1150 = vmatpush.bf16.msrb.mxu0 %v2298_v46  ;;  %v2830_v46 = vld [vmem:[#allocation5 + $0x37c] sm:$0xf]  ;;  %v2422_v10 = vor.u32 %v2851_v62, %v2419_v63  ;;  %v2848_v12 = vld [vmem:[#allocation5 + $0x40c] sm:$0xf]  ;;  %v2407_v13 = vld [vmem:[#allocation5 + $0x414] sm:$0xf0] }
  0x4f   :  { %1163 = vmatpush.bf16.msrb.mxu1 %v2394_v47  ;;  %v2335_v47 = vld [vmem:[#allocation5 + $0x384] sm:$0xf0]  ;;  %v2773_v16 = vld [vmem:[#allocation5 + $0x1b4] sm:$0xf]  ;;  %v2107_v17 = vld [vmem:[#allocation5 + $0x1bc] sm:$0xf0]  ;;  %v2410_v24 = vor.u32 %v2848_v12, %v2407_v13 }
  0x50   :  { %1176 = vmatpush.bf16.msrb.mxu2 %v1918_v49  ;;  %v2146_v49 = vor.u32 %v2782_v42, %v2143_v43  ;;  %v2797_v18 = vld [vmem:[#allocation5 + $0x274] sm:$0xf]  ;;  %v2299_v23 = vld [vmem:[#allocation5 + $0x33c] sm:$0xf0]  ;;  %v2095_v32 = vld [vmem:[#allocation5 + $0x1a4] sm:$0xf0] }
  0x51   :  { %1189 = vmatpush.bf16.msrb.mxu3 %v2014_v53  ;;  %v2338_v53 = vor.u32 %v2830_v46, %v2335_v47  ;;  %v2395_v27 = vld [vmem:[#allocation5 + $0x3fc] sm:$0xf0]  ;;  %v2794_v33 = vld [vmem:[#allocation5 + $0x25c] sm:$0xf]  ;;  %v2191_v34 = vld [vmem:[#allocation5 + $0x264] sm:$0xf0] }
  0x52   :  { %1151 = vmatpush.bf16.msrb.mxu0 %v2286_v59  ;;  %v2323_v59 = vld [vmem:[#allocation5 + $0x36c] sm:$0xf0]  ;;  %v2767_v42 = vld [vmem:[#allocation5 + $0x184] sm:$0xf]  ;;  %v2194_v43 = vor.u32 %v2794_v33, %v2191_v34  ;;  %v2766_v54 = vld [vmem:[#allocation5 + $0x178] sm:$0xf0] }
  0x53   :  { %1164 = vmatpush.bf16.msrb.mxu1 %v2382_v60  ;;  %v2434_v60 = vor.u32 %v2854_v50, %v2431_v51  ;;  %v2326_v4 = vor.u32 %v2827_v58, %v2323_v59  ;;  %v2083_v45 = vld [vmem:[#allocation5 + $0x18c] sm:$0xf0]  ;;  %v2791_v46 = vld [vmem:[#allocation5 + $0x244] sm:$0xf]  ;;  %v2790_v63 = vld [vmem:[#allocation5 + $0x238] sm:$0xf0] }
  0x54   :  { %1177 = vmatpush.bf16.msrb.mxu2 %v1906_v0  ;;  %v2776_v0 = vld [vmem:[#allocation5 + $0x1cc] sm:$0xf]  ;;  %v2179_v47 = vld [vmem:[#allocation5 + $0x24c] sm:$0xf0]  ;;  %v2086_v55 = vor.u32 %v2767_v42, %v2083_v45  ;;  %v2839_v56 = vld [vmem:[#allocation5 + $0x3c4] sm:$0xf] }
  0x55   :  { %1190 = vmatpush.bf16.msrb.mxu3 %v2002_v6  ;;  %v2800_v6 = vld [vmem:[#allocation5 + $0x28c] sm:$0xf]  ;;  %v2122_v11 = vor.u32 %v2776_v0, %v2119_v5  ;;  %v1981_v50 = vld [vmem:[#allocation5 + $0xb0] sm:$0xf]  ;;  %v2182_v58 = vor.u32 %v2791_v46, %v2179_v47  ;;  %v1969_v5 = vld [vmem:[#allocation5 + $0x98] sm:$0xf] }
  0x56   :  { %1152 = vmatpush.bf16.msrb.mxu0 %v2274_v14  ;;  %v2218_v14 = vor.u32 %v2800_v6, %v2215_v7  ;;  %v2371_v57 = vld [vmem:[#allocation5 + $0x3cc] sm:$0xf0]  ;;  %v2739_v6 = vld [vmem:[#allocation5 + $0xa0] sm:$0xf0]  ;;  %v2065_v7 = vld [vmem:[#allocation5 + $0x158] sm:$0xf] }
  0x57   :  { %1165 = vmatpush.bf16.msrb.mxu1 %v2370_v15  ;;  %v2314_v15 = vor.u32 %v2824_v8, %v2311_v9  ;;  %v2269_v0 = vld [vmem:[#allocation5 + $0x2f0] sm:$0xf]  ;;  %v2763_v8 = vld [vmem:[#allocation5 + $0x160] sm:$0xf0]  ;;  %v1970_v12 = vor.u32 %v2739_v6, %v1969_v5  ;;  %v2733_v33 = vld [vmem:[#allocation5 + $0x70] sm:$0xf0] }
  0x58   :  { %1178 = vmatpush.bf16.msrb.mxu2 %v1894_v19  ;;  %v2203_v19 = vld [vmem:[#allocation5 + $0x27c] sm:$0xf0]  ;;  %v2787_v13 = vld [vmem:[#allocation5 + $0x220] sm:$0xf0]  ;;  %v2041_v34 = vld [vmem:[#allocation5 + $0x128] sm:$0xf] }
  0x59   :  { %1191 = vmatpush.bf16.msrb.mxu3 %v1990_v30  ;;  %1153 = vmatmul.bf16.vlgmr.msrb.gmra.mxu0 %v3171_v31  ;;  %v2206_v28 = vor.u32 %v2797_v18, %v2203_v19  ;;  %v2770_v30 = vld [vmem:[#allocation5 + $0x19c] sm:$0xf]  ;;  %v2736_v18 = vld [vmem:[#allocation5 + $0x88] sm:$0xf0]  ;;  %v2053_v19 = vld [vmem:[#allocation5 + $0x140] sm:$0xf] }
  0x5a   :  { %1197 = vmatpush.bf16.msra.mxu0 %v2170_v22  ;;  %1166 = vmatmul.bf16.vlgmr.msrb.gmra.mxu1 %v3173_v36  ;;  %v2821_v22 = vld [vmem:[#allocation5 + $0x334] sm:$0xf]  ;;  %v2098_v39 = vor.u32 %v2770_v30, %v2095_v32  ;;  %v1945_v32 = vld [vmem:[#allocation5 + $0x68] sm:$0xf]  ;;  %v1933_v45 = vld [vmem:[#allocation5 + $0x50] sm:$0xf] }
  0x5b   :  { %1210 = vmatpush.bf16.msra.mxu1 %v2266_v25  ;;  %1179 = vmatmul.bf16.vlgmr.msrb.gmra.mxu2 %v3159_v1  ;;  %v2110_v25 = vor.u32 %v2773_v16, %v2107_v17  ;;  %v2302_v29 = vor.u32 %v2821_v22, %v2299_v23  ;;  %v2066_v16 = vor.u32 %v2763_v8, %v2065_v7  ;;  %v1957_v17 = vld [vmem:[#allocation5 + $0x80] sm:$0xf]  ;;  %v2760_v22 = vld [vmem:[#allocation5 + $0x148] sm:$0xf0]  ;;  %v2233_v42 = vld [vmem:[#allocation5 + $0x2a8] sm:$0xf] }
  0x5c   :  { %1223 = vmatpush.bf16.msra.mxu2 %v2362_v26  ;;  %1192 = vmatmul.bf16.vlgmr.msrb.gmra.mxu3 %v3161_v2  ;;  %v2845_v26 = vld [vmem:[#allocation5 + $0x3f4] sm:$0xf]  ;;  %v2054_v30 = vor.u32 %v2760_v22, %v2053_v19  ;;  %v2730_v46 = vld [vmem:[#allocation5 + $0x58] sm:$0xf0]  ;;  %v2029_v47 = vld [vmem:[#allocation5 + $0x110] sm:$0xf] }
  0x5d   :  { %1236 = vmatpush.bf16.msra.mxu3 %v2458_v35  ;;  %v2818_v35 = vld [vmem:[#allocation5 + $0x31c] sm:$0xf]  ;;  %v2398_v38 = vor.u32 %v2845_v26, %v2395_v27  ;;  %v1958_v26 = vor.u32 %v2736_v18, %v1957_v17  ;;  %v2784_v27 = vld [vmem:[#allocation5 + $0x208] sm:$0xf0]  ;;  %v2799_v5 = vld [vmem:[#allocation5 + $0x280] sm:$0xf0] }
  0x5e   :  { %1198 = vmatpush.bf16.msra.mxu0 %v2158_v37  ;;  %v2287_v37 = vld [vmem:[#allocation5 + $0x324] sm:$0xf0]  ;;  %v1909_v7 = vld [vmem:[#allocation5 + $0x20] sm:$0xf]  ;;  %v2724_v8 = vld [vmem:[#allocation5 + $0x28] sm:$0xf0] }
  0x5f   :  { %1211 = vmatpush.bf16.msra.mxu1 %v2254_v40  ;;  %v2842_v40 = vld [vmem:[#allocation5 + $0x3dc] sm:$0xf]  ;;  %v2290_v44 = vor.u32 %v2818_v35, %v2287_v37  ;;  %v2757_v35 = vld [vmem:[#allocation5 + $0x130] sm:$0xf0]  ;;  %v2796_v17 = vld [vmem:[#allocation5 + $0x268] sm:$0xf0] }
  0x60   :  { %1224 = vmatpush.bf16.msra.mxu2 %v2350_v41  ;;  %v2383_v41 = vld [vmem:[#allocation5 + $0x3e4] sm:$0xf0]  ;;  %v2721_v22 = vld [vmem:[#allocation5 + $0x10] sm:$0xf0] }
  0x61   :  { %1237 = vmatpush.bf16.msra.mxu3 %v2446_v48  ;;  %v2815_v48 = vld [vmem:[#allocation5 + $0x304] sm:$0xf]  ;;  %v2386_v51 = vor.u32 %v2842_v40, %v2383_v41  ;;  %v1946_v40 = vor.u32 %v2733_v33, %v1945_v32  ;;  %v2781_v41 = vld [vmem:[#allocation5 + $0x1f0] sm:$0xf0]  ;;  %v1897_v19 = vld [vmem:[#allocation5 + $0x8] sm:$0xf] }
  0x62   :  { %1199 = vmatpush.bf16.msra.mxu0 %v2146_v49  ;;  %v2275_v49 = vld [vmem:[#allocation5 + $0x30c] sm:$0xf0]  ;;  %v1898_v32 = vor.u32 %v2721_v22, %v1897_v19  ;;  %v2089_v33 = vld [vmem:[#allocation5 + $0x188] sm:$0xf]  ;;  %v2293_v19 = vld [vmem:[#allocation5 + $0x320] sm:$0xf] }
  0x63   :  { %1212 = vmatpush.bf16.msra.mxu1 %v2242_v52  ;;  %v2742_v52 = vld [vmem:[#allocation5 + $0xb8] sm:$0xf0]  ;;  %v2278_v59 = vor.u32 %v2815_v48, %v2275_v49  ;;  %v2820_v22 = vld [vmem:[#allocation5 + $0x328] sm:$0xf0] }
  0x64   :  { %1225 = vmatpush.bf16.msra.mxu2 %v2338_v53  ;;  %v2077_v53 = vld [vmem:[#allocation5 + $0x170] sm:$0xf]  ;;  %v2754_v48 = vld [vmem:[#allocation5 + $0x118] sm:$0xf0] }
  0x65   :  { %1238 = vmatpush.bf16.msra.mxu3 %v2434_v60  ;;  %v2173_v60 = vld [vmem:[#allocation5 + $0x230] sm:$0xf]  ;;  %v2078_v62 = vor.u32 %v2766_v54, %v2077_v53  ;;  %v2778_v53 = vld [vmem:[#allocation5 + $0x1d8] sm:$0xf0] }
  0x66   :  { %1200 = vmatpush.bf16.msra.mxu0 %v2134_v61  ;;  %v1982_v61 = vor.u32 %v2742_v52, %v1981_v50  ;;  %v2174_v9 = vor.u32 %v2790_v63, %v2173_v60  ;;  %v1934_v52 = vor.u32 %v2730_v46, %v1933_v45  ;;  %v2221_v54 = vld [vmem:[#allocation5 + $0x290] sm:$0xf]  ;;  %v2751_v60 = vld [vmem:[#allocation5 + $0x100] sm:$0xf0]  ;;  %v2113_v63 = vld [vmem:[#allocation5 + $0x1b8] sm:$0xf] }
  0x67   :  { %1213 = vmatpush.bf16.msra.mxu1 %v2230_v3  ;;  %v2814_v3 = vld [vmem:[#allocation5 + $0x2f8] sm:$0xf0] }
  0x68   :  { %1226 = vmatpush.bf16.msra.mxu2 %v2326_v4  ;;  %v2374_v4 = vor.u32 %v2839_v56, %v2371_v57  ;;  %v2030_v56 = vor.u32 %v2754_v48, %v2029_v47  ;;  %v1921_v57 = vld [vmem:[#allocation5 + $0x38] sm:$0xf]  ;;  %v2341_v48 = vld [vmem:[#allocation5 + $0x380] sm:$0xf] }
  0x69   :  { %1239 = vmatpush.bf16.msra.mxu3 %v2422_v10  ;;  %v2270_v10 = vor.u32 %v2814_v3, %v2269_v0  ;;  %v2775_v3 = vld [vmem:[#allocation5 + $0x1c0] sm:$0xf0] }
  0x6a   :  { %1201 = vmatpush.bf16.msra.mxu0 %v2122_v11  ;;  %v2161_v11 = vld [vmem:[#allocation5 + $0x218] sm:$0xf] }
  0x6b   :  { %1214 = vmatpush.bf16.msra.mxu1 %v2218_v14  ;;  %v2257_v14 = vld [vmem:[#allocation5 + $0x2d8] sm:$0xf]  ;;  %v2162_v23 = vor.u32 %v2787_v13, %v2161_v11  ;;  %v2114_v11 = vor.u32 %v2775_v3, %v2113_v63  ;;  %v2101_v13 = vld [vmem:[#allocation5 + $0x1a0] sm:$0xf]  ;;  %v2425_v63 = vld [vmem:[#allocation5 + $0x428] sm:$0xf] }
  0x6c   :  { %1227 = vmatpush.bf16.msra.mxu2 %v2314_v15  ;;  %v2811_v15 = vld [vmem:[#allocation5 + $0x2e0] sm:$0xf0]  ;;  %v2317_v3 = vld [vmem:[#allocation5 + $0x350] sm:$0xf] }
  0x6d   :  { %1240 = vmatpush.bf16.msra.mxu3 %v2410_v24  ;;  %v2258_v24 = vor.u32 %v2811_v15, %v2257_v14  ;;  %v1910_v14 = vor.u32 %v2724_v8, %v1909_v7  ;;  %v2772_v15 = vld [vmem:[#allocation5 + $0x1a8] sm:$0xf0]  ;;  %v2305_v8 = vld [vmem:[#allocation5 + $0x338] sm:$0xf] }
  0x6e   :  { %1202 = vmatpush.bf16.msra.mxu0 %v2110_v25  ;;  %v2149_v25 = vld [vmem:[#allocation5 + $0x200] sm:$0xf] }
  0x6f   :  { %1215 = vmatpush.bf16.msra.mxu1 %v2206_v28  ;;  %v2245_v28 = vld [vmem:[#allocation5 + $0x2c0] sm:$0xf]  ;;  %v2150_v37 = vor.u32 %v2784_v27, %v2149_v25  ;;  %v2365_v25 = vld [vmem:[#allocation5 + $0x3b0] sm:$0xf] }
  0x70   :  { %1228 = vmatpush.bf16.msra.mxu2 %v2302_v29  ;;  %v2808_v29 = vld [vmem:[#allocation5 + $0x2c8] sm:$0xf0]  ;;  %v2461_v27 = vld [vmem:[#allocation5 + $0x470] sm:$0xf] }
  0x71   :  { %1241 = vmatpush.bf16.msra.mxu3 %v2398_v38  ;;  %v2246_v38 = vor.u32 %v2808_v29, %v2245_v28  ;;  %v2862_v28 = vld [vmem:[#allocation5 + $0x478] sm:$0xf0]  ;;  %v2102_v29 = vor.u32 %v2772_v15, %v2101_v13  ;;  %v2847_v13 = vld [vmem:[#allocation5 + $0x400] sm:$0xf0]  ;;  %v2872_v15 = vld [vmem:[#allocation8 + $0x44] sm:$0xf0] }
  0x72   :  { %1203 = vmatpush.bf16.msra.mxu0 %v2098_v39  ;;  %v2137_v39 = vld [vmem:[#allocation5 + $0x1e8] sm:$0xf] }
  0x73   :  { %1216 = vmatpush.bf16.msra.mxu1 %v2194_v43  ;;  %v2805_v43 = vld [vmem:[#allocation5 + $0x2b0] sm:$0xf0]  ;;  %v2138_v49 = vor.u32 %v2781_v41, %v2137_v39  ;;  %v2353_v41 = vld [vmem:[#allocation5 + $0x398] sm:$0xf] }
  0x74   :  { %1229 = vmatpush.bf16.msra.mxu2 %v2290_v44  ;;  %v2042_v44 = vor.u32 %v2757_v35, %v2041_v34  ;;  %v2234_v50 = vor.u32 %v2805_v43, %v2233_v42  ;;  %v2769_v34 = vld [vmem:[#allocation5 + $0x190] sm:$0xf0]  ;;  %v2835_v42 = vld [vmem:[#allocation5 + $0x3a0] sm:$0xf0]  ;;  %v2449_v43 = vld [vmem:[#allocation5 + $0x458] sm:$0xf] }
  0x75   :  { %1242 = vmatpush.bf16.msra.mxu3 %v2386_v51  ;;  %v2125_v51 = vld [vmem:[#allocation5 + $0x1d0] sm:$0xf]  ;;  %v2793_v39 = vld [vmem:[#allocation5 + $0x250] sm:$0xf0]  ;;  %v2090_v45 = vor.u32 %v2769_v34, %v2089_v33  ;;  %v2354_v47 = vor.u32 %v2835_v42, %v2353_v41  ;;  %v2377_v33 = vld [vmem:[#allocation5 + $0x3c8] sm:$0xf] }
  0x76   :  { %1204 = vmatpush.bf16.msra.mxu0 %v2086_v55  ;;  %v2802_v55 = vld [vmem:[#allocation5 + $0x298] sm:$0xf0]  ;;  %v2841_v34 = vld [vmem:[#allocation5 + $0x3d0] sm:$0xf0] }
  0x77   :  { %1217 = vmatpush.bf16.msra.mxu1 %v2182_v58  ;;  %v2727_v58 = vld [vmem:[#allocation5 + $0x40] sm:$0xf0]  ;;  %v2378_v41 = vor.u32 %v2841_v34, %v2377_v33  ;;  %v2888_v33 = vld [vmem:[#allocation8 + $0xc4] sm:$0xf0] }
  0x78   :  { %1230 = vmatpush.bf16.msra.mxu2 %v2278_v59  ;;  %v2017_v59 = vld [vmem:[#allocation5 + $0xf8] sm:$0xf]  ;;  %v1922_v0 = vor.u32 %v2727_v58, %v1921_v57  ;;  %v2856_v57 = vld [vmem:[#allocation5 + $0x448] sm:$0xf0] }
  0x79   :  { %1243 = vmatpush.bf16.msra.mxu3 %v2374_v4  ;;  %1205 = vmatmul.bf16.vlgmr.msra.gmra.mxu0 %v3165_v20  ;;  %v2209_v4 = vld [vmem:[#allocation5 + $0x278] sm:$0xf]  ;;  %v2018_v6 = vor.u32 %v2751_v60, %v2017_v59 }
  0x7a   :  { %1249 = vmatpush.bf16.msrb.mxu0 %v1982_v61  ;;  %1218 = vmatmul.bf16.vlgmr.msra.gmra.mxu1 %v3167_v21  ;;  %v2126_v61 = vor.u32 %v2778_v53, %v2125_v51 }
  0x7b   :  { %1262 = vmatpush.bf16.msrb.mxu1 %v2078_v62  ;;  %1231 = vmatmul.bf16.vlgmr.msra.gmra.mxu2 %v3171_v31  ;;  %v2222_v62 = vor.u32 %v2802_v55, %v2221_v54  ;;  %v2513_v54 = vld [vmem:[#allocation8 + $0x60] sm:$0xf]  ;;  %v2876_v55 = vld [vmem:[#allocation8 + $0x64] sm:$0xf0] }
  0x7c   :  { %1275 = vmatpush.bf16.msrb.mxu2 %v2174_v9  ;;  %1244 = vmatmul.bf16.vlgmr.msra.gmra.mxu3 %v3173_v36  ;;  %v2005_v9 = vld [vmem:[#allocation5 + $0xe0] sm:$0xf]  ;;  %v2514_v59 = vor.u32 %v2876_v55, %v2513_v54 }
  0x7d   :  { %1288 = vmatpush.bf16.msrb.mxu3 %v2270_v10  ;;  %v2748_v10 = vld [vmem:[#allocation5 + $0xe8] sm:$0xf0] }
  0x7e   :  { %1250 = vmatpush.bf16.msrb.mxu0 %v1970_v12  ;;  %v2210_v12 = vor.u32 %v2799_v5, %v2209_v4  ;;  %v2006_v18 = vor.u32 %v2748_v10, %v2005_v9  ;;  %v2826_v4 = vld [vmem:[#allocation5 + $0x358] sm:$0xf0]  ;;  %v2413_v5 = vld [vmem:[#allocation5 + $0x410] sm:$0xf]  ;;  %v2823_v9 = vld [vmem:[#allocation5 + $0x340] sm:$0xf0] }
  0x7f   :  { %1263 = vmatpush.bf16.msrb.mxu1 %v2066_v16  ;;  %v2197_v16 = vld [vmem:[#allocation5 + $0x260] sm:$0xf]  ;;  %v2318_v7 = vor.u32 %v2826_v4, %v2317_v3  ;;  %v2894_v3 = vld [vmem:[#allocation8 + $0xf4] sm:$0xf0]  ;;  %v2893_v4 = vld [vmem:[#allocation8 + $0xf4] sm:$0xf] }
  0x80   :  { %1276 = vmatpush.bf16.msrb.mxu2 %v2162_v23  ;;  %v1993_v23 = vld [vmem:[#allocation5 + $0xc8] sm:$0xf] }
  0x81   :  { %1289 = vmatpush.bf16.msrb.mxu3 %v2258_v24  ;;  %v2745_v24 = vld [vmem:[#allocation5 + $0xd0] sm:$0xf0] }
  0x82   :  { %1251 = vmatpush.bf16.msrb.mxu0 %v1958_v26  ;;  %v2838_v26 = vld [vmem:[#allocation5 + $0x3b8] sm:$0xf0]  ;;  %v1994_v35 = vor.u32 %v2745_v24, %v1993_v23  ;;  %v2389_v23 = vld [vmem:[#allocation5 + $0x3e0] sm:$0xf]  ;;  %v2844_v24 = vld [vmem:[#allocation5 + $0x3e8] sm:$0xf0] }
  0x83   :  { %1264 = vmatpush.bf16.msrb.mxu1 %v2054_v30  ;;  %v2198_v30 = vor.u32 %v2796_v17, %v2197_v16  ;;  %v2306_v16 = vor.u32 %v2823_v9, %v2305_v8  ;;  %v2577_v8 = vld [vmem:[#allocation8 + $0xe0] sm:$0xf]  ;;  %v2892_v9 = vld [vmem:[#allocation8 + $0xe4] sm:$0xf0] }
  0x84   :  { %1277 = vmatpush.bf16.msrb.mxu2 %v2150_v37  ;;  %v2366_v37 = vor.u32 %v2838_v26, %v2365_v25  ;;  %v2489_v25 = vld [vmem:[#allocation8 + $0x30] sm:$0xf]  ;;  %v2870_v26 = vld [vmem:[#allocation8 + $0x34] sm:$0xf0] }
  0x85   :  { %1290 = vmatpush.bf16.msrb.mxu3 %v2246_v38  ;;  %v2185_v38 = vld [vmem:[#allocation5 + $0x248] sm:$0xf] }
  0x86   :  { %1252 = vmatpush.bf16.msrb.mxu0 %v1946_v40  ;;  %v2462_v40 = vor.u32 %v2862_v28, %v2461_v27  ;;  %v2186_v46 = vor.u32 %v2793_v39, %v2185_v38  ;;  %v2294_v27 = vor.u32 %v2820_v22, %v2293_v19  ;;  %v2490_v28 = vor.u32 %v2870_v26, %v2489_v25  ;;  %v2481_v39 = vld [vmem:[#allocation8 + $0x20] sm:$0xf]  ;;  %v2889_v19 = vld [vmem:[#allocation8 + $0xd4] sm:$0xf]  ;;  %v2571_v22 = vld [vmem:[#allocation8 + $0xd8] sm:$0xf0] }
  0x87   :  { %1265 = vmatpush.bf16.msrb.mxu1 %v2042_v44  ;;  %v2859_v44 = vld [vmem:[#allocation5 + $0x460] sm:$0xf0]  ;;  %v2467_v25 = vld [vmem:[#allocation8 + $0x8] sm:$0xf0] }
  0x88   :  { %1278 = vmatpush.bf16.msrb.mxu2 %v2138_v49  ;;  %v2521_v49 = vld [vmem:[#allocation8 + $0x70] sm:$0xf]  ;;  %v2450_v51 = vor.u32 %v2859_v44, %v2449_v43  ;;  %v2875_v44 = vld [vmem:[#allocation8 + $0x64] sm:$0xf] }
  0x89   :  { %1291 = vmatpush.bf16.msrb.mxu3 %v2234_v50  ;;  %v2878_v50 = vld [vmem:[#allocation8 + $0x74] sm:$0xf0] }
  0x8a   :  { %1253 = vmatpush.bf16.msrb.mxu0 %v1934_v52  ;;  %v2832_v52 = vld [vmem:[#allocation5 + $0x388] sm:$0xf0]  ;;  %v2522_v53 = vor.u32 %v2878_v50, %v2521_v49  ;;  %v2871_v50 = vld [vmem:[#allocation8 + $0x44] sm:$0xf] }
  0x8b   :  { %1266 = vmatpush.bf16.msrb.mxu1 %v2030_v56  ;;  %v2437_v56 = vld [vmem:[#allocation5 + $0x440] sm:$0xf]  ;;  %v2342_v58 = vor.u32 %v2832_v52, %v2341_v48  ;;  %v2473_v52 = vld [vmem:[#allocation8 + $0x10] sm:$0xf] }
  0x8c   :  { %1279 = vmatpush.bf16.msrb.mxu2 %v2126_v61  ;;  %v2438_v60 = vor.u32 %v2856_v57, %v2437_v56  ;;  %v2329_v61 = vld [vmem:[#allocation5 + $0x368] sm:$0xf]  ;;  %v2507_v48 = vld [vmem:[#allocation8 + $0x58] sm:$0xf0]  ;;  %v2869_v56 = vld [vmem:[#allocation8 + $0x34] sm:$0xf] }
  0x8d   :  { %1292 = vmatpush.bf16.msrb.mxu3 %v2222_v62  ;;  %v2829_v62 = vld [vmem:[#allocation5 + $0x370] sm:$0xf0]  ;;  %v2491_v57 = vld [vmem:[#allocation8 + $0x38] sm:$0xf0] }
  0x8e   :  { %1254 = vmatpush.bf16.msrb.mxu0 %v1922_v0  ;;  %v2853_v0 = vld [vmem:[#allocation5 + $0x430] sm:$0xf0] }
  0x8f   :  { %1267 = vmatpush.bf16.msrb.mxu1 %v2018_v6  ;;  %v2850_v6 = vld [vmem:[#allocation5 + $0x418] sm:$0xf0] }
  0x90   :  { %1280 = vmatpush.bf16.msrb.mxu2 %v2114_v11  ;;  %v2414_v10 = vor.u32 %v2850_v6, %v2413_v5  ;;  %v2505_v11 = vld [vmem:[#allocation8 + $0x50] sm:$0xf] }
  0x91   :  { %1293 = vmatpush.bf16.msrb.mxu3 %v2210_v12  ;;  %v2874_v12 = vld [vmem:[#allocation8 + $0x54] sm:$0xf0] }
  0x92   :  { %1255 = vmatpush.bf16.msrb.mxu0 %v1910_v14  ;;  %v2497_v14 = vld [vmem:[#allocation8 + $0x40] sm:$0xf] }
  0x93   :  { %1268 = vmatpush.bf16.msrb.mxu1 %v2006_v18  ;;  %v2498_v17 = vor.u32 %v2872_v15, %v2497_v14  ;;  %v2569_v15 = vld [vmem:[#allocation8 + $0xd0] sm:$0xf] }
  0x94   :  { %1281 = vmatpush.bf16.msrb.mxu2 %v2102_v29  ;;  %v2390_v29 = vor.u32 %v2844_v24, %v2389_v23  ;;  %v2863_v24 = vld [vmem:[#allocation8 + $0x4] sm:$0xf] }
  0x95   :  { %1294 = vmatpush.bf16.msrb.mxu3 %v2198_v30  ;;  %v2281_v30 = vld [vmem:[#allocation5 + $0x308] sm:$0xf]  ;;  %v2470_v34 = vor.u32 %v2863_v24, %v2467_v25  ;;  %v2909_v24 = vld [vmem:[#allocation8 + $0x174] sm:$0xf] }
  0x96   :  { %1256 = vmatpush.bf16.msrb.mxu0 %v1898_v32  ;;  %v2817_v32 = vld [vmem:[#allocation5 + $0x310] sm:$0xf0] }
  0x97   :  { %1269 = vmatpush.bf16.msrb.mxu1 %v1994_v35  ;;  %v2877_v35 = vld [vmem:[#allocation8 + $0x74] sm:$0xf]  ;;  %v2282_v38 = vor.u32 %v2817_v32, %v2281_v30  ;;  %v2574_v30 = vor.u32 %v2889_v19, %v2571_v22  ;;  %v2561_v32 = vld [vmem:[#allocation8 + $0xc0] sm:$0xf]  ;;  %v2649_v22 = vld [vmem:[#allocation8 + $0x170] sm:$0xf] }
  0x98   :  { %1282 = vmatpush.bf16.msrb.mxu2 %v2090_v45  ;;  %v2515_v45 = vld [vmem:[#allocation8 + $0x68] sm:$0xf0] }
  0x99   :  { %1257 = vmatmul.bf16.vlgmr.msrb.gmra.mxu0 %v3159_v1  ;;  %1295 = vmatpush.bf16.msrb.mxu3 %v2186_v46  ;;  %v2330_v1 = vor.u32 %v2829_v62, %v2329_v61  ;;  %v2518_v46 = vor.u32 %v2875_v44, %v2515_v45  ;;  %v2555_v44 = vld [vmem:[#allocation8 + $0xb8] sm:$0xf0] }
  0x9a   :  { %1301 = vmatpush.bf16.msra.mxu0 %v2366_v37  ;;  %1270 = vmatmul.bf16.vlgmr.msrb.gmra.mxu1 %v3161_v2  ;;  %v2426_v2 = vor.u32 %v2853_v0, %v2425_v63  ;;  %v2523_v37 = vld [vmem:[#allocation8 + $0x78] sm:$0xf0]  ;;  %v2483_v63 = vld [vmem:[#allocation8 + $0x28] sm:$0xf0] }
  0x9b   :  { %1314 = vmatpush.bf16.msra.mxu1 %v2462_v40  ;;  %1283 = vmatmul.bf16.vlgmr.msrb.gmra.mxu2 %v3165_v20  ;;  %v2401_v20 = vld [vmem:[#allocation5 + $0x3f8] sm:$0xf]  ;;  %v2868_v40 = vld [vmem:[#allocation8 + $0x24] sm:$0xf0]  ;;  %v2526_v43 = vor.u32 %v2877_v35, %v2523_v37  ;;  %v3189_v0 = vld [vmem:[#allocation7] sm:$0x7] }
  0x9c   :  { %1627 = vmatpush.bf16.msra.mxu2 %v2522_v53  ;;  %1296 = vmatmul.bf16.vlgmr.msrb.gmra.mxu3 %v3167_v21  ;;  %v2506_v21 = vor.u32 %v2874_v12, %v2505_v11  ;;  %v2402_v18 = vor.u32 %v2847_v13, %v2401_v20  ;;  %v2482_v42 = vor.u32 %v2868_v40, %v2481_v39  ;;  %v2866_v53 = vld [vmem:[#allocation8 + $0x14] sm:$0xf0]  ;;  %v2891_v11 = vld [vmem:[#allocation8 + $0xe4] sm:$0xf]  ;;  %v2579_v12 = vld [vmem:[#allocation8 + $0xe8] sm:$0xf0] }
  0x9d   :  { %v2474_v55 = vor.u32 %v2866_v53, %v2473_v52  ;;  %v2578_v13 = vor.u32 %v2892_v9, %v2577_v8  ;;  %v2582_v14 = vor.u32 %v2891_v11, %v2579_v12  ;;  %v2887_v35 = vld [vmem:[#allocation8 + $0xc4] sm:$0xf]  ;;  %v2563_v37 = vld [vmem:[#allocation8 + $0xc8] sm:$0xf0]  ;;  %v2545_v52 = vld [vmem:[#allocation8 + $0xa0] sm:$0xf] }
  0x9e   :  { %1302 = vmatpush.bf16.msra.mxu0 %v2354_v47  ;;  %v2873_v47 = vld [vmem:[#allocation8 + $0x54] sm:$0xf]  ;;  %v2566_v40 = vor.u32 %v2887_v35, %v2563_v37  ;;  %v2884_v53 = vld [vmem:[#allocation8 + $0xa4] sm:$0xf0]  ;;  %v2879_v8 = vld [vmem:[#allocation8 + $0x84] sm:$0xf] }
  0x9f   :  { %1315 = vmatpush.bf16.msra.mxu1 %v2450_v51  ;;  %v2510_v49 = vor.u32 %v2873_v47, %v2507_v48  ;;  %v2499_v51 = vld [vmem:[#allocation8 + $0x48] sm:$0xf0] }
  0xa0   :  { %1628 = vmatpush.bf16.msra.mxu2 %v2514_v59  ;;  %v2502_v54 = vor.u32 %v2871_v50, %v2499_v51  ;;  %v2864_v59 = vld [vmem:[#allocation8 + $0x4] sm:$0xf0] }
  0xa2   :  { %1303 = vmatpush.bf16.msra.mxu0 %v2342_v58  ;;  %v2465_v58 = vld [vmem:[#allocation8] sm:$0xf] }
  0xa3   :  { %1316 = vmatpush.bf16.msra.mxu1 %v2438_v60  ;;  %v2466_v61 = vor.u32 %v2864_v59, %v2465_v58  ;;  %v2547_v58 = vld [vmem:[#allocation8 + $0xa8] sm:$0xf0] }
  0xa4   :  { %1629 = vmatpush.bf16.msra.mxu2 %v2506_v21  ;;  %v298_v21 = vperm.slane %v3189_v0, 0 }
  0xa6   :  { %1304 = vmatpush.bf16.msra.mxu0 %v2330_v1  ;;  %v2865_v1 = vld [vmem:[#allocation8 + $0x14] sm:$0xf] }
  0xa7   :  { %1317 = vmatpush.bf16.msra.mxu1 %v2426_v2  ;;  %v2585_v2 = vld [vmem:[#allocation8 + $0xf0] sm:$0xf] }
  0xa8   :  { %1630 = vmatpush.bf16.msra.mxu2 %v2498_v17  ;;  %v2586_v6 = vor.u32 %v2894_v3, %v2585_v2 }
  0xaa   :  { %1305 = vmatpush.bf16.msra.mxu0 %v2318_v7  ;;  %v2587_v7 = vld [vmem:[#allocation8 + $0xf8] sm:$0xf0]  ;;  %1640 = vmatpush.bf16.msra.mxu3 %v2586_v6  ;;  %v2529_v6 = vld [vmem:[#allocation8 + $0x80] sm:$0xf] }
  0xab   :  { %1318 = vmatpush.bf16.msra.mxu1 %v2414_v10  ;;  %v2475_v10 = vld [vmem:[#allocation8 + $0x18] sm:$0xf0]  ;;  %v2590_v20 = vor.u32 %v2893_v4, %v2587_v7  ;;  %v2880_v7 = vld [vmem:[#allocation8 + $0x84] sm:$0xf0] }
  0xac   :  { %1631 = vmatpush.bf16.msra.mxu2 %v2490_v28 }
  0xae   :  { %1306 = vmatpush.bf16.msra.mxu0 %v2306_v16  ;;  %v2890_v16 = vld [vmem:[#allocation8 + $0xd4] sm:$0xf0]  ;;  %1641 = vmatpush.bf16.msra.mxu3 %v2578_v13 }
  0xaf   :  { %1319 = vmatpush.bf16.msra.mxu1 %v2402_v18  ;;  %v2478_v18 = vor.u32 %v2865_v1, %v2475_v10  ;;  %v2539_v1 = vld [vmem:[#allocation8 + $0x98] sm:$0xf0]  ;;  %v2530_v10 = vor.u32 %v2880_v7, %v2529_v6  ;;  %v2601_v6 = vld [vmem:[#allocation8 + $0x110] sm:$0xf]  ;;  %v2898_v7 = vld [vmem:[#allocation8 + $0x114] sm:$0xf0] }
  0xb0   :  { %1632 = vmatpush.bf16.msra.mxu2 %v2482_v42  ;;  %v2886_v42 = vld [vmem:[#allocation8 + $0xb4] sm:$0xf0] }
  0xb2   :  { %1307 = vmatpush.bf16.msra.mxu0 %v2294_v27  ;;  %v2570_v27 = vor.u32 %v2890_v16, %v2569_v15 }
  0xb3   :  { %1320 = vmatpush.bf16.msra.mxu1 %v2390_v29 }
  0xb4   :  { %1633 = vmatpush.bf16.msra.mxu2 %v2474_v55  ;;  %1642 = vmatpush.bf16.msra.mxu3 %v2570_v27  ;;  %v2641_v27 = vld [vmem:[#allocation8 + $0x160] sm:$0xf] }
  0xb6   :  { %1308 = vmatpush.bf16.msra.mxu0 %v2282_v38  ;;  %v1102_v60 = vpop.f32.mrf.mxu0  ;;  %v2562_v38 = vor.u32 %v2888_v33, %v2561_v32  ;;  %v2643_v32 = vld [vmem:[#allocation8 + $0x168] sm:$0xf0] }
  0xb7   :  { %1321 = vmatpush.bf16.msra.mxu1 %v2378_v41  ;;  %v1115_v62 = vpop.f32.mrf.mxu1  ;;  %v1103_v28 = vadd.f32 %v1102_v60, %v298_v21  ;;  %v2553_v41 = vld [vmem:[#allocation8 + $0xb0] sm:$0xf]  ;;  %v299_v21 = vperm.slane %v3189_v0, 1 }
  0xb8   :  { %1634 = vmatpush.bf16.msra.mxu2 %v2466_v61  ;;  %1643 = vmatpush.bf16.msra.mxu3 %v2562_v38  ;;  %v2882_v61 = vld [vmem:[#allocation8 + $0x94] sm:$0xf0]  ;;  %v2633_v38 = vld [vmem:[#allocation8 + $0x150] sm:$0xf] }
  0xb9   :  { %1309 = vmatmul.bf16.vlgmr.msra.gmra.mxu0 %v3171_v31  ;;  %v2494_v31 = vor.u32 %v2869_v56, %v2491_v57  ;;  %v1116_v39 = vadd.f32 %v1115_v62, %v1103_v28  ;;  %v2546_v57 = vor.u32 %v2884_v53, %v2545_v52  ;;  %v2881_v62 = vld [vmem:[#allocation8 + $0x94] sm:$0xf]  ;;  %v2908_v28 = vld [vmem:[#allocation8 + $0x164] sm:$0xf0]  ;;  %v2627_v52 = vld [vmem:[#allocation8 + $0x148] sm:$0xf0] }
  0xba   :  { %1322 = vmatmul.bf16.vlgmr.msra.gmra.mxu1 %v3173_v36  ;;  %v2867_v36 = vld [vmem:[#allocation8 + $0x24] sm:$0xf]  ;;  %v2542_v2 = vor.u32 %v2881_v62, %v2539_v1  ;;  %v2900_v1 = vld [vmem:[#allocation8 + $0x124] sm:$0xf0] }
  0xbb   :  { %1666 = vmatpush.bf16.msrb.mxu1 %v2526_v43  ;;  %v2486_v5 = vor.u32 %v2867_v36, %v2483_v63  ;;  %v2885_v43 = vld [vmem:[#allocation8 + $0xb4] sm:$0xf] }
  0xbc   :  { %1679 = vmatpush.bf16.msrb.mxu2 %v2590_v20  ;;  %v2531_v20 = vld [vmem:[#allocation8 + $0x88] sm:$0xf0] }
  0xbd   :  { %v2534_v12 = vor.u32 %v2879_v8, %v2531_v20  ;;  %v2897_v8 = vld [vmem:[#allocation8 + $0x114] sm:$0xf] }
  0xbe   :  { %v1104_v17 = vpop.f32.mrf.mxu0  ;;  %v1128_v29 = vpop.f32.mrf.mxu2 }
  0xbf   :  { %1667 = vmatpush.bf16.msrb.mxu1 %v2518_v46  ;;  %v1117_v23 = vpop.f32.mrf.mxu1  ;;  %v1141_v26 = vpop.f32.mrf.mxu3  ;;  %v2554_v46 = vor.u32 %v2886_v42, %v2553_v41  ;;  %v1129_v47 = vadd.f32 %v1128_v29, %v1116_v39  ;;  %v2906_v39 = vld [vmem:[#allocation8 + $0x154] sm:$0xf0] }
  0xc0   :  { %1680 = vmatpush.bf16.msrb.mxu2 %v2582_v14  ;;  %v2910_v23 = vld [vmem:[#allocation8 + $0x174] sm:$0xf0] }
  0xc1   :  { %1644 = vmatpush.bf16.msra.mxu3 %v2554_v46  ;;  %v1142_v50 = vadd.f32 %v1141_v26, %v1129_v47  ;;  %v2650_v25 = vor.u32 %v2910_v23, %v2649_v22  ;;  %v2651_v26 = vld [vmem:[#allocation8 + $0x178] sm:$0xf0] }
  0xc2   :  { %v2654_v29 = vor.u32 %v2909_v24, %v2651_v26  ;;  %v300_v24 = vperm.slane %v3189_v0, 2  ;;  %v2918_v0 = vld [vmem:[#allocation10 + $0x38] sm:$0xff] }
  0xc3   :  { %1668 = vmatpush.bf16.msrb.mxu1 %v2510_v49  ;;  %v2558_v49 = vor.u32 %v2885_v43, %v2555_v44  ;;  %1653 = vmatpush.bf16.msrb.mxu0 %v2650_v25  ;;  %v2634_v43 = vor.u32 %v2906_v39, %v2633_v38  ;;  %v2635_v44 = vld [vmem:[#allocation8 + $0x158] sm:$0xf0] }
  0xc4   :  { %1681 = vmatpush.bf16.msrb.mxu2 %v2574_v30  ;;  %v2907_v30 = vld [vmem:[#allocation8 + $0x164] sm:$0xf] }
  0xc5   :  { %1645 = vmatpush.bf16.msra.mxu3 %v2546_v57  ;;  %v2646_v35 = vor.u32 %v2907_v30, %v2643_v32 }
  0xc6   :  { %v1130_v48 = vpop.f32.mrf.mxu2 }
  0xc7   :  { %1669 = vmatpush.bf16.msrb.mxu1 %v2502_v54  ;;  %v1143_v45 = vpop.f32.mrf.mxu3  ;;  %v2883_v54 = vld [vmem:[#allocation8 + $0xa4] sm:$0xf] }
  0xc8   :  { %1682 = vmatpush.bf16.msrb.mxu2 %v2566_v40  ;;  %v2550_v59 = vor.u32 %v2883_v54, %v2547_v58  ;;  %v2905_v40 = vld [vmem:[#allocation8 + $0x154] sm:$0xf]  ;;  %v2902_v58 = vld [vmem:[#allocation8 + $0x134] sm:$0xf0] }
  0xc9   :  { %v2638_v47 = vor.u32 %v2905_v40, %v2635_v44 }
  0xcb   :  { %1670 = vmatpush.bf16.msrb.mxu1 %v2494_v31  ;;  %v2537_v31 = vld [vmem:[#allocation8 + $0x90] sm:$0xf] }
  0xcc   :  { %1683 = vmatpush.bf16.msrb.mxu2 %v2558_v49  ;;  %v2538_v63 = vor.u32 %v2882_v61, %v2537_v31  ;;  %v2625_v49 = vld [vmem:[#allocation8 + $0x140] sm:$0xf] }
  0xce   :  { %1646 = vmatpush.bf16.msra.mxu3 %v2538_v63  ;;  %v2609_v63 = vld [vmem:[#allocation8 + $0x120] sm:$0xf] }
  0xcf   :  { %1671 = vmatpush.bf16.msrb.mxu1 %v2486_v5 }
  0xd0   :  { %1684 = vmatpush.bf16.msrb.mxu2 %v2550_v59  ;;  %v2901_v59 = vld [vmem:[#allocation8 + $0x134] sm:$0xf] }
  0xd2   :  { %1647 = vmatpush.bf16.msra.mxu3 %v2530_v10  ;;  %v2603_v10 = vld [vmem:[#allocation8 + $0x118] sm:$0xf0] }
  0xd3   :  { %1672 = vmatpush.bf16.msrb.mxu1 %v2478_v18  ;;  %v2606_v20 = vor.u32 %v2897_v8, %v2603_v10 }
  0xd4   :  { %1685 = vmatpush.bf16.msrb.mxu2 %v2542_v2  ;;  %v2899_v2 = vld [vmem:[#allocation8 + $0x124] sm:$0xf] }
  0xd6   :  { %v1154_v51 = vpop.f32.mrf.mxu0  ;;  %1692 = vmatpush.bf16.msrb.mxu3 %v2654_v29 }
  0xd7   :  { %1673 = vmatpush.bf16.msrb.mxu1 %v2470_v34  ;;  %v1155_v55 = vadd.f32 %v1154_v51, %v1142_v50  ;;  %v1167_v56 = vpop.f32.mrf.mxu1  ;;  %v2642_v34 = vor.u32 %v2908_v28, %v2641_v27  ;;  %v2904_v50 = vld [vmem:[#allocation8 + $0x144] sm:$0xf0]  ;;  %v2903_v51 = vld [vmem:[#allocation8 + $0x144] sm:$0xf] }
  0xd8   :  { %1686 = vmatpush.bf16.msrb.mxu2 %v2534_v12  ;;  %v2626_v54 = vor.u32 %v2904_v50, %v2625_v49  ;;  %v2915_v49 = vld [vmem:[#allocation10 + $0x20] sm:$0xff]  ;;  %v2924_v50 = vld [vmem:[#allocation10 + $0x68] sm:$0xff] }
  0xd9   :  { %v1168_v60 = vadd.f32 %v1167_v56, %v1155_v55  ;;  %1654 = vmatpush.bf16.msrb.mxu0 %v2642_v34  ;;  %v2630_v55 = vor.u32 %v2903_v51, %v2627_v52  ;;  %v2617_v56 = vld [vmem:[#allocation8 + $0x130] sm:$0xf]  ;;  %v2914_v51 = vld [vmem:[#allocation10 + $0x18] sm:$0xff]  ;;  %v2923_v52 = vld [vmem:[#allocation10 + $0x60] sm:$0xff] }
  0xda   :  { %1693 = vmatpush.bf16.msrb.mxu3 %v2646_v35  ;;  %v2618_v62 = vor.u32 %v2902_v58, %v2617_v56 }
  0xdb   :  { %v1327_v36 = vmax.f32 %v1168_v60, 0.0  ;;  %v2619_v60 = vld [vmem:[#allocation8 + $0x138] sm:$0xf0] }
  0xdd   :  { %v1330_v3 = vpack.c.bf16 %v1327_v36, %v1327_v36  ;;  %1655 = vmatpush.bf16.msrb.mxu0 %v2634_v43  ;;  %v2622_v36 = vor.u32 %v2901_v59, %v2619_v60  ;;  %v2912_v59 = vld [vmem:[#allocation10 + $0x8] sm:$0xff]  ;;  %v2921_v60 = vld [vmem:[#allocation10 + $0x50] sm:$0xff] }
  0xde   :  { %v1180_v4 = vpop.f32.mrf.mxu2  ;;  %v1156_v5 = vpop.f32.mrf.mxu0  ;;  %1694 = vmatpush.bf16.msrb.mxu3 %v2638_v47  ;;  %v2916_v47 = vld [vmem:[#allocation10 + $0x28] sm:$0xff] }
  0xdf   :  { %1635 = vmatmul.bf16.vlgmr.msra.gmra.mxu2 %v1330_v3  ;;  %1674 = vmatmul.bf16.vlgmr.msrb.gmra.mxu1 %v1330_v3  ;;  %v1169_v9 = vpop.f32.mrf.mxu1  ;;  %v1193_v11 = vpop.f32.mrf.mxu3  ;;  %v1181_v15 = vadd.f32 %v1180_v4, %v299_v21  ;;  %v2611_v3 = vld [vmem:[#allocation8 + $0x128] sm:$0xf0]  ;;  %v2610_v4 = vor.u32 %v2900_v1, %v2609_v63  ;;  %v2896_v21 = vld [vmem:[#allocation8 + $0x104] sm:$0xf0] }
  0xe0   :  { %v2614_v5 = vor.u32 %v2899_v2, %v2611_v3  ;;  %v2602_v9 = vor.u32 %v2898_v7, %v2601_v6 }
  0xe1   :  { %v1194_v16 = vadd.f32 %v1193_v11, %v1181_v15  ;;  %1656 = vmatpush.bf16.msrb.mxu0 %v2626_v54  ;;  %v2922_v54 = vld [vmem:[#allocation10 + $0x58] sm:$0xff] }
  0xe2   :  { %1695 = vmatpush.bf16.msrb.mxu3 %v2630_v55 }
  0xe5   :  { %1657 = vmatpush.bf16.msrb.mxu0 %v2618_v62  ;;  %v2919_v62 = vld [vmem:[#allocation10 + $0x40] sm:$0xff] }
  0xe6   :  { %v1182_v13 = vpop.f32.mrf.mxu2  ;;  %1696 = vmatpush.bf16.msrb.mxu3 %v2622_v36  ;;  %v1381_v36 = vld [vmem:[%s3207_s4] sm:$0x3] }
  0xe7   :  { %v1195_v14 = vpop.f32.mrf.mxu3  ;;  %v2593_v13 = vld [vmem:[#allocation8 + $0x100] sm:$0xf]  ;;  %v1383_v63 = vperm.slane %v1381_v36, 0  ;;  %v1384_v2 = vperm.slane %v1381_v36, 1 }
  0xe8   :  { %v2895_v14 = vld [vmem:[#allocation8 + $0x104] sm:$0xf]  ;;  %v2594_v15 = vor.u32 %v2896_v21, %v2593_v13 }
  0xe9   :  { %1658 = vmatpush.bf16.msrb.mxu0 %v2610_v4 }
  0xea   :  { %1697 = vmatpush.bf16.msrb.mxu3 %v2614_v5 }
  0xed   :  { %1659 = vmatpush.bf16.msrb.mxu0 %v2602_v9 }
  0xee   :  { %1698 = vmatpush.bf16.msrb.mxu3 %v2606_v20 }
  0xf1   :  { %1660 = vmatpush.bf16.msrb.mxu0 %v2594_v15  ;;  %v2939_v15 = vld [vmem:[%s3209_s6] ss:$0 sm:$0xff] }
  0xf5   :  { %1841 = vmatpush.bf16.msra.mxu0 %v2918_v0 }
  0xf6   :  { %v1206_v17 = vpop.f32.mrf.mxu0 }
  0xf7   :  { %v1207_v18 = vadd.f32 %v1206_v17, %v1194_v16  ;;  %v1219_v19 = vpop.f32.mrf.mxu1  ;;  %v2595_v16 = vld [vmem:[#allocation8 + $0x108] sm:$0xf0] }
  0xf8   :  { %v2598_v17 = vor.u32 %v2895_v14, %v2595_v16 }
  0xf9   :  { %v1220_v33 = vadd.f32 %v1219_v19, %v1207_v18 }
  0xfa   :  { %1699 = vmatpush.bf16.msrb.mxu3 %v2598_v17 }
  0xfe   :  { %v1232_v37 = vpop.f32.mrf.mxu2  ;;  %v1208_v42 = vpop.f32.mrf.mxu0 }
  0xff   :  { %v1233_v41 = vadd.f32 %v1232_v37, %v1220_v33  ;;  %v1245_v45 = vpop.f32.mrf.mxu3  ;;  %v1221_v46 = vpop.f32.mrf.mxu1 }
 0x100   :  { %v2926_v46 = vld [vmem:[#allocation10 + $0x78] sm:$0xff] }
 0x101   :  { %v1246_v48 = vadd.f32 %v1245_v45, %v1233_v41  ;;  %v2917_v45 = vld [vmem:[#allocation10 + $0x30] sm:$0xff]  ;;  %1854 = vmatpush.bf16.msra.mxu1 %v2926_v46 }
 0x102   :  { %1842 = vmatpush.bf16.msra.mxu0 %v2917_v45 }
 0x103   :  { %v1328_v53 = vmax.f32 %v1246_v48, 0.0  ;;  %v2925_v48 = vld [vmem:[#allocation10 + $0x70] sm:$0xff] }
 0x105   :  { %v1331_v57 = vpack.c.bf16 %v1328_v53, %v1328_v53  ;;  %1855 = vmatpush.bf16.msra.mxu1 %v2925_v48  ;;  %v2913_v53 = vld [vmem:[#allocation10 + $0x10] sm:$0xff] }
 0x106   :  { %v1234_v31 = vpop.f32.mrf.mxu2  ;;  %1843 = vmatpush.bf16.msra.mxu0 %v2916_v47 }
 0x107   :  { %1648 = vmatmul.bf16.vlgmr.msra.gmra.mxu3 %v1331_v57  ;;  %1687 = vmatmul.bf16.vlgmr.msrb.gmra.mxu2 %v1331_v57  ;;  %v1247_v61 = vpop.f32.mrf.mxu3  ;;  %v2911_v31 = vld [vmem:[#allocation10] sm:$0xff] }
 0x108   :  { %v2920_v61 = vld [vmem:[#allocation10 + $0x48] sm:$0xff] }
 0x109   :  { %1856 = vmatpush.bf16.msra.mxu1 %v2924_v50 }
 0x10a   :  { %1844 = vmatpush.bf16.msra.mxu0 %v2915_v49 }
 0x10d   :  { %1857 = vmatpush.bf16.msra.mxu1 %v2923_v52 }
 0x10e   :  { %1845 = vmatpush.bf16.msra.mxu0 %v2914_v51 }
 0x111   :  { %1858 = vmatpush.bf16.msra.mxu1 %v2922_v54 }
 0x112   :  { %1846 = vmatpush.bf16.msra.mxu0 %v2913_v53 }
 0x115   :  { %1859 = vmatpush.bf16.msra.mxu1 %v2921_v60 }
 0x116   :  { %v1258_v11 = vpop.f32.mrf.mxu0  ;;  %1847 = vmatpush.bf16.msra.mxu0 %v2912_v59 }
 0x117   :  { %v1271_v12 = vpop.f32.mrf.mxu1  ;;  %v1259_v25 = vadd.f32 %v1258_v11, %v300_v24 }
 0x119   :  { %v1272_v28 = vadd.f32 %v1271_v12, %v1259_v25  ;;  %1860 = vmatpush.bf16.msra.mxu1 %v2920_v61 }
 0x11a   :  { %1848 = vmatpush.bf16.msra.mxu0 %v2911_v31 }
 0x11d   :  { %1861 = vmatpush.bf16.msra.mxu1 %v2919_v62 }
 0x11e   :  { %v1260_v18 = vpop.f32.mrf.mxu0  ;;  %v1284_v22 = vpop.f32.mrf.mxu2 }
 0x11f   :  { %v1273_v19 = vpop.f32.mrf.mxu1  ;;  %v1297_v23 = vpop.f32.mrf.mxu3  ;;  %v1285_v29 = vadd.f32 %v1284_v22, %v1272_v28 }
 0x121   :  { %v1298_v30 = vadd.f32 %v1297_v23, %v1285_v29 }
 0x126   :  { %v1286_v26 = vpop.f32.mrf.mxu2 }
 0x127   :  { %v1299_v27 = vpop.f32.mrf.mxu3 }
 0x136   :  { %v1310_v32 = vpop.f32.mrf.mxu0 }
 0x137   :  { %v1311_v33 = vadd.f32 %v1310_v32, %v1298_v30  ;;  %v1323_v34 = vpop.f32.mrf.mxu1 }
 0x139   :  { %v1324_v35 = vadd.f32 %v1323_v34, %v1311_v33 }
 0x13b   :  { %v1329_v37 = vmax.f32 %v1324_v35, 0.0 }
 0x13d   :  { %v1332_v38 = vpack.c.bf16 %v1329_v37, %v1329_v37 }
 0x13e   :  { %v1312_v39 = vpop.f32.mrf.mxu0 }
 0x13f   :  { %v1325_v40 = vpop.f32.mrf.mxu1  ;;  %1661 = vmatmul.bf16.vlgmr.msrb.gmra.mxu0 %v1332_v38  ;;  %1700 = vmatmul.bf16.vlgmr.msrb.gmra.mxu3 %v1332_v38 }
 0x15c   :  { %v1675_v41 = vpop.f32.mrf.mxu1 }
 0x15d   :  { %v1676_v6 = vadd.f32 %v1675_v41, %v1384_v2 }
 0x162   :  { %v1636_v42 = vpop.f32.mrf.mxu2 }
 0x163   :  { %v1637_v1 = vadd.f32 %v1636_v42, %v1383_v63 }
 0x164   :  { %v1677_v43 = vpop.f32.mrf.mxu1 }
 0x16a   :  { %v1638_v44 = vpop.f32.mrf.mxu2 }
 0x18a   :  { %v1649_v55 = vpop.f32.mrf.mxu3  ;;  %v1688_v56 = vpop.f32.mrf.mxu2 }
 0x18b   :  { %v1650_v3 = vadd.f32 %v1649_v55, %v1637_v1  ;;  %v1689_v8 = vadd.f32 %v1688_v56, %v1676_v6 }
 0x192   :  { %v1651_v57 = vpop.f32.mrf.mxu3  ;;  %v1690_v58 = vpop.f32.mrf.mxu2 }
 0x1bc   :  { %v1662_v4 = vpop.f32.mrf.mxu0 }
 0x1bd   :  { %v1663_v5 = vadd.f32 %v1662_v4, %v1650_v3 }
 0x1bf   :  { %v1705_v7 = vmax.f32 %v1663_v5, 0.0 }
 0x1c1   :  { %v1707_v9 = vpack.c.bf16 %v1705_v7, %v1705_v7 }
 0x1c2   :  { %v1701_v10 = vpop.f32.mrf.mxu3 }
 0x1c3   :  { %v1702_v20 = vadd.f32 %v1701_v10, %v1689_v8  ;;  %1849 = vmatmul.bf16.vlgmr.msra.gmra.mxu0 %v1707_v9 }
 0x1c4   :  { %v1664_v11 = vpop.f32.mrf.mxu0 }
 0x1c5   :  { %v1706_v12 = vmax.f32 %v1702_v20, 0.0 }
 0x1c7   :  { %v1708_v13 = vpack.c.bf16 %v1706_v12, %v1706_v12 }
 0x1c9   :  { %1862 = vmatmul.bf16.vlgmr.msra.gmra.mxu1 %v1708_v13 }
 0x1ca   :  { %v1703_v21 = vpop.f32.mrf.mxu3 }
 0x240   :  { %v1850_v14 = vpop.f32.mrf.mxu0 }
 0x241   :  { %v1851_v16 = vadd.f32 %v2939_v15, %v1850_v14 }
 0x246   :  { %v1863_v17 = vpop.f32.mrf.mxu1 }
 0x247   :  { %v1864_v18 = vadd.f32 %v1863_v17, %v1851_v16 }
 0x248   :  { %v1852_v19 = vpop.f32.mrf.mxu0 }
 0x249   :  { %1867 = vst [vmem:[#allocation11] sm:$0xff] %v1864_v18 }
 0x24a   :  { %1878 = dma.vmem_to_hbm [thread:$0]  %s1874_s8, 128, %s1876_s11, [#allocation4]  }
 0x24e   :  { %v1865_v22 = vpop.f32.mrf.mxu1 }
 0x24f   :  { %3090 = dma.done.wait [#allocation4], 128  }
 0x250   :  { %3091 = vsyncadd [#allocation4], 4294967168 }
 0x251   :  { %1883 = vsyncpa [#allocation3], 1 }
 0x252   :  { %1884 = vsyncpa [#allocation6], 1 }
 0x253   :  { %1885 = vsyncpa [#allocation9], 1 }
 0x254   :  { %1886 = vsyncpa [#allocation4], 1 }

// kernel: tpu_custom_call.1
= control target key start
LH: loop header
LB: loop body
LE: loop exit
PB: predicated region body
PF: predicated region fallthrough
CT: control target
= control target key end

     0   :  { %12 = vsyncpa [#allocation3], 0  ;;  %s3203_s0 = inlined_call_operand.hbm [shape: bf16[8,768], index: 0, kind: input, shape index: {}]   ;;  %s3204_s1 = inlined_call_operand.hbm [shape: bf16[768,384], index: 1, kind: input, shape index: {}]   ;;  %s3205_s2 = inlined_call_operand.hbm [shape: f32[1,384], index: 2, kind: input, shape index: {}]   ;;  %s3206_s3 = inlined_call_operand.hbm [shape: bf16[384,256], index: 3, kind: input, shape index: {}]   ;;  %s3207_s4 = inlined_call_operand.vmem [shape: f32[1,256], index: 4, kind: input, shape index: {}]   ;;  %s3208_s5 = inlined_call_operand.hbm [shape: bf16[256,128], index: 5, kind: input, shape index: {}]   ;;  %s3209_s6 = inlined_call_operand.vmem [shape: f32[1,128], index: 6, kind: input, shape index: {}]   ;;  %s3210_s7 = inlined_call_operand.hbm [shape: f32[8,128], index: 7, kind: output, shape index: {}]  }
   0x1   :  { %13 = vsyncpa [#allocation6], 0 }
   0x2   :  { %14 = vsyncpa [#allocation9], 0  ;;  %s31_s26 = sshll.u32 %s3204_s1, 4  ;;  %s32_s26 = int_to_ptr.hbm [resolvable:$true] %s31_s26 }
   0x3   :  { %15 = vsyncpa [#allocation4], 0  ;;  %s3092_s27 = smov [#allocation5]   ;;  %s55_s8 = sshll.u32 %s3206_s3, 4  ;;  %s56_s8 = int_to_ptr.hbm [resolvable:$true] %s55_s8 }
   0x4   :  { %s33_s28 = sshll.u32 %s3092_s27, 4  ;;  %s3093_s9 = smov 192   ;;  %s34_s28 = int_to_ptr.vmem [resolvable:$true] %s33_s28 }
   0x5   :  { %s3094_s10 = smov 12   ;;  %s3095_s11 = smov [#allocation8]  }
   0x6   :  { %39 = dma.hbm_to_vmem [thread:$0]  %s32_s26, 18432, %s34_s28, [#allocation6], %s3093_s9, %s3093_s9, %s3094_s10  }
   0x7   :  { %s57_s12 = sshll.u32 %s3095_s11, 4  ;;  %s3096_s13 = smov 128   ;;  %s58_s12 = int_to_ptr.vmem [resolvable:$true] %s57_s12 }
   0x8   :  { %s3097_s14 = smov 8   ;;  %s21_s16 = sshll.u32 %s3203_s0, 4  ;;  %s22_s16 = int_to_ptr.hbm [resolvable:$true] %s21_s16 }
   0x9   :  { %63 = dma.hbm_to_vmem [thread:$0]  %s56_s8, 6144, %s58_s12, [#allocation9], %s3096_s13, %s3096_s13, %s3097_s14  }
   0xa   :  { %s3098_s17 = smov [#allocation2]   ;;  %s45_s20 = sshll.u32 %s3205_s2, 4  ;;  %s46_s20 = int_to_ptr.hbm [resolvable:$true] %s45_s20 }
   0xb   :  { %s23_s18 = sshll.u32 %s3098_s17, 4  ;;  %s3099_s21 = smov [#allocation7]   ;;  %s24_s18 = int_to_ptr.vmem [resolvable:$true] %s23_s18 }
   0xc   :  { %26 = dma.hbm_to_vmem [thread:$0]  %s22_s16, 384, %s24_s18, [#allocation3]  }
   0xd   :  { %s47_s22 = sshll.u32 %s3099_s21, 4  ;;  %s70_s25 = sshll.u32 %s3208_s5, 4  ;;  %s48_s22 = int_to_ptr.vmem [resolvable:$true] %s47_s22  ;;  %s71_s25 = int_to_ptr.hbm [resolvable:$true] %s70_s25 }
   0xe   :  { %50 = dma.hbm_to_vmem [thread:$0]  %s46_s20, 48, %s48_s22, [#allocation6]  }
   0xf   :  { %s3100_s0 = smov [#allocation10]   ;;  %s3101_s27 = smov 64  }
  0x10   :  { %s72_s26 = sshll.u32 %s3100_s0, 4  ;;  %s3102_s28 = smov 4   ;;  %s73_s26 = int_to_ptr.vmem [resolvable:$true] %s72_s26 }
  0x11   :  { %78 = dma.hbm_to_vmem [thread:$0]  %s71_s25, 2048, %s73_s26, [#allocation9], %s3101_s27, %s3101_s27, %s3102_s28  }
  0x12   :  { %3084 = dma.done.wait [#allocation3], 384  }
  0x13   :  { %3085 = vsyncadd [#allocation3], 4294966912 }
  0x14   :  { %3086 = dma.done.wait [#allocation6], 18480  }
  0x15   :  { %3087 = vsyncadd [#allocation6], 4294948816 }
  0x16   :  { %3088 = dma.done.wait [#allocation9], 8192  }
  0x17   :  { %3089 = vsyncadd [#allocation9], 4294959104  ;;  %v1973_v0 = vld [vmem:[#allocation5 + $0xa8] sm:$0xf]  ;;  %v2741_v1 = vld [vmem:[#allocation5 + $0xb0] sm:$0xf0] }
  0x18   :  { %v2069_v2 = vld [vmem:[#allocation5 + $0x168] sm:$0xf]  ;;  %v1974_v3 = vor.u32 %v2741_v1, %v1973_v0  ;;  %v2765_v4 = vld [vmem:[#allocation5 + $0x170] sm:$0xf0]  ;;  %v1961_v11 = vld [vmem:[#allocation5 + $0x90] sm:$0xf] }
  0x19   :  { %v2165_v5 = vld [vmem:[#allocation5 + $0x228] sm:$0xf]  ;;  %v2789_v6 = vld [vmem:[#allocation5 + $0x230] sm:$0xf0]  ;;  %v2070_v7 = vor.u32 %v2765_v4, %v2069_v2  ;;  %v2738_v13 = vld [vmem:[#allocation5 + $0x98] sm:$0xf0] }
  0x1a   :  { %v2166_v8 = vor.u32 %v2789_v6, %v2165_v5  ;;  %v2261_v9 = vld [vmem:[#allocation5 + $0x2e8] sm:$0xf]  ;;  %v2813_v10 = vld [vmem:[#allocation5 + $0x2f0] sm:$0xf0]  ;;  %1093 = vmatpush.bf16.msra.mxu0 %v1974_v3  ;;  %v2057_v14 = vld [vmem:[#allocation5 + $0x150] sm:$0xf]  ;;  %v1962_v16 = vor.u32 %v2738_v13, %v1961_v11 }
  0x1b   :  { %v2262_v12 = vor.u32 %v2813_v10, %v2261_v9  ;;  %v2762_v15 = vld [vmem:[#allocation5 + $0x158] sm:$0xf0]  ;;  %1106 = vmatpush.bf16.msra.mxu1 %v2070_v7  ;;  %v2153_v18 = vld [vmem:[#allocation5 + $0x210] sm:$0xf]  ;;  %v1949_v23 = vld [vmem:[#allocation5 + $0x78] sm:$0xf] }
  0x1c   :  { %1119 = vmatpush.bf16.msra.mxu2 %v2166_v8  ;;  %v2058_v17 = vor.u32 %v2762_v15, %v2057_v14  ;;  %v2786_v19 = vld [vmem:[#allocation5 + $0x218] sm:$0xf0]  ;;  %v2249_v20 = vld [vmem:[#allocation5 + $0x2d0] sm:$0xf]  ;;  %v2735_v24 = vld [vmem:[#allocation5 + $0x80] sm:$0xf0] }
  0x1d   :  { %1132 = vmatpush.bf16.msra.mxu3 %v2262_v12  ;;  %v2154_v21 = vor.u32 %v2786_v19, %v2153_v18  ;;  %v2810_v22 = vld [vmem:[#allocation5 + $0x2d8] sm:$0xf0]  ;;  %v2045_v26 = vld [vmem:[#allocation5 + $0x138] sm:$0xf]  ;;  %v2759_v27 = vld [vmem:[#allocation5 + $0x140] sm:$0xf0]  ;;  %v1950_v29 = vor.u32 %v2735_v24, %v1949_v23 }
  0x1e   :  { %v2250_v25 = vor.u32 %v2810_v22, %v2249_v20  ;;  %v2141_v28 = vld [vmem:[#allocation5 + $0x1f8] sm:$0xf]  ;;  %1094 = vmatpush.bf16.msra.mxu0 %v1962_v16  ;;  %v2783_v30 = vld [vmem:[#allocation5 + $0x200] sm:$0xf0]  ;;  %v2046_v33 = vor.u32 %v2759_v27, %v2045_v26  ;;  %v1937_v35 = vld [vmem:[#allocation5 + $0x60] sm:$0xf] }
  0x1f   :  { %v2237_v31 = vld [vmem:[#allocation5 + $0x2b8] sm:$0xf]  ;;  %v2807_v32 = vld [vmem:[#allocation5 + $0x2c0] sm:$0xf0]  ;;  %1107 = vmatpush.bf16.msra.mxu1 %v2058_v17  ;;  %v2142_v34 = vor.u32 %v2783_v30, %v2141_v28  ;;  %v2732_v36 = vld [vmem:[#allocation5 + $0x68] sm:$0xf0] }
  0x20   :  { %1120 = vmatpush.bf16.msra.mxu2 %v2154_v21  ;;  %v2033_v37 = vld [vmem:[#allocation5 + $0x120] sm:$0xf]  ;;  %v2238_v38 = vor.u32 %v2807_v32, %v2237_v31  ;;  %v2756_v39 = vld [vmem:[#allocation5 + $0x128] sm:$0xf0]  ;;  %v1938_v44 = vor.u32 %v2732_v36, %v1937_v35  ;;  %v1925_v47 = vld [vmem:[#allocation5 + $0x48] sm:$0xf] }
  0x21   :  { %1133 = vmatpush.bf16.msra.mxu3 %v2250_v25  ;;  %v2129_v40 = vld [vmem:[#allocation5 + $0x1e0] sm:$0xf]  ;;  %v2780_v41 = vld [vmem:[#allocation5 + $0x1e8] sm:$0xf0]  ;;  %v2034_v45 = vor.u32 %v2756_v39, %v2033_v37  ;;  %v2729_v48 = vld [vmem:[#allocation5 + $0x50] sm:$0xf0] }
  0x22   :  { %v2225_v42 = vld [vmem:[#allocation5 + $0x2a0] sm:$0xf]  ;;  %v2804_v43 = vld [vmem:[#allocation5 + $0x2a8] sm:$0xf0]  ;;  %1095 = vmatpush.bf16.msra.mxu0 %v1950_v29  ;;  %v2130_v46 = vor.u32 %v2780_v41, %v2129_v40  ;;  %v2021_v49 = vld [vmem:[#allocation5 + $0x108] sm:$0xf]  ;;  %v1926_v56 = vor.u32 %v2729_v48, %v1925_v47 }
  0x23   :  { %1108 = vmatpush.bf16.msra.mxu1 %v2046_v33  ;;  %v2226_v50 = vor.u32 %v2804_v43, %v2225_v42  ;;  %v2753_v51 = vld [vmem:[#allocation5 + $0x110] sm:$0xf0]  ;;  %v2117_v52 = vld [vmem:[#allocation5 + $0x1c8] sm:$0xf]  ;;  %v1913_v59 = vld [vmem:[#allocation5 + $0x30] sm:$0xf] }
  0x24   :  { %1121 = vmatpush.bf16.msra.mxu2 %v2142_v34  ;;  %v2777_v53 = vld [vmem:[#allocation5 + $0x1d0] sm:$0xf0]  ;;  %v2213_v54 = vld [vmem:[#allocation5 + $0x288] sm:$0xf]  ;;  %v2022_v57 = vor.u32 %v2753_v51, %v2021_v49  ;;  %v2726_v60 = vld [vmem:[#allocation5 + $0x38] sm:$0xf0] }
  0x25   :  { %1134 = vmatpush.bf16.msra.mxu3 %v2238_v38  ;;  %v2801_v55 = vld [vmem:[#allocation5 + $0x290] sm:$0xf0]  ;;  %v2118_v58 = vor.u32 %v2777_v53, %v2117_v52  ;;  %v2009_v61 = vld [vmem:[#allocation5 + $0xf0] sm:$0xf]  ;;  %v2750_v63 = vld [vmem:[#allocation5 + $0xf8] sm:$0xf0]  ;;  %v1914_v4 = vor.u32 %v2726_v60, %v1913_v59 }
  0x26   :  { %1096 = vmatpush.bf16.msra.mxu0 %v1938_v44  ;;  %v2214_v62 = vor.u32 %v2801_v55, %v2213_v54  ;;  %v2105_v0 = vld [vmem:[#allocation5 + $0x1b0] sm:$0xf]  ;;  %v2774_v1 = vld [vmem:[#allocation5 + $0x1b8] sm:$0xf0]  ;;  %v2010_v5 = vor.u32 %v2750_v63, %v2009_v61  ;;  %v1901_v7 = vld [vmem:[#allocation5 + $0x18] sm:$0xf] }
  0x27   :  { %1109 = vmatpush.bf16.msra.mxu1 %v2034_v45  ;;  %v2201_v2 = vld [vmem:[#allocation5 + $0x270] sm:$0xf]  ;;  %v2798_v3 = vld [vmem:[#allocation5 + $0x278] sm:$0xf0]  ;;  %v2106_v6 = vor.u32 %v2774_v1, %v2105_v0  ;;  %v2723_v8 = vld [vmem:[#allocation5 + $0x20] sm:$0xf0] }
  0x28   :  { %1122 = vmatpush.bf16.msra.mxu2 %v2130_v46  ;;  %v1997_v9 = vld [vmem:[#allocation5 + $0xd8] sm:$0xf]  ;;  %v2202_v10 = vor.u32 %v2798_v3, %v2201_v2  ;;  %v2747_v11 = vld [vmem:[#allocation5 + $0xe0] sm:$0xf0]  ;;  %v1902_v16 = vor.u32 %v2723_v8, %v1901_v7  ;;  %v1889_v17 = vld [vmem:[#allocation5] sm:$0xf] }
  0x29   :  { %1135 = vmatpush.bf16.msra.mxu3 %v2226_v50  ;;  %v2093_v12 = vld [vmem:[#allocation5 + $0x198] sm:$0xf]  ;;  %v2771_v13 = vld [vmem:[#allocation5 + $0x1a0] sm:$0xf0]  ;;  %v2720_v18 = vld [vmem:[#allocation5 + $0x8] sm:$0xf0]  ;;  %v1998_v19 = vor.u32 %v2747_v11, %v1997_v9 }
  0x2a   :  { %1097 = vmatpush.bf16.msra.mxu0 %v1926_v56  ;;  %v2189_v14 = vld [vmem:[#allocation5 + $0x258] sm:$0xf]  ;;  %v2795_v15 = vld [vmem:[#allocation5 + $0x260] sm:$0xf0]  ;;  %v2094_v20 = vor.u32 %v2771_v13, %v2093_v12  ;;  %v1985_v21 = vld [vmem:[#allocation5 + $0xc0] sm:$0xf]  ;;  %v1890_v31 = vor.u32 %v2720_v18, %v1889_v17 }
  0x2b   :  { %1110 = vmatpush.bf16.msra.mxu1 %v2022_v57  ;;  %v2744_v22 = vld [vmem:[#allocation5 + $0xc8] sm:$0xf0]  ;;  %v2081_v23 = vld [vmem:[#allocation5 + $0x180] sm:$0xf]  ;;  %v2190_v24 = vor.u32 %v2795_v15, %v2189_v14  ;;  %v2357_v26 = vld [vmem:[#allocation5 + $0x3a8] sm:$0xf] }
  0x2c   :  { %1123 = vmatpush.bf16.msra.mxu2 %v2118_v58  ;;  %v2768_v25 = vld [vmem:[#allocation5 + $0x188] sm:$0xf0]  ;;  %v2837_v27 = vld [vmem:[#allocation5 + $0x3b0] sm:$0xf0]  ;;  %v2453_v28 = vld [vmem:[#allocation5 + $0x468] sm:$0xf]  ;;  %v1986_v35 = vor.u32 %v2744_v22, %v1985_v21 }
  0x2d   :  { %1136 = vmatpush.bf16.msra.mxu3 %v2214_v62  ;;  %v2861_v29 = vld [vmem:[#allocation5 + $0x470] sm:$0xf0]  ;;  %v2740_v30 = vld [vmem:[#allocation5 + $0xac] sm:$0xf]  ;;  %v1975_v32 = vld [vmem:[#allocation5 + $0xb4] sm:$0xf0]  ;;  %v2082_v36 = vor.u32 %v2768_v25, %v2081_v23  ;;  %v2358_v39 = vor.u32 %v2837_v27, %v2357_v26 }
  0x2e   :  { %1098 = vmatpush.bf16.msra.mxu0 %v1914_v4  ;;  %v2177_v33 = vld [vmem:[#allocation5 + $0x240] sm:$0xf]  ;;  %v2792_v34 = vld [vmem:[#allocation5 + $0x248] sm:$0xf0]  ;;  %v2071_v38 = vld [vmem:[#allocation5 + $0x174] sm:$0xf0]  ;;  %v2454_v40 = vor.u32 %v2861_v29, %v2453_v28  ;;  %v1978_v42 = vor.u32 %v2740_v30, %v1975_v32 }
  0x2f   :  { %1111 = vmatpush.bf16.msra.mxu1 %v2010_v5  ;;  %v2764_v37 = vld [vmem:[#allocation5 + $0x16c] sm:$0xf]  ;;  %v2345_v41 = vld [vmem:[#allocation5 + $0x390] sm:$0xf]  ;;  %v2178_v43 = vor.u32 %v2792_v34, %v2177_v33  ;;  %v2834_v44 = vld [vmem:[#allocation5 + $0x398] sm:$0xf0] }
  0x30   :  { %1124 = vmatpush.bf16.msra.mxu2 %v2106_v6  ;;  %v2441_v45 = vld [vmem:[#allocation5 + $0x450] sm:$0xf]  ;;  %v2858_v46 = vld [vmem:[#allocation5 + $0x458] sm:$0xf0]  ;;  %v2074_v47 = vor.u32 %v2764_v37, %v2071_v38  ;;  %v2737_v48 = vld [vmem:[#allocation5 + $0x94] sm:$0xf]  ;;  %v2346_v53 = vor.u32 %v2834_v44, %v2345_v41 }
  0x31   :  { %1137 = vmatpush.bf16.msra.mxu3 %v2202_v10  ;;  %v1963_v49 = vld [vmem:[#allocation5 + $0x9c] sm:$0xf0]  ;;  %v2761_v50 = vld [vmem:[#allocation5 + $0x154] sm:$0xf]  ;;  %v101_v52 = vld [vmem:[#allocation2] sm:$0xff]  ;;  %v2442_v54 = vor.u32 %v2858_v46, %v2441_v45  ;;  %s3103_s30 = smov [#allocation11]  }
  0x32   :  { %1099 = vmatpush.bf16.msra.mxu0 %v1902_v16  ;;  %v2059_v51 = vld [vmem:[#allocation5 + $0x15c] sm:$0xf0]  ;;  %v2333_v55 = vld [vmem:[#allocation5 + $0x378] sm:$0xf]  ;;  %v307_v56 = vunpack.c.l.b16 %v101_v52  ;;  %v308_v57 = vunpack.c.h.b16 %v101_v52  ;;  %v1966_v58 = vor.u32 %v2737_v48, %v1963_v49  ;;  %v2831_v59 = vld [vmem:[#allocation5 + $0x380] sm:$0xf0] }
  0x33   :  { %1112 = vmatpush.bf16.msra.mxu1 %v1998_v19  ;;  %v2429_v60 = vld [vmem:[#allocation5 + $0x438] sm:$0xf]  ;;  %v2855_v61 = vld [vmem:[#allocation5 + $0x440] sm:$0xf0]  ;;  %v2062_v62 = vor.u32 %v2761_v50, %v2059_v51  ;;  %v2734_v63 = vld [vmem:[#allocation5 + $0x7c] sm:$0xf]  ;;  %v2334_v5 = vor.u32 %v2831_v59, %v2333_v55 }
  0x34   :  { %1125 = vmatpush.bf16.msra.mxu2 %v2094_v20  ;;  %v1951_v0 = vld [vmem:[#allocation5 + $0x84] sm:$0xf0]  ;;  %v3159_v1 = vpack.c.b16 %v307_v56, %v307_v56  ;;  %v3161_v2 = vpack.c.b16 %v308_v57, %v308_v57  ;;  %v2758_v3 = vld [vmem:[#allocation5 + $0x13c] sm:$0xf]  ;;  %v2430_v6 = vor.u32 %v2855_v61, %v2429_v60  ;;  %v2321_v7 = vld [vmem:[#allocation5 + $0x360] sm:$0xf] }
  0x35   :  { %1138 = vmatpush.bf16.msra.mxu3 %v2190_v24  ;;  %v2047_v4 = vld [vmem:[#allocation5 + $0x144] sm:$0xf0]  ;;  %v102_v8 = vld [vmem:[#allocation2 + $0x8] sm:$0xff]  ;;  %v1954_v9 = vor.u32 %v2734_v63, %v1951_v0  ;;  %v2828_v10 = vld [vmem:[#allocation5 + $0x368] sm:$0xf0]  ;;  %s1873_s8 = sshll.u32 %s3103_s30, 4  ;;  %s1874_s8 = int_to_ptr.vmem [resolvable:$true] %s1873_s8 }
  0x36   :  { %1100 = vmatpush.bf16.msra.mxu0 %v1890_v31  ;;  %v2417_v11 = vld [vmem:[#allocation5 + $0x420] sm:$0xf]  ;;  %v2852_v12 = vld [vmem:[#allocation5 + $0x428] sm:$0xf0]  ;;  %v309_v13 = vunpack.c.l.b16 %v102_v8  ;;  %v310_v14 = vunpack.c.h.b16 %v102_v8  ;;  %v2050_v15 = vor.u32 %v2758_v3, %v2047_v4  ;;  %v2731_v16 = vld [vmem:[#allocation5 + $0x64] sm:$0xf]  ;;  %v2322_v22 = vor.u32 %v2828_v10, %v2321_v7 }
  0x37   :  { %1113 = vmatpush.bf16.msra.mxu1 %v1986_v35  ;;  %v1939_v17 = vld [vmem:[#allocation5 + $0x6c] sm:$0xf0]  ;;  %v2755_v18 = vld [vmem:[#allocation5 + $0x124] sm:$0xf]  ;;  %v2418_v23 = vor.u32 %v2852_v12, %v2417_v11  ;;  %v2309_v24 = vld [vmem:[#allocation5 + $0x348] sm:$0xf] }
  0x38   :  { %1126 = vmatpush.bf16.msra.mxu2 %v2082_v36  ;;  %v2035_v19 = vld [vmem:[#allocation5 + $0x12c] sm:$0xf0]  ;;  %v3165_v20 = vpack.c.b16 %v309_v13, %v309_v13  ;;  %v3167_v21 = vpack.c.b16 %v310_v14, %v310_v14  ;;  %v1942_v25 = vor.u32 %v2731_v16, %v1939_v17  ;;  %v2825_v26 = vld [vmem:[#allocation5 + $0x350] sm:$0xf0]  ;;  %v2405_v27 = vld [vmem:[#allocation5 + $0x408] sm:$0xf] }
  0x39   :  { %1139 = vmatpush.bf16.msra.mxu3 %v2178_v43  ;;  %1101 = vmatmul.bf16.vlgmr.msra.gmra.mxu0 %v3159_v1  ;;  %v2849_v28 = vld [vmem:[#allocation5 + $0x410] sm:$0xf0]  ;;  %v2038_v29 = vor.u32 %v2755_v18, %v2035_v19  ;;  %v2728_v30 = vld [vmem:[#allocation5 + $0x4c] sm:$0xf]  ;;  %v1927_v31 = vld [vmem:[#allocation5 + $0x54] sm:$0xf0]  ;;  %v2310_v34 = vor.u32 %v2825_v26, %v2309_v24 }
  0x3a   :  { %1145 = vmatpush.bf16.msrb.mxu0 %v2358_v39  ;;  %1114 = vmatmul.bf16.vlgmr.msra.gmra.mxu1 %v3161_v2  ;;  %v2752_v32 = vld [vmem:[#allocation5 + $0x10c] sm:$0xf]  ;;  %v2023_v33 = vld [vmem:[#allocation5 + $0x114] sm:$0xf0]  ;;  %v2406_v35 = vor.u32 %v2849_v28, %v2405_v27  ;;  %v2297_v36 = vld [vmem:[#allocation5 + $0x330] sm:$0xf]  ;;  %v1930_v37 = vor.u32 %v2728_v30, %v1927_v31 }
  0x3b   :  { %1158 = vmatpush.bf16.msrb.mxu1 %v2454_v40  ;;  %1127 = vmatmul.bf16.vlgmr.msra.gmra.mxu2 %v3165_v20  ;;  %v2822_v38 = vld [vmem:[#allocation5 + $0x338] sm:$0xf0]  ;;  %v2393_v39 = vld [vmem:[#allocation5 + $0x3f0] sm:$0xf]  ;;  %v2026_v41 = vor.u32 %v2752_v32, %v2023_v33  ;;  %v1915_v43 = vld [vmem:[#allocation5 + $0x3c] sm:$0xf0] }
  0x3c   :  { %1171 = vmatpush.bf16.msrb.mxu2 %v1978_v42  ;;  %1140 = vmatmul.bf16.vlgmr.msra.gmra.mxu3 %v3167_v21  ;;  %v2846_v40 = vld [vmem:[#allocation5 + $0x3f8] sm:$0xf0]  ;;  %v2725_v42 = vld [vmem:[#allocation5 + $0x34] sm:$0xf]  ;;  %v2011_v45 = vld [vmem:[#allocation5 + $0xfc] sm:$0xf0]  ;;  %v2298_v46 = vor.u32 %v2822_v38, %v2297_v36 }
  0x3d   :  { %1184 = vmatpush.bf16.msrb.mxu3 %v2074_v47  ;;  %v2749_v44 = vld [vmem:[#allocation5 + $0xf4] sm:$0xf]  ;;  %v2394_v47 = vor.u32 %v2846_v40, %v2393_v39  ;;  %v2285_v48 = vld [vmem:[#allocation5 + $0x318] sm:$0xf]  ;;  %v1918_v49 = vor.u32 %v2725_v42, %v1915_v43  ;;  %v2819_v50 = vld [vmem:[#allocation5 + $0x320] sm:$0xf0] }
  0x3e   :  { %1146 = vmatpush.bf16.msrb.mxu0 %v2346_v53  ;;  %v2381_v51 = vld [vmem:[#allocation5 + $0x3d8] sm:$0xf]  ;;  %v2843_v52 = vld [vmem:[#allocation5 + $0x3e0] sm:$0xf0]  ;;  %v2014_v53 = vor.u32 %v2749_v44, %v2011_v45  ;;  %v1903_v55 = vld [vmem:[#allocation5 + $0x24] sm:$0xf0]  ;;  %v2286_v59 = vor.u32 %v2819_v50, %v2285_v48 }
  0x3f   :  { %1159 = vmatpush.bf16.msrb.mxu1 %v2442_v54  ;;  %v2722_v54 = vld [vmem:[#allocation5 + $0x1c] sm:$0xf]  ;;  %v1999_v57 = vld [vmem:[#allocation5 + $0xe4] sm:$0xf0]  ;;  %v2382_v60 = vor.u32 %v2843_v52, %v2381_v51  ;;  %v2816_v61 = vld [vmem:[#allocation5 + $0x308] sm:$0xf0] }
  0x40   :  { %1172 = vmatpush.bf16.msrb.mxu2 %v1966_v58  ;;  %v2746_v56 = vld [vmem:[#allocation5 + $0xdc] sm:$0xf]  ;;  %v2273_v58 = vld [vmem:[#allocation5 + $0x300] sm:$0xf]  ;;  %v1906_v0 = vor.u32 %v2722_v54, %v1903_v55  ;;  %v2840_v3 = vld [vmem:[#allocation5 + $0x3c8] sm:$0xf0] }
  0x41   :  { %1185 = vmatpush.bf16.msrb.mxu3 %v2062_v62  ;;  %v2369_v62 = vld [vmem:[#allocation5 + $0x3c0] sm:$0xf]  ;;  %v103_v63 = vld [vmem:[#allocation2 + $0x10] sm:$0xff]  ;;  %v2719_v4 = vld [vmem:[#allocation5 + $0x4] sm:$0xf]  ;;  %v2274_v14 = vor.u32 %v2816_v61, %v2273_v58  ;;  %s1875_s11 = sshll.u32 %s3210_s7, 4  ;;  %s1876_s11 = int_to_ptr.hbm [resolvable:$true] %s1875_s11 }
  0x42   :  { %1147 = vmatpush.bf16.msrb.mxu0 %v2334_v5  ;;  %v1891_v5 = vld [vmem:[#allocation5 + $0xc] sm:$0xf0]  ;;  %v2788_v7 = vld [vmem:[#allocation5 + $0x22c] sm:$0xf]  ;;  %v2167_v8 = vld [vmem:[#allocation5 + $0x234] sm:$0xf0]  ;;  %v311_v13 = vunpack.c.l.b16 %v103_v63  ;;  %v312_v18 = vunpack.c.h.b16 %v103_v63 }
  0x43   :  { %1160 = vmatpush.bf16.msrb.mxu1 %v2430_v6  ;;  %v2002_v6 = vor.u32 %v2746_v56, %v1999_v57  ;;  %v2263_v10 = vld [vmem:[#allocation5 + $0x2f4] sm:$0xf0]  ;;  %v2836_v11 = vld [vmem:[#allocation5 + $0x3ac] sm:$0xf]  ;;  %v2743_v16 = vld [vmem:[#allocation5 + $0xc4] sm:$0xf]  ;;  %v1894_v19 = vor.u32 %v2719_v4, %v1891_v5 }
  0x44   :  { %1173 = vmatpush.bf16.msrb.mxu2 %v1954_v9  ;;  %v2812_v9 = vld [vmem:[#allocation5 + $0x2ec] sm:$0xf]  ;;  %v2359_v12 = vld [vmem:[#allocation5 + $0x3b4] sm:$0xf0]  ;;  %v1987_v17 = vld [vmem:[#allocation5 + $0xcc] sm:$0xf0]  ;;  %v3171_v31 = vpack.c.b16 %v311_v13, %v311_v13  ;;  %v3173_v36 = vpack.c.b16 %v312_v18, %v312_v18 }
  0x45   :  { %1186 = vmatpush.bf16.msrb.mxu3 %v2050_v15  ;;  %v2370_v15 = vor.u32 %v2840_v3, %v2369_v62  ;;  %v2455_v24 = vld [vmem:[#allocation5 + $0x474] sm:$0xf0]  ;;  %v2362_v26 = vor.u32 %v2836_v11, %v2359_v12  ;;  %v2785_v27 = vld [vmem:[#allocation5 + $0x214] sm:$0xf]  ;;  %v2155_v28 = vld [vmem:[#allocation5 + $0x21c] sm:$0xf0]  ;;  %v1990_v30 = vor.u32 %v2743_v16, %v1987_v17 }
  0x46   :  { %1148 = vmatpush.bf16.msrb.mxu0 %v2322_v22  ;;  %v2170_v22 = vor.u32 %v2788_v7, %v2167_v8  ;;  %v2251_v32 = vld [vmem:[#allocation5 + $0x2dc] sm:$0xf0]  ;;  %v2833_v33 = vld [vmem:[#allocation5 + $0x394] sm:$0xf]  ;;  %v2782_v42 = vld [vmem:[#allocation5 + $0x1fc] sm:$0xf] }
  0x47   :  { %1161 = vmatpush.bf16.msrb.mxu1 %v2418_v23  ;;  %v2860_v23 = vld [vmem:[#allocation5 + $0x46c] sm:$0xf]  ;;  %v2857_v38 = vld [vmem:[#allocation5 + $0x454] sm:$0xf]  ;;  %v2443_v39 = vld [vmem:[#allocation5 + $0x45c] sm:$0xf0] }
  0x48   :  { %1174 = vmatpush.bf16.msrb.mxu2 %v1942_v25  ;;  %v2266_v25 = vor.u32 %v2812_v9, %v2263_v10  ;;  %v2143_v43 = vld [vmem:[#allocation5 + $0x204] sm:$0xf0]  ;;  %v2806_v44 = vld [vmem:[#allocation5 + $0x2bc] sm:$0xf]  ;;  %v2446_v48 = vor.u32 %v2857_v38, %v2443_v39  ;;  %v2779_v54 = vld [vmem:[#allocation5 + $0x1e4] sm:$0xf] }
  0x49   :  { %1187 = vmatpush.bf16.msrb.mxu3 %v2038_v29  ;;  %v2809_v29 = vld [vmem:[#allocation5 + $0x2d4] sm:$0xf]  ;;  %v2239_v45 = vld [vmem:[#allocation5 + $0x2c4] sm:$0xf0]  ;;  %v2854_v50 = vld [vmem:[#allocation5 + $0x43c] sm:$0xf] }
  0x4a   :  { %1149 = vmatpush.bf16.msrb.mxu0 %v2310_v34  ;;  %v2347_v34 = vld [vmem:[#allocation5 + $0x39c] sm:$0xf0]  ;;  %v2254_v40 = vor.u32 %v2809_v29, %v2251_v32  ;;  %v2431_v51 = vld [vmem:[#allocation5 + $0x444] sm:$0xf0]  ;;  %v2242_v52 = vor.u32 %v2806_v44, %v2239_v45  ;;  %v2131_v55 = vld [vmem:[#allocation5 + $0x1ec] sm:$0xf0] }
  0x4b   :  { %1162 = vmatpush.bf16.msrb.mxu1 %v2406_v35  ;;  %v2458_v35 = vor.u32 %v2860_v23, %v2455_v24  ;;  %v2803_v56 = vld [vmem:[#allocation5 + $0x2a4] sm:$0xf]  ;;  %v2227_v57 = vld [vmem:[#allocation5 + $0x2ac] sm:$0xf0]  ;;  %v2134_v61 = vor.u32 %v2779_v54, %v2131_v55  ;;  %v2119_v5 = vld [vmem:[#allocation5 + $0x1d4] sm:$0xf0] }
  0x4c   :  { %1175 = vmatpush.bf16.msrb.mxu2 %v1930_v37  ;;  %v2158_v37 = vor.u32 %v2785_v27, %v2155_v28  ;;  %v2827_v58 = vld [vmem:[#allocation5 + $0x364] sm:$0xf]  ;;  %v2419_v63 = vld [vmem:[#allocation5 + $0x42c] sm:$0xf0]  ;;  %v2230_v3 = vor.u32 %v2803_v56, %v2227_v57  ;;  %v2215_v7 = vld [vmem:[#allocation5 + $0x294] sm:$0xf0] }
  0x4d   :  { %1188 = vmatpush.bf16.msrb.mxu3 %v2026_v41  ;;  %v2350_v41 = vor.u32 %v2833_v33, %v2347_v34  ;;  %v2851_v62 = vld [vmem:[#allocation5 + $0x424] sm:$0xf]  ;;  %v2824_v8 = vld [vmem:[#allocation5 + $0x34c] sm:$0xf]  ;;  %v2311_v9 = vld [vmem:[#allocation5 + $0x354] sm:$0xf0] }
  0x4e   :  { %1150 = vmatpush.bf16.msrb.mxu0 %v2298_v46  ;;  %v2830_v46 = vld [vmem:[#allocation5 + $0x37c] sm:$0xf]  ;;  %v2422_v10 = vor.u32 %v2851_v62, %v2419_v63  ;;  %v2848_v12 = vld [vmem:[#allocation5 + $0x40c] sm:$0xf]  ;;  %v2407_v13 = vld [vmem:[#allocation5 + $0x414] sm:$0xf0] }
  0x4f   :  { %1163 = vmatpush.bf16.msrb.mxu1 %v2394_v47  ;;  %v2335_v47 = vld [vmem:[#allocation5 + $0x384] sm:$0xf0]  ;;  %v2773_v16 = vld [vmem:[#allocation5 + $0x1b4] sm:$0xf]  ;;  %v2107_v17 = vld [vmem:[#allocation5 + $0x1bc] sm:$0xf0]  ;;  %v2410_v24 = vor.u32 %v2848_v12, %v2407_v13 }
  0x50   :  { %1176 = vmatpush.bf16.msrb.mxu2 %v1918_v49  ;;  %v2146_v49 = vor.u32 %v2782_v42, %v2143_v43  ;;  %v2797_v18 = vld [vmem:[#allocation5 + $0x274] sm:$0xf]  ;;  %v2299_v23 = vld [vmem:[#allocation5 + $0x33c] sm:$0xf0]  ;;  %v2095_v32 = vld [vmem:[#allocation5 + $0x1a4] sm:$0xf0] }
  0x51   :  { %1189 = vmatpush.bf16.msrb.mxu3 %v2014_v53  ;;  %v2338_v53 = vor.u32 %v2830_v46, %v2335_v47  ;;  %v2395_v27 = vld [vmem:[#allocation5 + $0x3fc] sm:$0xf0]  ;;  %v2794_v33 = vld [vmem:[#allocation5 + $0x25c] sm:$0xf]  ;;  %v2191_v34 = vld [vmem:[#allocation5 + $0x264] sm:$0xf0] }
  0x52   :  { %1151 = vmatpush.bf16.msrb.mxu0 %v2286_v59  ;;  %v2323_v59 = vld [vmem:[#allocation5 + $0x36c] sm:$0xf0]  ;;  %v2767_v42 = vld [vmem:[#allocation5 + $0x184] sm:$0xf]  ;;  %v2194_v43 = vor.u32 %v2794_v33, %v2191_v34  ;;  %v2766_v54 = vld [vmem:[#allocation5 + $0x178] sm:$0xf0] }
  0x53   :  { %1164 = vmatpush.bf16.msrb.mxu1 %v2382_v60  ;;  %v2434_v60 = vor.u32 %v2854_v50, %v2431_v51  ;;  %v2326_v4 = vor.u32 %v2827_v58, %v2323_v59  ;;  %v2083_v45 = vld [vmem:[#allocation5 + $0x18c] sm:$0xf0]  ;;  %v2791_v46 = vld [vmem:[#allocation5 + $0x244] sm:$0xf]  ;;  %v2790_v63 = vld [vmem:[#allocation5 + $0x238] sm:$0xf0] }
  0x54   :  { %1177 = vmatpush.bf16.msrb.mxu2 %v1906_v0  ;;  %v2776_v0 = vld [vmem:[#allocation5 + $0x1cc] sm:$0xf]  ;;  %v2179_v47 = vld [vmem:[#allocation5 + $0x24c] sm:$0xf0]  ;;  %v2086_v55 = vor.u32 %v2767_v42, %v2083_v45  ;;  %v2839_v56 = vld [vmem:[#allocation5 + $0x3c4] sm:$0xf] }
  0x55   :  { %1190 = vmatpush.bf16.msrb.mxu3 %v2002_v6  ;;  %v2800_v6 = vld [vmem:[#allocation5 + $0x28c] sm:$0xf]  ;;  %v2122_v11 = vor.u32 %v2776_v0, %v2119_v5  ;;  %v1981_v50 = vld [vmem:[#allocation5 + $0xb0] sm:$0xf]  ;;  %v2182_v58 = vor.u32 %v2791_v46, %v2179_v47  ;;  %v1969_v5 = vld [vmem:[#allocation5 + $0x98] sm:$0xf] }
  0x56   :  { %1152 = vmatpush.bf16.msrb.mxu0 %v2274_v14  ;;  %v2218_v14 = vor.u32 %v2800_v6, %v2215_v7  ;;  %v2371_v57 = vld [vmem:[#allocation5 + $0x3cc] sm:$0xf0]  ;;  %v2739_v6 = vld [vmem:[#allocation5 + $0xa0] sm:$0xf0]  ;;  %v2065_v7 = vld [vmem:[#allocation5 + $0x158] sm:$0xf] }
  0x57   :  { %1165 = vmatpush.bf16.msrb.mxu1 %v2370_v15  ;;  %v2314_v15 = vor.u32 %v2824_v8, %v2311_v9  ;;  %v2269_v0 = vld [vmem:[#allocation5 + $0x2f0] sm:$0xf]  ;;  %v2763_v8 = vld [vmem:[#allocation5 + $0x160] sm:$0xf0]  ;;  %v1970_v12 = vor.u32 %v2739_v6, %v1969_v5  ;;  %v2733_v33 = vld [vmem:[#allocation5 + $0x70] sm:$0xf0] }
  0x58   :  { %1178 = vmatpush.bf16.msrb.mxu2 %v1894_v19  ;;  %v2203_v19 = vld [vmem:[#allocation5 + $0x27c] sm:$0xf0]  ;;  %v2787_v13 = vld [vmem:[#allocation5 + $0x220] sm:$0xf0]  ;;  %v2041_v34 = vld [vmem:[#allocation5 + $0x128] sm:$0xf] }
  0x59   :  { %1191 = vmatpush.bf16.msrb.mxu3 %v1990_v30  ;;  %1153 = vmatmul.bf16.vlgmr.msrb.gmra.mxu0 %v3171_v31  ;;  %v2206_v28 = vor.u32 %v2797_v18, %v2203_v19  ;;  %v2770_v30 = vld [vmem:[#allocation5 + $0x19c] sm:$0xf]  ;;  %v2736_v18 = vld [vmem:[#allocation5 + $0x88] sm:$0xf0]  ;;  %v2053_v19 = vld [vmem:[#allocation5 + $0x140] sm:$0xf] }
  0x5a   :  { %1197 = vmatpush.bf16.msra.mxu0 %v2170_v22  ;;  %1166 = vmatmul.bf16.vlgmr.msrb.gmra.mxu1 %v3173_v36  ;;  %v2821_v22 = vld [vmem:[#allocation5 + $0x334] sm:$0xf]  ;;  %v2098_v39 = vor.u32 %v2770_v30, %v2095_v32  ;;  %v1945_v32 = vld [vmem:[#allocation5 + $0x68] sm:$0xf]  ;;  %v1933_v45 = vld [vmem:[#allocation5 + $0x50] sm:$0xf] }
  0x5b   :  { %1210 = vmatpush.bf16.msra.mxu1 %v2266_v25  ;;  %1179 = vmatmul.bf16.vlgmr.msrb.gmra.mxu2 %v3159_v1  ;;  %v2110_v25 = vor.u32 %v2773_v16, %v2107_v17  ;;  %v2302_v29 = vor.u32 %v2821_v22, %v2299_v23  ;;  %v2066_v16 = vor.u32 %v2763_v8, %v2065_v7  ;;  %v1957_v17 = vld [vmem:[#allocation5 + $0x80] sm:$0xf]  ;;  %v2760_v22 = vld [vmem:[#allocation5 + $0x148] sm:$0xf0]  ;;  %v2233_v42 = vld [vmem:[#allocation5 + $0x2a8] sm:$0xf] }
  0x5c   :  { %1223 = vmatpush.bf16.msra.mxu2 %v2362_v26  ;;  %1192 = vmatmul.bf16.vlgmr.msrb.gmra.mxu3 %v3161_v2  ;;  %v2845_v26 = vld [vmem:[#allocation5 + $0x3f4] sm:$0xf]  ;;  %v2054_v30 = vor.u32 %v2760_v22, %v2053_v19  ;;  %v2730_v46 = vld [vmem:[#allocation5 + $0x58] sm:$0xf0]  ;;  %v2029_v47 = vld [vmem:[#allocation5 + $0x110] sm:$0xf] }
  0x5d   :  { %1236 = vmatpush.bf16.msra.mxu3 %v2458_v35  ;;  %v2818_v35 = vld [vmem:[#allocation5 + $0x31c] sm:$0xf]  ;;  %v2398_v38 = vor.u32 %v2845_v26, %v2395_v27  ;;  %v1958_v26 = vor.u32 %v2736_v18, %v1957_v17  ;;  %v2784_v27 = vld [vmem:[#allocation5 + $0x208] sm:$0xf0]  ;;  %v2799_v5 = vld [vmem:[#allocation5 + $0x280] sm:$0xf0] }
  0x5e   :  { %1198 = vmatpush.bf16.msra.mxu0 %v2158_v37  ;;  %v2287_v37 = vld [vmem:[#allocation5 + $0x324] sm:$0xf0]  ;;  %v1909_v7 = vld [vmem:[#allocation5 + $0x20] sm:$0xf]  ;;  %v2724_v8 = vld [vmem:[#allocation5 + $0x28] sm:$0xf0] }
  0x5f   :  { %1211 = vmatpush.bf16.msra.mxu1 %v2254_v40  ;;  %v2842_v40 = vld [vmem:[#allocation5 + $0x3dc] sm:$0xf]  ;;  %v2290_v44 = vor.u32 %v2818_v35, %v2287_v37  ;;  %v2757_v35 = vld [vmem:[#allocation5 + $0x130] sm:$0xf0]  ;;  %v2796_v17 = vld [vmem:[#allocation5 + $0x268] sm:$0xf0] }
  0x60   :  { %1224 = vmatpush.bf16.msra.mxu2 %v2350_v41  ;;  %v2383_v41 = vld [vmem:[#allocation5 + $0x3e4] sm:$0xf0]  ;;  %v2721_v22 = vld [vmem:[#allocation5 + $0x10] sm:$0xf0] }
  0x61   :  { %1237 = vmatpush.bf16.msra.mxu3 %v2446_v48  ;;  %v2815_v48 = vld [vmem:[#allocation5 + $0x304] sm:$0xf]  ;;  %v2386_v51 = vor.u32 %v2842_v40, %v2383_v41  ;;  %v1946_v40 = vor.u32 %v2733_v33, %v1945_v32  ;;  %v2781_v41 = vld [vmem:[#allocation5 + $0x1f0] sm:$0xf0]  ;;  %v1897_v19 = vld [vmem:[#allocation5 + $0x8] sm:$0xf] }
  0x62   :  { %1199 = vmatpush.bf16.msra.mxu0 %v2146_v49  ;;  %v2275_v49 = vld [vmem:[#allocation5 + $0x30c] sm:$0xf0]  ;;  %v1898_v32 = vor.u32 %v2721_v22, %v1897_v19  ;;  %v2089_v33 = vld [vmem:[#allocation5 + $0x188] sm:$0xf]  ;;  %v2293_v19 = vld [vmem:[#allocation5 + $0x320] sm:$0xf] }
  0x63   :  { %1212 = vmatpush.bf16.msra.mxu1 %v2242_v52  ;;  %v2742_v52 = vld [vmem:[#allocation5 + $0xb8] sm:$0xf0]  ;;  %v2278_v59 = vor.u32 %v2815_v48, %v2275_v49  ;;  %v2820_v22 = vld [vmem:[#allocation5 + $0x328] sm:$0xf0] }
  0x64   :  { %1225 = vmatpush.bf16.msra.mxu2 %v2338_v53  ;;  %v2077_v53 = vld [vmem:[#allocation5 + $0x170] sm:$0xf]  ;;  %v2754_v48 = vld [vmem:[#allocation5 + $0x118] sm:$0xf0] }
  0x65   :  { %1238 = vmatpush.bf16.msra.mxu3 %v2434_v60  ;;  %v2173_v60 = vld [vmem:[#allocation5 + $0x230] sm:$0xf]  ;;  %v2078_v62 = vor.u32 %v2766_v54, %v2077_v53  ;;  %v2778_v53 = vld [vmem:[#allocation5 + $0x1d8] sm:$0xf0] }
  0x66   :  { %1200 = vmatpush.bf16.msra.mxu0 %v2134_v61  ;;  %v1982_v61 = vor.u32 %v2742_v52, %v1981_v50  ;;  %v2174_v9 = vor.u32 %v2790_v63, %v2173_v60  ;;  %v1934_v52 = vor.u32 %v2730_v46, %v1933_v45  ;;  %v2221_v54 = vld [vmem:[#allocation5 + $0x290] sm:$0xf]  ;;  %v2751_v60 = vld [vmem:[#allocation5 + $0x100] sm:$0xf0]  ;;  %v2113_v63 = vld [vmem:[#allocation5 + $0x1b8] sm:$0xf] }
  0x67   :  { %1213 = vmatpush.bf16.msra.mxu1 %v2230_v3  ;;  %v2814_v3 = vld [vmem:[#allocation5 + $0x2f8] sm:$0xf0] }
  0x68   :  { %1226 = vmatpush.bf16.msra.mxu2 %v2326_v4  ;;  %v2374_v4 = vor.u32 %v2839_v56, %v2371_v57  ;;  %v2030_v56 = vor.u32 %v2754_v48, %v2029_v47  ;;  %v1921_v57 = vld [vmem:[#allocation5 + $0x38] sm:$0xf]  ;;  %v2341_v48 = vld [vmem:[#allocation5 + $0x380] sm:$0xf] }
  0x69   :  { %1239 = vmatpush.bf16.msra.mxu3 %v2422_v10  ;;  %v2270_v10 = vor.u32 %v2814_v3, %v2269_v0  ;;  %v2775_v3 = vld [vmem:[#allocation5 + $0x1c0] sm:$0xf0] }
  0x6a   :  { %1201 = vmatpush.bf16.msra.mxu0 %v2122_v11  ;;  %v2161_v11 = vld [vmem:[#allocation5 + $0x218] sm:$0xf] }
  0x6b   :  { %1214 = vmatpush.bf16.msra.mxu1 %v2218_v14  ;;  %v2257_v14 = vld [vmem:[#allocation5 + $0x2d8] sm:$0xf]  ;;  %v2162_v23 = vor.u32 %v2787_v13, %v2161_v11  ;;  %v2114_v11 = vor.u32 %v2775_v3, %v2113_v63  ;;  %v2101_v13 = vld [vmem:[#allocation5 + $0x1a0] sm:$0xf]  ;;  %v2425_v63 = vld [vmem:[#allocation5 + $0x428] sm:$0xf] }
  0x6c   :  { %1227 = vmatpush.bf16.msra.mxu2 %v2314_v15  ;;  %v2811_v15 = vld [vmem:[#allocation5 + $0x2e0] sm:$0xf0]  ;;  %v2317_v3 = vld [vmem:[#allocation5 + $0x350] sm:$0xf] }
  0x6d   :  { %1240 = vmatpush.bf16.msra.mxu3 %v2410_v24  ;;  %v2258_v24 = vor.u32 %v2811_v15, %v2257_v14  ;;  %v1910_v14 = vor.u32 %v2724_v8, %v1909_v7  ;;  %v2772_v15 = vld [vmem:[#allocation5 + $0x1a8] sm:$0xf0]  ;;  %v2305_v8 = vld [vmem:[#allocation5 + $0x338] sm:$0xf] }
  0x6e   :  { %1202 = vmatpush.bf16.msra.mxu0 %v2110_v25  ;;  %v2149_v25 = vld [vmem:[#allocation5 + $0x200] sm:$0xf] }
  0x6f   :  { %1215 = vmatpush.bf16.msra.mxu1 %v2206_v28  ;;  %v2245_v28 = vld [vmem:[#allocation5 + $0x2c0] sm:$0xf]  ;;  %v2150_v37 = vor.u32 %v2784_v27, %v2149_v25  ;;  %v2365_v25 = vld [vmem:[#allocation5 + $0x3b0] sm:$0xf] }
  0x70   :  { %1228 = vmatpush.bf16.msra.mxu2 %v2302_v29  ;;  %v2808_v29 = vld [vmem:[#allocation5 + $0x2c8] sm:$0xf0]  ;;  %v2461_v27 = vld [vmem:[#allocation5 + $0x470] sm:$0xf] }
  0x71   :  { %1241 = vmatpush.bf16.msra.mxu3 %v2398_v38  ;;  %v2246_v38 = vor.u32 %v2808_v29, %v2245_v28  ;;  %v2862_v28 = vld [vmem:[#allocation5 + $0x478] sm:$0xf0]  ;;  %v2102_v29 = vor.u32 %v2772_v15, %v2101_v13  ;;  %v2847_v13 = vld [vmem:[#allocation5 + $0x400] sm:$0xf0]  ;;  %v2872_v15 = vld [vmem:[#allocation8 + $0x44] sm:$0xf0] }
  0x72   :  { %1203 = vmatpush.bf16.msra.mxu0 %v2098_v39  ;;  %v2137_v39 = vld [vmem:[#allocation5 + $0x1e8] sm:$0xf] }
  0x73   :  { %1216 = vmatpush.bf16.msra.mxu1 %v2194_v43  ;;  %v2805_v43 = vld [vmem:[#allocation5 + $0x2b0] sm:$0xf0]  ;;  %v2138_v49 = vor.u32 %v2781_v41, %v2137_v39  ;;  %v2353_v41 = vld [vmem:[#allocation5 + $0x398] sm:$0xf] }
  0x74   :  { %1229 = vmatpush.bf16.msra.mxu2 %v2290_v44  ;;  %v2042_v44 = vor.u32 %v2757_v35, %v2041_v34  ;;  %v2234_v50 = vor.u32 %v2805_v43, %v2233_v42  ;;  %v2769_v34 = vld [vmem:[#allocation5 + $0x190] sm:$0xf0]  ;;  %v2835_v42 = vld [vmem:[#allocation5 + $0x3a0] sm:$0xf0]  ;;  %v2449_v43 = vld [vmem:[#allocation5 + $0x458] sm:$0xf] }
  0x75   :  { %1242 = vmatpush.bf16.msra.mxu3 %v2386_v51  ;;  %v2125_v51 = vld [vmem:[#allocation5 + $0x1d0] sm:$0xf]  ;;  %v2793_v39 = vld [vmem:[#allocation5 + $0x250] sm:$0xf0]  ;;  %v2090_v45 = vor.u32 %v2769_v34, %v2089_v33  ;;  %v2354_v47 = vor.u32 %v2835_v42, %v2353_v41  ;;  %v2377_v33 = vld [vmem:[#allocation5 + $0x3c8] sm:$0xf] }
  0x76   :  { %1204 = vmatpush.bf16.msra.mxu0 %v2086_v55  ;;  %v2802_v55 = vld [vmem:[#allocation5 + $0x298] sm:$0xf0]  ;;  %v2841_v34 = vld [vmem:[#allocation5 + $0x3d0] sm:$0xf0] }
  0x77   :  { %1217 = vmatpush.bf16.msra.mxu1 %v2182_v58  ;;  %v2727_v58 = vld [vmem:[#allocation5 + $0x40] sm:$0xf0]  ;;  %v2378_v41 = vor.u32 %v2841_v34, %v2377_v33  ;;  %v2888_v33 = vld [vmem:[#allocation8 + $0xc4] sm:$0xf0] }
  0x78   :  { %1230 = vmatpush.bf16.msra.mxu2 %v2278_v59  ;;  %v2017_v59 = vld [vmem:[#allocation5 + $0xf8] sm:$0xf]  ;;  %v1922_v0 = vor.u32 %v2727_v58, %v1921_v57  ;;  %v2856_v57 = vld [vmem:[#allocation5 + $0x448] sm:$0xf0] }
  0x79   :  { %1243 = vmatpush.bf16.msra.mxu3 %v2374_v4  ;;  %1205 = vmatmul.bf16.vlgmr.msra.gmra.mxu0 %v3165_v20  ;;  %v2209_v4 = vld [vmem:[#allocation5 + $0x278] sm:$0xf]  ;;  %v2018_v6 = vor.u32 %v2751_v60, %v2017_v59 }
  0x7a   :  { %1249 = vmatpush.bf16.msrb.mxu0 %v1982_v61  ;;  %1218 = vmatmul.bf16.vlgmr.msra.gmra.mxu1 %v3167_v21  ;;  %v2126_v61 = vor.u32 %v2778_v53, %v2125_v51 }
  0x7b   :  { %1262 = vmatpush.bf16.msrb.mxu1 %v2078_v62  ;;  %1231 = vmatmul.bf16.vlgmr.msra.gmra.mxu2 %v3171_v31  ;;  %v2222_v62 = vor.u32 %v2802_v55, %v2221_v54  ;;  %v2513_v54 = vld [vmem:[#allocation8 + $0x60] sm:$0xf]  ;;  %v2876_v55 = vld [vmem:[#allocation8 + $0x64] sm:$0xf0] }
  0x7c   :  { %1275 = vmatpush.bf16.msrb.mxu2 %v2174_v9  ;;  %1244 = vmatmul.bf16.vlgmr.msra.gmra.mxu3 %v3173_v36  ;;  %v2005_v9 = vld [vmem:[#allocation5 + $0xe0] sm:$0xf]  ;;  %v2514_v59 = vor.u32 %v2876_v55, %v2513_v54 }
  0x7d   :  { %1288 = vmatpush.bf16.msrb.mxu3 %v2270_v10  ;;  %v2748_v10 = vld [vmem:[#allocation5 + $0xe8] sm:$0xf0] }
  0x7e   :  { %1250 = vmatpush.bf16.msrb.mxu0 %v1970_v12  ;;  %v2210_v12 = vor.u32 %v2799_v5, %v2209_v4  ;;  %v2006_v18 = vor.u32 %v2748_v10, %v2005_v9  ;;  %v2826_v4 = vld [vmem:[#allocation5 + $0x358] sm:$0xf0]  ;;  %v2413_v5 = vld [vmem:[#allocation5 + $0x410] sm:$0xf]  ;;  %v2823_v9 = vld [vmem:[#allocation5 + $0x340] sm:$0xf0] }
  0x7f   :  { %1263 = vmatpush.bf16.msrb.mxu1 %v2066_v16  ;;  %v2197_v16 = vld [vmem:[#allocation5 + $0x260] sm:$0xf]  ;;  %v2318_v7 = vor.u32 %v2826_v4, %v2317_v3  ;;  %v2894_v3 = vld [vmem:[#allocation8 + $0xf4] sm:$0xf0]  ;;  %v2893_v4 = vld [vmem:[#allocation8 + $0xf4] sm:$0xf] }
  0x80   :  { %1276 = vmatpush.bf16.msrb.mxu2 %v2162_v23  ;;  %v1993_v23 = vld [vmem:[#allocation5 + $0xc8] sm:$0xf] }
  0x81   :  { %1289 = vmatpush.bf16.msrb.mxu3 %v2258_v24  ;;  %v2745_v24 = vld [vmem:[#allocation5 + $0xd0] sm:$0xf0] }
  0x82   :  { %1251 = vmatpush.bf16.msrb.mxu0 %v1958_v26  ;;  %v2838_v26 = vld [vmem:[#allocation5 + $0x3b8] sm:$0xf0]  ;;  %v1994_v35 = vor.u32 %v2745_v24, %v1993_v23  ;;  %v2389_v23 = vld [vmem:[#allocation5 + $0x3e0] sm:$0xf]  ;;  %v2844_v24 = vld [vmem:[#allocation5 + $0x3e8] sm:$0xf0] }
  0x83   :  { %1264 = vmatpush.bf16.msrb.mxu1 %v2054_v30  ;;  %v2198_v30 = vor.u32 %v2796_v17, %v2197_v16  ;;  %v2306_v16 = vor.u32 %v2823_v9, %v2305_v8  ;;  %v2577_v8 = vld [vmem:[#allocation8 + $0xe0] sm:$0xf]  ;;  %v2892_v9 = vld [vmem:[#allocation8 + $0xe4] sm:$0xf0] }
  0x84   :  { %1277 = vmatpush.bf16.msrb.mxu2 %v2150_v37  ;;  %v2366_v37 = vor.u32 %v2838_v26, %v2365_v25  ;;  %v2489_v25 = vld [vmem:[#allocation8 + $0x30] sm:$0xf]  ;;  %v2870_v26 = vld [vmem:[#allocation8 + $0x34] sm:$0xf0] }
  0x85   :  { %1290 = vmatpush.bf16.msrb.mxu3 %v2246_v38  ;;  %v2185_v38 = vld [vmem:[#allocation5 + $0x248] sm:$0xf] }
  0x86   :  { %1252 = vmatpush.bf16.msrb.mxu0 %v1946_v40  ;;  %v2462_v40 = vor.u32 %v2862_v28, %v2461_v27  ;;  %v2186_v46 = vor.u32 %v2793_v39, %v2185_v38  ;;  %v2294_v27 = vor.u32 %v2820_v22, %v2293_v19  ;;  %v2490_v28 = vor.u32 %v2870_v26, %v2489_v25  ;;  %v2481_v39 = vld [vmem:[#allocation8 + $0x20] sm:$0xf]  ;;  %v2889_v19 = vld [vmem:[#allocation8 + $0xd4] sm:$0xf]  ;;  %v2571_v22 = vld [vmem:[#allocation8 + $0xd8] sm:$0xf0] }
  0x87   :  { %1265 = vmatpush.bf16.msrb.mxu1 %v2042_v44  ;;  %v2859_v44 = vld [vmem:[#allocation5 + $0x460] sm:$0xf0]  ;;  %v2467_v25 = vld [vmem:[#allocation8 + $0x8] sm:$0xf0] }
  0x88   :  { %1278 = vmatpush.bf16.msrb.mxu2 %v2138_v49  ;;  %v2521_v49 = vld [vmem:[#allocation8 + $0x70] sm:$0xf]  ;;  %v2450_v51 = vor.u32 %v2859_v44, %v2449_v43  ;;  %v2875_v44 = vld [vmem:[#allocation8 + $0x64] sm:$0xf] }
  0x89   :  { %1291 = vmatpush.bf16.msrb.mxu3 %v2234_v50  ;;  %v2878_v50 = vld [vmem:[#allocation8 + $0x74] sm:$0xf0] }
  0x8a   :  { %1253 = vmatpush.bf16.msrb.mxu0 %v1934_v52  ;;  %v2832_v52 = vld [vmem:[#allocation5 + $0x388] sm:$0xf0]  ;;  %v2522_v53 = vor.u32 %v2878_v50, %v2521_v49  ;;  %v2871_v50 = vld [vmem:[#allocation8 + $0x44] sm:$0xf] }
  0x8b   :  { %1266 = vmatpush.bf16.msrb.mxu1 %v2030_v56  ;;  %v2437_v56 = vld [vmem:[#allocation5 + $0x440] sm:$0xf]  ;;  %v2342_v58 = vor.u32 %v2832_v52, %v2341_v48  ;;  %v2473_v52 = vld [vmem:[#allocation8 + $0x10] sm:$0xf] }
  0x8c   :  { %1279 = vmatpush.bf16.msrb.mxu2 %v2126_v61  ;;  %v2438_v60 = vor.u32 %v2856_v57, %v2437_v56  ;;  %v2329_v61 = vld [vmem:[#allocation5 + $0x368] sm:$0xf]  ;;  %v2507_v48 = vld [vmem:[#allocation8 + $0x58] sm:$0xf0]  ;;  %v2869_v56 = vld [vmem:[#allocation8 + $0x34] sm:$0xf] }
  0x8d   :  { %1292 = vmatpush.bf16.msrb.mxu3 %v2222_v62  ;;  %v2829_v62 = vld [vmem:[#allocation5 + $0x370] sm:$0xf0]  ;;  %v2491_v57 = vld [vmem:[#allocation8 + $0x38] sm:$0xf0] }
  0x8e   :  { %1254 = vmatpush.bf16.msrb.mxu0 %v1922_v0  ;;  %v2853_v0 = vld [vmem:[#allocation5 + $0x430] sm:$0xf0] }
  0x8f   :  { %1267 = vmatpush.bf16.msrb.mxu1 %v2018_v6  ;;  %v2850_v6 = vld [vmem:[#allocation5 + $0x418] sm:$0xf0] }
  0x90   :  { %1280 = vmatpush.bf16.msrb.mxu2 %v2114_v11  ;;  %v2414_v10 = vor.u32 %v2850_v6, %v2413_v5  ;;  %v2505_v11 = vld [vmem:[#allocation8 + $0x50] sm:$0xf] }
  0x91   :  { %1293 = vmatpush.bf16.msrb.mxu3 %v2210_v12  ;;  %v2874_v12 = vld [vmem:[#allocation8 + $0x54] sm:$0xf0] }
  0x92   :  { %1255 = vmatpush.bf16.msrb.mxu0 %v1910_v14  ;;  %v2497_v14 = vld [vmem:[#allocation8 + $0x40] sm:$0xf] }
  0x93   :  { %1268 = vmatpush.bf16.msrb.mxu1 %v2006_v18  ;;  %v2498_v17 = vor.u32 %v2872_v15, %v2497_v14  ;;  %v2569_v15 = vld [vmem:[#allocation8 + $0xd0] sm:$0xf] }
  0x94   :  { %1281 = vmatpush.bf16.msrb.mxu2 %v2102_v29  ;;  %v2390_v29 = vor.u32 %v2844_v24, %v2389_v23  ;;  %v2863_v24 = vld [vmem:[#allocation8 + $0x4] sm:$0xf] }
  0x95   :  { %1294 = vmatpush.bf16.msrb.mxu3 %v2198_v30  ;;  %v2281_v30 = vld [vmem:[#allocation5 + $0x308] sm:$0xf]  ;;  %v2470_v34 = vor.u32 %v2863_v24, %v2467_v25  ;;  %v2909_v24 = vld [vmem:[#allocation8 + $0x174] sm:$0xf] }
  0x96   :  { %1256 = vmatpush.bf16.msrb.mxu0 %v1898_v32  ;;  %v2817_v32 = vld [vmem:[#allocation5 + $0x310] sm:$0xf0] }
  0x97   :  { %1269 = vmatpush.bf16.msrb.mxu1 %v1994_v35  ;;  %v2877_v35 = vld [vmem:[#allocation8 + $0x74] sm:$0xf]  ;;  %v2282_v38 = vor.u32 %v2817_v32, %v2281_v30  ;;  %v2574_v30 = vor.u32 %v2889_v19, %v2571_v22  ;;  %v2561_v32 = vld [vmem:[#allocation8 + $0xc0] sm:$0xf]  ;;  %v2649_v22 = vld [vmem:[#allocation8 + $0x170] sm:$0xf] }
  0x98   :  { %1282 = vmatpush.bf16.msrb.mxu2 %v2090_v45  ;;  %v2515_v45 = vld [vmem:[#allocation8 + $0x68] sm:$0xf0] }
  0x99   :  { %1257 = vmatmul.bf16.vlgmr.msrb.gmra.mxu0 %v3159_v1  ;;  %1295 = vmatpush.bf16.msrb.mxu3 %v2186_v46  ;;  %v2330_v1 = vor.u32 %v2829_v62, %v2329_v61  ;;  %v2518_v46 = vor.u32 %v2875_v44, %v2515_v45  ;;  %v2555_v44 = vld [vmem:[#allocation8 + $0xb8] sm:$0xf0] }
  0x9a   :  { %1301 = vmatpush.bf16.msra.mxu0 %v2366_v37  ;;  %1270 = vmatmul.bf16.vlgmr.msrb.gmra.mxu1 %v3161_v2  ;;  %v2426_v2 = vor.u32 %v2853_v0, %v2425_v63  ;;  %v2523_v37 = vld [vmem:[#allocation8 + $0x78] sm:$0xf0]  ;;  %v2483_v63 = vld [vmem:[#allocation8 + $0x28] sm:$0xf0] }
  0x9b   :  { %1314 = vmatpush.bf16.msra.mxu1 %v2462_v40  ;;  %1283 = vmatmul.bf16.vlgmr.msrb.gmra.mxu2 %v3165_v20  ;;  %v2401_v20 = vld [vmem:[#allocation5 + $0x3f8] sm:$0xf]  ;;  %v2868_v40 = vld [vmem:[#allocation8 + $0x24] sm:$0xf0]  ;;  %v2526_v43 = vor.u32 %v2877_v35, %v2523_v37  ;;  %v3189_v0 = vld [vmem:[#allocation7] sm:$0x7] }
  0x9c   :  { %1627 = vmatpush.bf16.msra.mxu2 %v2522_v53  ;;  %1296 = vmatmul.bf16.vlgmr.msrb.gmra.mxu3 %v3167_v21  ;;  %v2506_v21 = vor.u32 %v2874_v12, %v2505_v11  ;;  %v2402_v18 = vor.u32 %v2847_v13, %v2401_v20  ;;  %v2482_v42 = vor.u32 %v2868_v40, %v2481_v39  ;;  %v2866_v53 = vld [vmem:[#allocation8 + $0x14] sm:$0xf0]  ;;  %v2891_v11 = vld [vmem:[#allocation8 + $0xe4] sm:$0xf]  ;;  %v2579_v12 = vld [vmem:[#allocation8 + $0xe8] sm:$0xf0] }
  0x9d   :  { %v2474_v55 = vor.u32 %v2866_v53, %v2473_v52  ;;  %v2578_v13 = vor.u32 %v2892_v9, %v2577_v8  ;;  %v2582_v14 = vor.u32 %v2891_v11, %v2579_v12  ;;  %v2887_v35 = vld [vmem:[#allocation8 + $0xc4] sm:$0xf]  ;;  %v2563_v37 = vld [vmem:[#allocation8 + $0xc8] sm:$0xf0]  ;;  %v2545_v52 = vld [vmem:[#allocation8 + $0xa0] sm:$0xf] }
  0x9e   :  { %1302 = vmatpush.bf16.msra.mxu0 %v2354_v47  ;;  %v2873_v47 = vld [vmem:[#allocation8 + $0x54] sm:$0xf]  ;;  %v2566_v40 = vor.u32 %v2887_v35, %v2563_v37  ;;  %v2884_v53 = vld [vmem:[#allocation8 + $0xa4] sm:$0xf0]  ;;  %v2879_v8 = vld [vmem:[#allocation8 + $0x84] sm:$0xf] }
  0x9f   :  { %1315 = vmatpush.bf16.msra.mxu1 %v2450_v51  ;;  %v2510_v49 = vor.u32 %v2873_v47, %v2507_v48  ;;  %v2499_v51 = vld [vmem:[#allocation8 + $0x48] sm:$0xf0] }
  0xa0   :  { %1628 = vmatpush.bf16.msra.mxu2 %v2514_v59  ;;  %v2502_v54 = vor.u32 %v2871_v50, %v2499_v51  ;;  %v2864_v59 = vld [vmem:[#allocation8 + $0x4] sm:$0xf0] }
  0xa2   :  { %1303 = vmatpush.bf16.msra.mxu0 %v2342_v58  ;;  %v2465_v58 = vld [vmem:[#allocation8] sm:$0xf] }
  0xa3   :  { %1316 = vmatpush.bf16.msra.mxu1 %v2438_v60  ;;  %v2466_v61 = vor.u32 %v2864_v59, %v2465_v58  ;;  %v2547_v58 = vld [vmem:[#allocation8 + $0xa8] sm:$0xf0] }
  0xa4   :  { %1629 = vmatpush.bf16.msra.mxu2 %v2506_v21  ;;  %v298_v21 = vperm.slane %v3189_v0, 0 }
  0xa6   :  { %1304 = vmatpush.bf16.msra.mxu0 %v2330_v1  ;;  %v2865_v1 = vld [vmem:[#allocation8 + $0x14] sm:$0xf] }
  0xa7   :  { %1317 = vmatpush.bf16.msra.mxu1 %v2426_v2  ;;  %v2585_v2 = vld [vmem:[#allocation8 + $0xf0] sm:$0xf] }
  0xa8   :  { %1630 = vmatpush.bf16.msra.mxu2 %v2498_v17  ;;  %v2586_v6 = vor.u32 %v2894_v3, %v2585_v2 }
  0xaa   :  { %1305 = vmatpush.bf16.msra.mxu0 %v2318_v7  ;;  %v2587_v7 = vld [vmem:[#allocation8 + $0xf8] sm:$0xf0]  ;;  %1640 = vmatpush.bf16.msra.mxu3 %v2586_v6  ;;  %v2529_v6 = vld [vmem:[#allocation8 + $0x80] sm:$0xf] }
  0xab   :  { %1318 = vmatpush.bf16.msra.mxu1 %v2414_v10  ;;  %v2475_v10 = vld [vmem:[#allocation8 + $0x18] sm:$0xf0]  ;;  %v2590_v20 = vor.u32 %v2893_v4, %v2587_v7  ;;  %v2880_v7 = vld [vmem:[#allocation8 + $0x84] sm:$0xf0] }
  0xac   :  { %1631 = vmatpush.bf16.msra.mxu2 %v2490_v28 }
  0xae   :  { %1306 = vmatpush.bf16.msra.mxu0 %v2306_v16  ;;  %v2890_v16 = vld [vmem:[#allocation8 + $0xd4] sm:$0xf0]  ;;  %1641 = vmatpush.bf16.msra.mxu3 %v2578_v13 }
  0xaf   :  { %1319 = vmatpush.bf16.msra.mxu1 %v2402_v18  ;;  %v2478_v18 = vor.u32 %v2865_v1, %v2475_v10  ;;  %v2539_v1 = vld [vmem:[#allocation8 + $0x98] sm:$0xf0]  ;;  %v2530_v10 = vor.u32 %v2880_v7, %v2529_v6  ;;  %v2601_v6 = vld [vmem:[#allocation8 + $0x110] sm:$0xf]  ;;  %v2898_v7 = vld [vmem:[#allocation8 + $0x114] sm:$0xf0] }
  0xb0   :  { %1632 = vmatpush.bf16.msra.mxu2 %v2482_v42  ;;  %v2886_v42 = vld [vmem:[#allocation8 + $0xb4] sm:$0xf0] }
  0xb2   :  { %1307 = vmatpush.bf16.msra.mxu0 %v2294_v27  ;;  %v2570_v27 = vor.u32 %v2890_v16, %v2569_v15 }
  0xb3   :  { %1320 = vmatpush.bf16.msra.mxu1 %v2390_v29 }
  0xb4   :  { %1633 = vmatpush.bf16.msra.mxu2 %v2474_v55  ;;  %1642 = vmatpush.bf16.msra.mxu3 %v2570_v27  ;;  %v2641_v27 = vld [vmem:[#allocation8 + $0x160] sm:$0xf] }
  0xb6   :  { %1308 = vmatpush.bf16.msra.mxu0 %v2282_v38  ;;  %v1102_v60 = vpop.f32.mrf.mxu0  ;;  %v2562_v38 = vor.u32 %v2888_v33, %v2561_v32  ;;  %v2643_v32 = vld [vmem:[#allocation8 + $0x168] sm:$0xf0] }
  0xb7   :  { %1321 = vmatpush.bf16.msra.mxu1 %v2378_v41  ;;  %v1115_v62 = vpop.f32.mrf.mxu1  ;;  %v1103_v28 = vadd.f32 %v1102_v60, %v298_v21  ;;  %v2553_v41 = vld [vmem:[#allocation8 + $0xb0] sm:$0xf]  ;;  %v299_v21 = vperm.slane %v3189_v0, 1 }
  0xb8   :  { %1634 = vmatpush.bf16.msra.mxu2 %v2466_v61  ;;  %1643 = vmatpush.bf16.msra.mxu3 %v2562_v38  ;;  %v2882_v61 = vld [vmem:[#allocation8 + $0x94] sm:$0xf0]  ;;  %v2633_v38 = vld [vmem:[#allocation8 + $0x150] sm:$0xf] }
  0xb9   :  { %1309 = vmatmul.bf16.vlgmr.msra.gmra.mxu0 %v3171_v31  ;;  %v2494_v31 = vor.u32 %v2869_v56, %v2491_v57  ;;  %v1116_v39 = vadd.f32 %v1115_v62, %v1103_v28  ;;  %v2546_v57 = vor.u32 %v2884_v53, %v2545_v52  ;;  %v2881_v62 = vld [vmem:[#allocation8 + $0x94] sm:$0xf]  ;;  %v2908_v28 = vld [vmem:[#allocation8 + $0x164] sm:$0xf0]  ;;  %v2627_v52 = vld [vmem:[#allocation8 + $0x148] sm:$0xf0] }
  0xba   :  { %1322 = vmatmul.bf16.vlgmr.msra.gmra.mxu1 %v3173_v36  ;;  %v2867_v36 = vld [vmem:[#allocation8 + $0x24] sm:$0xf]  ;;  %v2542_v2 = vor.u32 %v2881_v62, %v2539_v1  ;;  %v2900_v1 = vld [vmem:[#allocation8 + $0x124] sm:$0xf0] }
  0xbb   :  { %1666 = vmatpush.bf16.msrb.mxu1 %v2526_v43  ;;  %v2486_v5 = vor.u32 %v2867_v36, %v2483_v63  ;;  %v2885_v43 = vld [vmem:[#allocation8 + $0xb4] sm:$0xf] }
  0xbc   :  { %1679 = vmatpush.bf16.msrb.mxu2 %v2590_v20  ;;  %v2531_v20 = vld [vmem:[#allocation8 + $0x88] sm:$0xf0] }
  0xbd   :  { %v2534_v12 = vor.u32 %v2879_v8, %v2531_v20  ;;  %v2897_v8 = vld [vmem:[#allocation8 + $0x114] sm:$0xf] }
  0xbe   :  { %v1104_v17 = vpop.f32.mrf.mxu0  ;;  %v1128_v29 = vpop.f32.mrf.mxu2 }
  0xbf   :  { %1667 = vmatpush.bf16.msrb.mxu1 %v2518_v46  ;;  %v1117_v23 = vpop.f32.mrf.mxu1  ;;  %v1141_v26 = vpop.f32.mrf.mxu3  ;;  %v2554_v46 = vor.u32 %v2886_v42, %v2553_v41  ;;  %v1129_v47 = vadd.f32 %v1128_v29, %v1116_v39  ;;  %v2906_v39 = vld [vmem:[#allocation8 + $0x154] sm:$0xf0] }
  0xc0   :  { %1680 = vmatpush.bf16.msrb.mxu2 %v2582_v14  ;;  %v2910_v23 = vld [vmem:[#allocation8 + $0x174] sm:$0xf0] }
  0xc1   :  { %1644 = vmatpush.bf16.msra.mxu3 %v2554_v46  ;;  %v1142_v50 = vadd.f32 %v1141_v26, %v1129_v47  ;;  %v2650_v25 = vor.u32 %v2910_v23, %v2649_v22  ;;  %v2651_v26 = vld [vmem:[#allocation8 + $0x178] sm:$0xf0] }
  0xc2   :  { %v2654_v29 = vor.u32 %v2909_v24, %v2651_v26  ;;  %v300_v24 = vperm.slane %v3189_v0, 2  ;;  %v2918_v0 = vld [vmem:[#allocation10 + $0x38] sm:$0xff] }
  0xc3   :  { %1668 = vmatpush.bf16.msrb.mxu1 %v2510_v49  ;;  %v2558_v49 = vor.u32 %v2885_v43, %v2555_v44  ;;  %1653 = vmatpush.bf16.msrb.mxu0 %v2650_v25  ;;  %v2634_v43 = vor.u32 %v2906_v39, %v2633_v38  ;;  %v2635_v44 = vld [vmem:[#allocation8 + $0x158] sm:$0xf0] }
  0xc4   :  { %1681 = vmatpush.bf16.msrb.mxu2 %v2574_v30  ;;  %v2907_v30 = vld [vmem:[#allocation8 + $0x164] sm:$0xf] }
  0xc5   :  { %1645 = vmatpush.bf16.msra.mxu3 %v2546_v57  ;;  %v2646_v35 = vor.u32 %v2907_v30, %v2643_v32 }
  0xc6   :  { %v1130_v48 = vpop.f32.mrf.mxu2 }
  0xc7   :  { %1669 = vmatpush.bf16.msrb.mxu1 %v2502_v54  ;;  %v1143_v45 = vpop.f32.mrf.mxu3  ;;  %v2883_v54 = vld [vmem:[#allocation8 + $0xa4] sm:$0xf] }
  0xc8   :  { %1682 = vmatpush.bf16.msrb.mxu2 %v2566_v40  ;;  %v2550_v59 = vor.u32 %v2883_v54, %v2547_v58  ;;  %v2905_v40 = vld [vmem:[#allocation8 + $0x154] sm:$0xf]  ;;  %v2902_v58 = vld [vmem:[#allocation8 + $0x134] sm:$0xf0] }
  0xc9   :  { %v2638_v47 = vor.u32 %v2905_v40, %v2635_v44 }
  0xcb   :  { %1670 = vmatpush.bf16.msrb.mxu1 %v2494_v31  ;;  %v2537_v31 = vld [vmem:[#allocation8 + $0x90] sm:$0xf] }
  0xcc   :  { %1683 = vmatpush.bf16.msrb.mxu2 %v2558_v49  ;;  %v2538_v63 = vor.u32 %v2882_v61, %v2537_v31  ;;  %v2625_v49 = vld [vmem:[#allocation8 + $0x140] sm:$0xf] }
  0xce   :  { %1646 = vmatpush.bf16.msra.mxu3 %v2538_v63  ;;  %v2609_v63 = vld [vmem:[#allocation8 + $0x120] sm:$0xf] }
  0xcf   :  { %1671 = vmatpush.bf16.msrb.mxu1 %v2486_v5 }
  0xd0   :  { %1684 = vmatpush.bf16.msrb.mxu2 %v2550_v59  ;;  %v2901_v59 = vld [vmem:[#allocation8 + $0x134] sm:$0xf] }
  0xd2   :  { %1647 = vmatpush.bf16.msra.mxu3 %v2530_v10  ;;  %v2603_v10 = vld [vmem:[#allocation8 + $0x118] sm:$0xf0] }
  0xd3   :  { %1672 = vmatpush.bf16.msrb.mxu1 %v2478_v18  ;;  %v2606_v20 = vor.u32 %v2897_v8, %v2603_v10 }
  0xd4   :  { %1685 = vmatpush.bf16.msrb.mxu2 %v2542_v2  ;;  %v2899_v2 = vld [vmem:[#allocation8 + $0x124] sm:$0xf] }
  0xd6   :  { %v1154_v51 = vpop.f32.mrf.mxu0  ;;  %1692 = vmatpush.bf16.msrb.mxu3 %v2654_v29 }
  0xd7   :  { %1673 = vmatpush.bf16.msrb.mxu1 %v2470_v34  ;;  %v1155_v55 = vadd.f32 %v1154_v51, %v1142_v50  ;;  %v1167_v56 = vpop.f32.mrf.mxu1  ;;  %v2642_v34 = vor.u32 %v2908_v28, %v2641_v27  ;;  %v2904_v50 = vld [vmem:[#allocation8 + $0x144] sm:$0xf0]  ;;  %v2903_v51 = vld [vmem:[#allocation8 + $0x144] sm:$0xf] }
  0xd8   :  { %1686 = vmatpush.bf16.msrb.mxu2 %v2534_v12  ;;  %v2626_v54 = vor.u32 %v2904_v50, %v2625_v49  ;;  %v2915_v49 = vld [vmem:[#allocation10 + $0x20] sm:$0xff]  ;;  %v2924_v50 = vld [vmem:[#allocation10 + $0x68] sm:$0xff] }
  0xd9   :  { %v1168_v60 = vadd.f32 %v1167_v56, %v1155_v55  ;;  %1654 = vmatpush.bf16.msrb.mxu0 %v2642_v34  ;;  %v2630_v55 = vor.u32 %v2903_v51, %v2627_v52  ;;  %v2617_v56 = vld [vmem:[#allocation8 + $0x130] sm:$0xf]  ;;  %v2914_v51 = vld [vmem:[#allocation10 + $0x18] sm:$0xff]  ;;  %v2923_v52 = vld [vmem:[#allocation10 + $0x60] sm:$0xff] }
  0xda   :  { %1693 = vmatpush.bf16.msrb.mxu3 %v2646_v35  ;;  %v2618_v62 = vor.u32 %v2902_v58, %v2617_v56 }
  0xdb   :  { %v1327_v36 = vmax.f32 %v1168_v60, 0.0  ;;  %v2619_v60 = vld [vmem:[#allocation8 + $0x138] sm:$0xf0] }
  0xdd   :  { %v1330_v3 = vpack.c.bf16 %v1327_v36, %v1327_v36  ;;  %1655 = vmatpush.bf16.msrb.mxu0 %v2634_v43  ;;  %v2622_v36 = vor.u32 %v2901_v59, %v2619_v60  ;;  %v2912_v59 = vld [vmem:[#allocation10 + $0x8] sm:$0xff]  ;;  %v2921_v60 = vld [vmem:[#allocation10 + $0x50] sm:$0xff] }
  0xde   :  { %v1180_v4 = vpop.f32.mrf.mxu2  ;;  %v1156_v5 = vpop.f32.mrf.mxu0  ;;  %1694 = vmatpush.bf16.msrb.mxu3 %v2638_v47  ;;  %v2916_v47 = vld [vmem:[#allocation10 + $0x28] sm:$0xff] }
  0xdf   :  { %1635 = vmatmul.bf16.vlgmr.msra.gmra.mxu2 %v1330_v3  ;;  %1674 = vmatmul.bf16.vlgmr.msrb.gmra.mxu1 %v1330_v3  ;;  %v1169_v9 = vpop.f32.mrf.mxu1  ;;  %v1193_v11 = vpop.f32.mrf.mxu3  ;;  %v1181_v15 = vadd.f32 %v1180_v4, %v299_v21  ;;  %v2611_v3 = vld [vmem:[#allocation8 + $0x128] sm:$0xf0]  ;;  %v2610_v4 = vor.u32 %v2900_v1, %v2609_v63  ;;  %v2896_v21 = vld [vmem:[#allocation8 + $0x104] sm:$0xf0] }
  0xe0   :  { %v2614_v5 = vor.u32 %v2899_v2, %v2611_v3  ;;  %v2602_v9 = vor.u32 %v2898_v7, %v2601_v6 }
  0xe1   :  { %v1194_v16 = vadd.f32 %v1193_v11, %v1181_v15  ;;  %1656 = vmatpush.bf16.msrb.mxu0 %v2626_v54  ;;  %v2922_v54 = vld [vmem:[#allocation10 + $0x58] sm:$0xff] }
  0xe2   :  { %1695 = vmatpush.bf16.msrb.mxu3 %v2630_v55 }
  0xe5   :  { %1657 = vmatpush.bf16.msrb.mxu0 %v2618_v62  ;;  %v2919_v62 = vld [vmem:[#allocation10 + $0x40] sm:$0xff] }
  0xe6   :  { %v1182_v13 = vpop.f32.mrf.mxu2  ;;  %1696 = vmatpush.bf16.msrb.mxu3 %v2622_v36  ;;  %v1381_v36 = vld [vmem:[%s3207_s4] sm:$0x3] }
  0xe7   :  { %v1195_v14 = vpop.f32.mrf.mxu3  ;;  %v2593_v13 = vld [vmem:[#allocation8 + $0x100] sm:$0xf]  ;;  %v1383_v63 = vperm.slane %v1381_v36, 0  ;;  %v1384_v2 = vperm.slane %v1381_v36, 1 }
  0xe8   :  { %v2895_v14 = vld [vmem:[#allocation8 + $0x104] sm:$0xf]  ;;  %v2594_v15 = vor.u32 %v2896_v21, %v2593_v13 }
  0xe9   :  { %1658 = vmatpush.bf16.msrb.mxu0 %v2610_v4 }
  0xea   :  { %1697 = vmatpush.bf16.msrb.mxu3 %v2614_v5 }
  0xed   :  { %1659 = vmatpush.bf16.msrb.mxu0 %v2602_v9 }
  0xee   :  { %1698 = vmatpush.bf16.msrb.mxu3 %v2606_v20 }
  0xf1   :  { %1660 = vmatpush.bf16.msrb.mxu0 %v2594_v15  ;;  %v2939_v15 = vld [vmem:[%s3209_s6] ss:$0 sm:$0xff] }
  0xf5   :  { %1841 = vmatpush.bf16.msra.mxu0 %v2918_v0 }
  0xf6   :  { %v1206_v17 = vpop.f32.mrf.mxu0 }
  0xf7   :  { %v1207_v18 = vadd.f32 %v1206_v17, %v1194_v16  ;;  %v1219_v19 = vpop.f32.mrf.mxu1  ;;  %v2595_v16 = vld [vmem:[#allocation8 + $0x108] sm:$0xf0] }
  0xf8   :  { %v2598_v17 = vor.u32 %v2895_v14, %v2595_v16 }
  0xf9   :  { %v1220_v33 = vadd.f32 %v1219_v19, %v1207_v18 }
  0xfa   :  { %1699 = vmatpush.bf16.msrb.mxu3 %v2598_v17 }
  0xfe   :  { %v1232_v37 = vpop.f32.mrf.mxu2  ;;  %v1208_v42 = vpop.f32.mrf.mxu0 }
  0xff   :  { %v1233_v41 = vadd.f32 %v1232_v37, %v1220_v33  ;;  %v1245_v45 = vpop.f32.mrf.mxu3  ;;  %v1221_v46 = vpop.f32.mrf.mxu1 }
 0x100   :  { %v2926_v46 = vld [vmem:[#allocation10 + $0x78] sm:$0xff] }
 0x101   :  { %v1246_v48 = vadd.f32 %v1245_v45, %v1233_v41  ;;  %v2917_v45 = vld [vmem:[#allocation10 + $0x30] sm:$0xff]  ;;  %1854 = vmatpush.bf16.msra.mxu1 %v2926_v46 }
 0x102   :  { %1842 = vmatpush.bf16.msra.mxu0 %v2917_v45 }
 0x103   :  { %v1328_v53 = vmax.f32 %v1246_v48, 0.0  ;;  %v2925_v48 = vld [vmem:[#allocation10 + $0x70] sm:$0xff] }
 0x105   :  { %v1331_v57 = vpack.c.bf16 %v1328_v53, %v1328_v53  ;;  %1855 = vmatpush.bf16.msra.mxu1 %v2925_v48  ;;  %v2913_v53 = vld [vmem:[#allocation10 + $0x10] sm:$0xff] }
 0x106   :  { %v1234_v31 = vpop.f32.mrf.mxu2  ;;  %1843 = vmatpush.bf16.msra.mxu0 %v2916_v47 }
 0x107   :  { %1648 = vmatmul.bf16.vlgmr.msra.gmra.mxu3 %v1331_v57  ;;  %1687 = vmatmul.bf16.vlgmr.msrb.gmra.mxu2 %v1331_v57  ;;  %v1247_v61 = vpop.f32.mrf.mxu3  ;;  %v2911_v31 = vld [vmem:[#allocation10] sm:$0xff] }
 0x108   :  { %v2920_v61 = vld [vmem:[#allocation10 + $0x48] sm:$0xff] }
 0x109   :  { %1856 = vmatpush.bf16.msra.mxu1 %v2924_v50 }
 0x10a   :  { %1844 = vmatpush.bf16.msra.mxu0 %v2915_v49 }
 0x10d   :  { %1857 = vmatpush.bf16.msra.mxu1 %v2923_v52 }
 0x10e   :  { %1845 = vmatpush.bf16.msra.mxu0 %v2914_v51 }
 0x111   :  { %1858 = vmatpush.bf16.msra.mxu1 %v2922_v54 }
 0x112   :  { %1846 = vmatpush.bf16.msra.mxu0 %v2913_v53 }
 0x115   :  { %1859 = vmatpush.bf16.msra.mxu1 %v2921_v60 }
 0x116   :  { %v1258_v11 = vpop.f32.mrf.mxu0  ;;  %1847 = vmatpush.bf16.msra.mxu0 %v2912_v59 }
 0x117   :  { %v1271_v12 = vpop.f32.mrf.mxu1  ;;  %v1259_v25 = vadd.f32 %v1258_v11, %v300_v24 }
 0x119   :  { %v1272_v28 = vadd.f32 %v1271_v12, %v1259_v25  ;;  %1860 = vmatpush.bf16.msra.mxu1 %v2920_v61 }
 0x11a   :  { %1848 = vmatpush.bf16.msra.mxu0 %v2911_v31 }
 0x11d   :  { %1861 = vmatpush.bf16.msra.mxu1 %v2919_v62 }
 0x11e   :  { %v1260_v18 = vpop.f32.mrf.mxu0  ;;  %v1284_v22 = vpop.f32.mrf.mxu2 }
 0x11f   :  { %v1273_v19 = vpop.f32.mrf.mxu1  ;;  %v1297_v23 = vpop.f32.mrf.mxu3  ;;  %v1285_v29 = vadd.f32 %v1284_v22, %v1272_v28 }
 0x121   :  { %v1298_v30 = vadd.f32 %v1297_v23, %v1285_v29 }
 0x126   :  { %v1286_v26 = vpop.f32.mrf.mxu2 }
 0x127   :  { %v1299_v27 = vpop.f32.mrf.mxu3 }
 0x136   :  { %v1310_v32 = vpop.f32.mrf.mxu0 }
 0x137   :  { %v1311_v33 = vadd.f32 %v1310_v32, %v1298_v30  ;;  %v1323_v34 = vpop.f32.mrf.mxu1 }
 0x139   :  { %v1324_v35 = vadd.f32 %v1323_v34, %v1311_v33 }
 0x13b   :  { %v1329_v37 = vmax.f32 %v1324_v35, 0.0 }
 0x13d   :  { %v1332_v38 = vpack.c.bf16 %v1329_v37, %v1329_v37 }
 0x13e   :  { %v1312_v39 = vpop.f32.mrf.mxu0 }
 0x13f   :  { %v1325_v40 = vpop.f32.mrf.mxu1  ;;  %1661 = vmatmul.bf16.vlgmr.msrb.gmra.mxu0 %v1332_v38  ;;  %1700 = vmatmul.bf16.vlgmr.msrb.gmra.mxu3 %v1332_v38 }
 0x15c   :  { %v1675_v41 = vpop.f32.mrf.mxu1 }
 0x15d   :  { %v1676_v6 = vadd.f32 %v1675_v41, %v1384_v2 }
 0x162   :  { %v1636_v42 = vpop.f32.mrf.mxu2 }
 0x163   :  { %v1637_v1 = vadd.f32 %v1636_v42, %v1383_v63 }
 0x164   :  { %v1677_v43 = vpop.f32.mrf.mxu1 }
 0x16a   :  { %v1638_v44 = vpop.f32.mrf.mxu2 }
 0x18a   :  { %v1649_v55 = vpop.f32.mrf.mxu3  ;;  %v1688_v56 = vpop.f32.mrf.mxu2 }
 0x18b   :  { %v1650_v3 = vadd.f32 %v1649_v55, %v1637_v1  ;;  %v1689_v8 = vadd.f32 %v1688_v56, %v1676_v6 }
 0x192   :  { %v1651_v57 = vpop.f32.mrf.mxu3  ;;  %v1690_v58 = vpop.f32.mrf.mxu2 }
 0x1bc   :  { %v1662_v4 = vpop.f32.mrf.mxu0 }
 0x1bd   :  { %v1663_v5 = vadd.f32 %v1662_v4, %v1650_v3 }
 0x1bf   :  { %v1705_v7 = vmax.f32 %v1663_v5, 0.0 }
 0x1c1   :  { %v1707_v9 = vpack.c.bf16 %v1705_v7, %v1705_v7 }
 0x1c2   :  { %v1701_v10 = vpop.f32.mrf.mxu3 }
 0x1c3   :  { %v1702_v20 = vadd.f32 %v1701_v10, %v1689_v8  ;;  %1849 = vmatmul.bf16.vlgmr.msra.gmra.mxu0 %v1707_v9 }
 0x1c4   :  { %v1664_v11 = vpop.f32.mrf.mxu0 }
 0x1c5   :  { %v1706_v12 = vmax.f32 %v1702_v20, 0.0 }
 0x1c7   :  { %v1708_v13 = vpack.c.bf16 %v1706_v12, %v1706_v12 }
 0x1c9   :  { %1862 = vmatmul.bf16.vlgmr.msra.gmra.mxu1 %v1708_v13 }
 0x1ca   :  { %v1703_v21 = vpop.f32.mrf.mxu3 }
 0x240   :  { %v1850_v14 = vpop.f32.mrf.mxu0 }
 0x241   :  { %v1851_v16 = vadd.f32 %v2939_v15, %v1850_v14 }
 0x246   :  { %v1863_v17 = vpop.f32.mrf.mxu1 }
 0x247   :  { %v1864_v18 = vadd.f32 %v1863_v17, %v1851_v16 }
 0x248   :  { %v1852_v19 = vpop.f32.mrf.mxu0 }
 0x249   :  { %1867 = vst [vmem:[#allocation11] sm:$0xff] %v1864_v18 }
 0x24a   :  { %1878 = dma.vmem_to_hbm [thread:$0]  %s1874_s8, 128, %s1876_s11, [#allocation4]  }
 0x24e   :  { %v1865_v22 = vpop.f32.mrf.mxu1 }
 0x24f   :  { %3090 = dma.done.wait [#allocation4], 128  }
 0x250   :  { %3091 = vsyncadd [#allocation4], 4294967168 }
 0x251   :  { %1883 = vsyncpa [#allocation3], 1 }
 0x252   :  { %1884 = vsyncpa [#allocation6], 1 }
 0x253   :  { %1885 = vsyncpa [#allocation9], 1 }
 0x254   :  { %1886 = vsyncpa [#allocation4], 1 }

</bundles_post_ra>
